<compile_context>
chip_gen: v5e
topology: v5e:2x2
jax: 0.10.0
libtpu: 0.0.40
codegen_flags: <defaults>
</compile_context>

<pallas_src>
import math

import jax
import jax.numpy as jnp
from jax.experimental import pallas as pl
from jax.experimental.pallas import tpu as pltpu


# Column offsets inside the packed per-row parameter plane `pp` (lane axis).
PP_W1 = 0              # conv1 folded weights: 3 out x 1 in x 3 taps
PP_B1 = PP_W1 + 9      # conv1 folded bias:    3
PP_W2 = PP_B1 + 3      # conv2 folded weights: 5 out x 3 in x 3
PP_B2 = PP_W2 + 45     # conv2 folded bias:    5
PP_W3 = PP_B2 + 5      # conv3 folded weights: 5 out x 5 in x 3
PP_B3 = PP_W3 + 75     # conv3 folded bias:    5
PP_SEL = PP_B3 + 5     # 1.0 for real-branch rows, 0.0 for imag-branch rows
PP_WIDTH = PP_SEL + 1  # = 143 used columns
PP_PAD = 256           # lane-aligned padded width of the pp plane


def convnet_kernel(x_ref, pp_ref, wt_ref, fb_ref, out_ref):
    x = x_ref[...]          # (RT, L) f32 — stacked real|imag batch rows
    pp = pp_ref[...]        # (RT, PP_PAD) f32 — per-row folded conv/BN coefs
    L = x.shape[-1]

    def col(j):             # per-row coefficient column, broadcasts over lanes
        return pp[:, j:j + 1]

    def taps(a):
        # (a[l-1], a[l], a[l+1]) along lanes with zero edge padding
        # (PyTorch conv1d padding=1).  Static lane slices + concat: direction
        # is explicit and no iota/compare masks are needed.
        z = jnp.zeros((a.shape[0], 1), a.dtype)
        return (jnp.concatenate([z, a[:, :-1]], axis=1),   # element l sees a[l-1]
                a,                                          # element l sees a[l]
                jnp.concatenate([a[:, 1:], z], axis=1))     # element l sees a[l+1]

    def conv_bn_relu(chans, w_off, b_off, cout):
        # i-outer / o-inner: only ONE input channel's tap planes are live at a
        # time, plus `cout` accumulators — keeps vreg pressure low for large
        # row tiles.  Weight layout matches w.reshape(-1): (o*cin + i)*3 + k.
        cin = len(chans)
        accs = [None] * cout
        for i in range(cin):
            tl, tc, tr = taps(chans[i])
            for o in range(cout):
                base = w_off + (o * cin + i) * 3
                term = tl * col(base) + tc * col(base + 1) + tr * col(base + 2)
                accs[o] = term if accs[o] is None else accs[o] + term
        return [jnp.maximum(accs[o] + col(b_off + o), 0.0) for o in range(cout)]

    # --- Conv1d(1->3, k=3, p=1, bias=False) + folded BatchNorm1d + ReLU -----
    h1 = conv_bn_relu([x], PP_W1, PP_B1, 3)

    # --- MaxPool1d(k=3, s=1, p=1) -------------------------------------------
    # h1 >= 0 (post-ReLU), so zero edge padding is equivalent to PyTorch's
    # implicit -inf padding.  Dropout(0.3): identity in eval mode.
    p1 = []
    for c in h1:
        tl, tc, tr = taps(c)
        p1.append(jnp.maximum(jnp.maximum(tl, tc), tr))

    # --- Conv1d(3->5) + BN + ReLU, then Conv1d(5->5) + BN + ReLU -------------
    h2 = conv_bn_relu(p1, PP_W2, PP_B2, 5)
    h3 = conv_bn_relu(h2, PP_W3, PP_B3, 5)

    # --- mean over channel dim (torch.mean(x, dim=1)) ------------------------
    m = (h3[0] + h3[1] + h3[2] + h3[3] + h3[4]) * jnp.float32(0.2)   # (RT, L)

    # --- Both branches' Linear(L, L) as ONE MXU op ----------------------------
    # (RT, L) @ (L, 2L) against [W_real^T | W_imag^T] in bf16, f32 accumulate.
    res = jnp.dot(m.astype(jnp.bfloat16), wt_ref[...],
                  preferred_element_type=jnp.float32)                 # (RT, 2L)
    res = res + fb_ref[...]                      # (1, 2L) grid-invariant biases
    is_real = col(PP_SEL) > jnp.float32(0.5)     # (RT, 1) boolean row mask
    out_ref[...] = jnp.where(is_real, res[:, :L], res[:, L:]).astype(out_ref.dtype)


# ----------------------------- wrapper / parameter glue ---------------------

def _pack_rows(params, nrows, is_real):
    """Per-row packed conv/BN coefficients (lane-padded) for one branch."""
    w1, b1, w2, b2, w3, b3, _fc_wT, _fc_b = params
    coefs = jnp.concatenate([
        w1.reshape(-1), b1, w2.reshape(-1), b2, w3.reshape(-1), b3,
        jnp.array([1.0 if is_real else 0.0], jnp.float32),
    ]).astype(jnp.float32)                                   # (PP_WIDTH,)
    coefs = jnp.pad(coefs, (0, PP_PAD - PP_WIDTH))           # lane-aligned 256
    return jnp.tile(coefs[None, :], (nrows, 1))              # (nrows, PP_PAD)


def _choose_row_tile(rows):
    """Largest multiple-of-8 row tile (<=128) that still allows >=2 grid steps
    when the row count permits (keeps both v7x TensorCores busy)."""
    half = -(-rows // 2)          # ceil(rows / 2)
    half8 = -(-half // 8) * 8     # round up to sublane multiple
    return max(8, min(128, half8))


def _invariant_spec(block_shape):
    """Grid-invariant operand: constant index_map; single-buffered when the
    installed Pallas supports pipeline_mode=pl.Buffered(1)."""
    idx = lambda r: (0, 0)
    if hasattr(pl, "Buffered"):
        try:
            return pl.BlockSpec(block_shape, idx, pipeline_mode=pl.Buffered(1))
        except TypeError:
            pass
    return pl.BlockSpec(block_shape, idx)


@jax.jit
def convnet_forward(real, imag, real_params, imag_params):
    """real/imag: (B, 1, L) — PyTorch NCL layout with C=1. Returns two (B, L)."""
    assert real.shape == imag.shape and real.shape[1] == 1
    B, _, L = real.shape
    rows = 2 * B

    # Stack both branches' batches along sublanes: rows [0,B) real, [B,2B) imag.
    x = jnp.concatenate([real[:, 0, :], imag[:, 0, :]], axis=0).astype(jnp.float32)
    pp = jnp.concatenate([_pack_rows(real_params, B, True),
                          _pack_rows(imag_params, B, False)], axis=0)
    # Grid-invariant operands (DMA'd once; single-buffered):
    #   both FC weights side by side in bf16 (MXU-native), and both FC biases.
    wt = jnp.concatenate([real_params[6], imag_params[6]],
                         axis=1).astype(jnp.bfloat16)                 # (L, 2L)
    fb = jnp.concatenate([real_params[7], imag_params[7]]
                         )[None, :].astype(jnp.float32)               # (1, 2L)

    rt = _choose_row_tile(rows)
    rp = pl.cdiv(rows, rt) * rt
    if rp != rows:                                  # pad to full row tiles
        pad = rp - rows
        x = jnp.pad(x, ((0, pad), (0, 0)))
        pp = jnp.pad(pp, ((0, pad), (0, 0)))        # filler rows sliced off below

    # Rough per-step VMEM footprint: streamed (double-buffered) tiles, the
    # resident FC weight/bias, and ~16 live f32 planes in the conv pipeline.
    est = (2 * rt * L * 4 + 2 * rt * PP_PAD * 4 + 2 * rt * L * 4
           + L * 2 * L * 2 + 2 * L * 4
           + 16 * rt * L * 4)
    cp_kwargs = dict(dimension_semantics=("parallel",))
    if est > 12 * 1024 * 1024:       # only raise above the conservative default
        cp_kwargs["vmem_limit_bytes"] = int(min(est * 5 // 4, 64 * 1024 * 1024))

    out = pl.pallas_call(
        convnet_kernel,
        out_shape=jax.ShapeDtypeStruct((rp, L), jnp.float32),
        grid=(rp // rt,),
        in_specs=[
            pl.BlockSpec((rt, L), lambda r: (r, 0)),        # stacked inputs
            pl.BlockSpec((rt, PP_PAD), lambda r: (r, 0)),   # per-row coefs
            _invariant_spec((L, 2 * L)),                    # fused FC weight
            _invariant_spec((1, 2 * L)),                    # fused FC bias
        ],
        out_specs=pl.BlockSpec((rt, L), lambda r: (r, 0)),
        compiler_params=pltpu.CompilerParams(**cp_kwargs),
    )(x, pp, wt, fb)
    return out[:B], out[B:rows]


def _fold_bn(w, gamma, beta, mu, var, eps=1e-5):
    """Fold eval-mode BatchNorm1d (running stats) into the preceding conv."""
    s = gamma / jnp.sqrt(var + eps)
    return w * s[:, None, None], beta - s * mu


def init_branch_params(key, L):
    """One ConvNet branch: conv stack (BN folded, eval mode) + Linear(L, L)."""
    ks = jax.random.split(key, 16)
    w1 = jax.random.normal(ks[0], (3, 1, 3), jnp.float32) / math.sqrt(1 * 3)
    w2 = jax.random.normal(ks[1], (5, 3, 3), jnp.float32) / math.sqrt(3 * 3)
    w3 = jax.random.normal(ks[2], (5, 5, 3), jnp.float32) / math.sqrt(5 * 3)

    def bn(kg, kb, km, kv, c):
        gamma = 1.0 + 0.1 * jax.random.normal(kg, (c,), jnp.float32)
        beta = 0.1 * jax.random.normal(kb, (c,), jnp.float32)
        mu = 0.1 * jax.random.normal(km, (c,), jnp.float32)
        var = jnp.abs(jax.random.normal(kv, (c,), jnp.float32)) + 0.5
        return gamma, beta, mu, var

    g1, be1, m1, v1 = bn(ks[3], ks[4], ks[5], ks[6], 3)
    g2, be2, m2, v2 = bn(ks[7], ks[8], ks[9], ks[10], 5)
    g3, be3, m3, v3 = bn(ks[11], ks[12], ks[13], ks[14], 5)
    w1f, b1f = _fold_bn(w1, g1, be1, m1, v1)
    w2f, b2f = _fold_bn(w2, g2, be2, m2, v2)
    w3f, b3f = _fold_bn(w3, g3, be3, m3, v3)

    kfw, kfb = jax.random.split(ks[15])
    bound = 1.0 / math.sqrt(L)
    fc_w = jax.random.uniform(kfw, (L, L), jnp.float32, -bound, bound)
    fc_b = jax.random.uniform(kfb, (L,), jnp.float32, -bound, bound)
    # fc_w stored transposed so that y = x @ fc_wT + b.
    return (w1f, b1f, w2f, b2f, w3f, b3f, fc_w.T, fc_b)


# ----------------------------- pure-JAX reference (for sanity check) --------

def _ref_branch(x, params):
    """One branch in eval mode (BN folded, dropout=identity). x: (B, L) f32."""
    w1, b1, w2, b2, w3, b3, fc_wT, fc_b = params
    L = x.shape[-1]

    def conv_bn_relu(h, w, b):                 # h: (B, Cin, L); w: (Cout, Cin, 3)
        hp = jnp.pad(h, ((0, 0), (0, 0), (1, 1)))
        outs = []
        for o in range(w.shape[0]):
            acc = jnp.zeros(h.shape[:1] + (L,), jnp.float32) + b[o]
            for i in range(w.shape[1]):
                for k in range(3):
                    acc = acc + hp[:, i, k:k + L] * w[o, i, k]
            outs.append(jnp.maximum(acc, 0.0))
        return jnp.stack(outs, axis=1)

    h = conv_bn_relu(x[:, None, :], w1, b1)                          # (B, 3, L)
    hp = jnp.pad(h, ((0, 0), (0, 0), (1, 1)), constant_values=-jnp.inf)
    h = jnp.maximum(jnp.maximum(hp[:, :, 0:L], hp[:, :, 1:L + 1]),
                    hp[:, :, 2:L + 2])                               # maxpool
    h = conv_bn_relu(h, w2, b2)                                      # (B, 5, L)
    h = conv_bn_relu(h, w3, b3)                                      # (B, 5, L)
    m = jnp.mean(h, axis=1)                                          # (B, L)
    # Mirror the kernel's bf16 MXU inputs (f32 accumulation).  Deliberate
    # (small) deviation from PyTorch's fp32 Linear — inference-grade.
    m16 = m.astype(jnp.bfloat16).astype(jnp.float32)
    w16 = fc_wT.astype(jnp.bfloat16).astype(jnp.float32)
    return jnp.dot(m16, w16, precision=jax.lax.Precision.HIGHEST) + fc_b[None, :]


if __name__ == "__main__":
    # B=12 -> 24 stacked rows -> 16-row tile, 2 "parallel" grid steps (both
    # v7x TensorCores busy) and exercises the filler-row padding path.
    B, L = 12, 128   # in_features = 128
    key = jax.random.PRNGKey(0)
    k_rp, k_ip, k_rx, k_ix = jax.random.split(key, 4)

    real_params = init_branch_params(k_rp, L)
    imag_params = init_branch_params(k_ip, L)
    real = jax.random.normal(k_rx, (B, 1, L), jnp.float32)
    imag = jax.random.normal(k_ix, (B, 1, L), jnp.float32)

    out_real, out_imag = convnet_forward(real, imag, real_params, imag_params)
    jax.block_until_ready((out_real, out_imag))
    assert out_real.shape == (B, L) and out_imag.shape == (B, L)

    # Sanity check against a pure-JAX reference of the same eval-mode forward.
    ref_real = _ref_branch(real[:, 0, :], real_params)
    ref_imag = _ref_branch(imag[:, 0, :], imag_params)
    assert jnp.allclose(out_real, ref_real, atol=5e-3, rtol=5e-3), (
        float(jnp.max(jnp.abs(out_real - ref_real))))
    assert jnp.allclose(out_imag, ref_imag, atol=5e-3, rtol=5e-3), (
        float(jnp.max(jnp.abs(out_imag - ref_imag))))
    print("KERNEL_OK")
</pallas_src>

<mosaic_0001>
module attributes {stable_mosaic.version = 11 : i64} {
  func.func @convnet_kernel(%arg0: i32, %arg1: memref<16x128xf32, #tpu.memory_space<vmem>>, %arg2: memref<16x256xf32, #tpu.memory_space<vmem>>, %arg3: memref<128x256xbf16, #tpu.memory_space<vmem>>, %arg4: memref<1x256xf32, #tpu.memory_space<vmem>>, %arg5: memref<16x128xf32, #tpu.memory_space<vmem>>) attributes {dimension_semantics = [#tpu.dimension_semantics<parallel>], iteration_bounds = array<i64: 2>, scalar_prefetch = 0 : i64, scratch_operands = 0 : i64, tpu.core_type = #tpu.core_type<tc>, window_params = [{transform_indices = @transform_0, window_bounds = array<i64: 16, 128>}, {transform_indices = @transform_1, window_bounds = array<i64: 16, 256>}, {pipeline_mode = #tpu.pipeline_mode<synchronous>, transform_indices = @transform_2, window_bounds = array<i64: 128, 256>}, {pipeline_mode = #tpu.pipeline_mode<synchronous>, transform_indices = @transform_3, window_bounds = array<i64: 1, 256>}, {transform_indices = @transform_4, window_bounds = array<i64: 16, 128>}]} {
    %c0 = arith.constant 0 : index
    %c0_0 = arith.constant 0 : index
    %0 = vector.load %arg1[%c0, %c0_0] : memref<16x128xf32, #tpu.memory_space<vmem>>, vector<16x128xf32>
    %c0_1 = arith.constant 0 : index
    %c0_2 = arith.constant 0 : index
    %1 = vector.load %arg2[%c0_1, %c0_2] : memref<16x256xf32, #tpu.memory_space<vmem>>, vector<16x256xf32>
    %cst = arith.constant 0.000000e+00 : f32
    %2 = vector.broadcast %cst : f32 to vector<16x1xf32>
    %3 = vector.extract_strided_slice %0 {offsets = [0, 0], sizes = [16, 127], strides = [1, 1]} : vector<16x128xf32> to vector<16x127xf32>
    %4 = tpu.concatenate %2, %3 in 1 : vector<16x1xf32>, vector<16x127xf32> -> vector<16x128xf32>
    %5 = vector.extract_strided_slice %0 {offsets = [0, 1], sizes = [16, 127], strides = [1, 1]} : vector<16x128xf32> to vector<16x127xf32>
    %6 = tpu.concatenate %5, %2 in 1 : vector<16x127xf32>, vector<16x1xf32> -> vector<16x128xf32>
    %7 = vector.extract_strided_slice %1 {offsets = [0, 0], sizes = [16, 1], strides = [1, 1]} : vector<16x256xf32> to vector<16x1xf32>
    %8 = vector.broadcast %7 : vector<16x1xf32> to vector<16x128xf32>
    %9 = arith.mulf %4, %8 : vector<16x128xf32>
    %10 = vector.extract_strided_slice %1 {offsets = [0, 1], sizes = [16, 1], strides = [1, 1]} : vector<16x256xf32> to vector<16x1xf32>
    %11 = vector.broadcast %10 : vector<16x1xf32> to vector<16x128xf32>
    %12 = arith.mulf %0, %11 : vector<16x128xf32>
    %13 = arith.addf %9, %12 : vector<16x128xf32>
    %14 = vector.extract_strided_slice %1 {offsets = [0, 2], sizes = [16, 1], strides = [1, 1]} : vector<16x256xf32> to vector<16x1xf32>
    %15 = vector.broadcast %14 : vector<16x1xf32> to vector<16x128xf32>
    %16 = arith.mulf %6, %15 : vector<16x128xf32>
    %17 = arith.addf %13, %16 : vector<16x128xf32>
    %18 = vector.extract_strided_slice %1 {offsets = [0, 3], sizes = [16, 1], strides = [1, 1]} : vector<16x256xf32> to vector<16x1xf32>
    %19 = vector.broadcast %18 : vector<16x1xf32> to vector<16x128xf32>
    %20 = arith.mulf %4, %19 : vector<16x128xf32>
    %21 = vector.extract_strided_slice %1 {offsets = [0, 4], sizes = [16, 1], strides = [1, 1]} : vector<16x256xf32> to vector<16x1xf32>
    %22 = vector.broadcast %21 : vector<16x1xf32> to vector<16x128xf32>
    %23 = arith.mulf %0, %22 : vector<16x128xf32>
    %24 = arith.addf %20, %23 : vector<16x128xf32>
    %25 = vector.extract_strided_slice %1 {offsets = [0, 5], sizes = [16, 1], strides = [1, 1]} : vector<16x256xf32> to vector<16x1xf32>
    %26 = vector.broadcast %25 : vector<16x1xf32> to vector<16x128xf32>
    %27 = arith.mulf %6, %26 : vector<16x128xf32>
    %28 = arith.addf %24, %27 : vector<16x128xf32>
    %29 = vector.extract_strided_slice %1 {offsets = [0, 6], sizes = [16, 1], strides = [1, 1]} : vector<16x256xf32> to vector<16x1xf32>
    %30 = vector.broadcast %29 : vector<16x1xf32> to vector<16x128xf32>
    %31 = arith.mulf %4, %30 : vector<16x128xf32>
    %32 = vector.extract_strided_slice %1 {offsets = [0, 7], sizes = [16, 1], strides = [1, 1]} : vector<16x256xf32> to vector<16x1xf32>
    %33 = vector.broadcast %32 : vector<16x1xf32> to vector<16x128xf32>
    %34 = arith.mulf %0, %33 : vector<16x128xf32>
    %35 = arith.addf %31, %34 : vector<16x128xf32>
    %36 = vector.extract_strided_slice %1 {offsets = [0, 8], sizes = [16, 1], strides = [1, 1]} : vector<16x256xf32> to vector<16x1xf32>
    %37 = vector.broadcast %36 : vector<16x1xf32> to vector<16x128xf32>
    %38 = arith.mulf %6, %37 : vector<16x128xf32>
    %39 = arith.addf %35, %38 : vector<16x128xf32>
    %40 = vector.extract_strided_slice %1 {offsets = [0, 9], sizes = [16, 1], strides = [1, 1]} : vector<16x256xf32> to vector<16x1xf32>
    %41 = vector.broadcast %40 : vector<16x1xf32> to vector<16x128xf32>
    %42 = arith.addf %17, %41 : vector<16x128xf32>
    %cst_3 = arith.constant 0.000000e+00 : f32
    %43 = vector.broadcast %cst_3 : f32 to vector<16x128xf32>
    %44 = arith.maximumf %42, %43 : vector<16x128xf32>
    %45 = vector.extract_strided_slice %1 {offsets = [0, 10], sizes = [16, 1], strides = [1, 1]} : vector<16x256xf32> to vector<16x1xf32>
    %46 = vector.broadcast %45 : vector<16x1xf32> to vector<16x128xf32>
    %47 = arith.addf %28, %46 : vector<16x128xf32>
    %cst_4 = arith.constant 0.000000e+00 : f32
    %48 = vector.broadcast %cst_4 : f32 to vector<16x128xf32>
    %49 = arith.maximumf %47, %48 : vector<16x128xf32>
    %50 = vector.extract_strided_slice %1 {offsets = [0, 11], sizes = [16, 1], strides = [1, 1]} : vector<16x256xf32> to vector<16x1xf32>
    %51 = vector.broadcast %50 : vector<16x1xf32> to vector<16x128xf32>
    %52 = arith.addf %39, %51 : vector<16x128xf32>
    %cst_5 = arith.constant 0.000000e+00 : f32
    %53 = vector.broadcast %cst_5 : f32 to vector<16x128xf32>
    %54 = arith.maximumf %52, %53 : vector<16x128xf32>
    %cst_6 = arith.constant 0.000000e+00 : f32
    %55 = vector.broadcast %cst_6 : f32 to vector<16x1xf32>
    %56 = vector.extract_strided_slice %44 {offsets = [0, 0], sizes = [16, 127], strides = [1, 1]} : vector<16x128xf32> to vector<16x127xf32>
    %57 = tpu.concatenate %55, %56 in 1 : vector<16x1xf32>, vector<16x127xf32> -> vector<16x128xf32>
    %58 = vector.extract_strided_slice %44 {offsets = [0, 1], sizes = [16, 127], strides = [1, 1]} : vector<16x128xf32> to vector<16x127xf32>
    %59 = tpu.concatenate %58, %55 in 1 : vector<16x127xf32>, vector<16x1xf32> -> vector<16x128xf32>
    %60 = arith.maximumf %57, %44 : vector<16x128xf32>
    %61 = arith.maximumf %60, %59 : vector<16x128xf32>
    %cst_7 = arith.constant 0.000000e+00 : f32
    %62 = vector.broadcast %cst_7 : f32 to vector<16x1xf32>
    %63 = vector.extract_strided_slice %49 {offsets = [0, 0], sizes = [16, 127], strides = [1, 1]} : vector<16x128xf32> to vector<16x127xf32>
    %64 = tpu.concatenate %62, %63 in 1 : vector<16x1xf32>, vector<16x127xf32> -> vector<16x128xf32>
    %65 = vector.extract_strided_slice %49 {offsets = [0, 1], sizes = [16, 127], strides = [1, 1]} : vector<16x128xf32> to vector<16x127xf32>
    %66 = tpu.concatenate %65, %62 in 1 : vector<16x127xf32>, vector<16x1xf32> -> vector<16x128xf32>
    %67 = arith.maximumf %64, %49 : vector<16x128xf32>
    %68 = arith.maximumf %67, %66 : vector<16x128xf32>
    %cst_8 = arith.constant 0.000000e+00 : f32
    %69 = vector.broadcast %cst_8 : f32 to vector<16x1xf32>
    %70 = vector.extract_strided_slice %54 {offsets = [0, 0], sizes = [16, 127], strides = [1, 1]} : vector<16x128xf32> to vector<16x127xf32>
    %71 = tpu.concatenate %69, %70 in 1 : vector<16x1xf32>, vector<16x127xf32> -> vector<16x128xf32>
    %72 = vector.extract_strided_slice %54 {offsets = [0, 1], sizes = [16, 127], strides = [1, 1]} : vector<16x128xf32> to vector<16x127xf32>
    %73 = tpu.concatenate %72, %69 in 1 : vector<16x127xf32>, vector<16x1xf32> -> vector<16x128xf32>
    %74 = arith.maximumf %71, %54 : vector<16x128xf32>
    %75 = arith.maximumf %74, %73 : vector<16x128xf32>
    %cst_9 = arith.constant 0.000000e+00 : f32
    %76 = vector.broadcast %cst_9 : f32 to vector<16x1xf32>
    %77 = vector.extract_strided_slice %61 {offsets = [0, 0], sizes = [16, 127], strides = [1, 1]} : vector<16x128xf32> to vector<16x127xf32>
    %78 = tpu.concatenate %76, %77 in 1 : vector<16x1xf32>, vector<16x127xf32> -> vector<16x128xf32>
    %79 = vector.extract_strided_slice %61 {offsets = [0, 1], sizes = [16, 127], strides = [1, 1]} : vector<16x128xf32> to vector<16x127xf32>
    %80 = tpu.concatenate %79, %76 in 1 : vector<16x127xf32>, vector<16x1xf32> -> vector<16x128xf32>
    %81 = vector.extract_strided_slice %1 {offsets = [0, 12], sizes = [16, 1], strides = [1, 1]} : vector<16x256xf32> to vector<16x1xf32>
    %82 = vector.broadcast %81 : vector<16x1xf32> to vector<16x128xf32>
    %83 = arith.mulf %78, %82 : vector<16x128xf32>
    %84 = vector.extract_strided_slice %1 {offsets = [0, 13], sizes = [16, 1], strides = [1, 1]} : vector<16x256xf32> to vector<16x1xf32>
    %85 = vector.broadcast %84 : vector<16x1xf32> to vector<16x128xf32>
    %86 = arith.mulf %61, %85 : vector<16x128xf32>
    %87 = arith.addf %83, %86 : vector<16x128xf32>
    %88 = vector.extract_strided_slice %1 {offsets = [0, 14], sizes = [16, 1], strides = [1, 1]} : vector<16x256xf32> to vector<16x1xf32>
    %89 = vector.broadcast %88 : vector<16x1xf32> to vector<16x128xf32>
    %90 = arith.mulf %80, %89 : vector<16x128xf32>
    %91 = arith.addf %87, %90 : vector<16x128xf32>
    %92 = vector.extract_strided_slice %1 {offsets = [0, 21], sizes = [16, 1], strides = [1, 1]} : vector<16x256xf32> to vector<16x1xf32>
    %93 = vector.broadcast %92 : vector<16x1xf32> to vector<16x128xf32>
    %94 = arith.mulf %78, %93 : vector<16x128xf32>
    %95 = vector.extract_strided_slice %1 {offsets = [0, 22], sizes = [16, 1], strides = [1, 1]} : vector<16x256xf32> to vector<16x1xf32>
    %96 = vector.broadcast %95 : vector<16x1xf32> to vector<16x128xf32>
    %97 = arith.mulf %61, %96 : vector<16x128xf32>
    %98 = arith.addf %94, %97 : vector<16x128xf32>
    %99 = vector.extract_strided_slice %1 {offsets = [0, 23], sizes = [16, 1], strides = [1, 1]} : vector<16x256xf32> to vector<16x1xf32>
    %100 = vector.broadcast %99 : vector<16x1xf32> to vector<16x128xf32>
    %101 = arith.mulf %80, %100 : vector<16x128xf32>
    %102 = arith.addf %98, %101 : vector<16x128xf32>
    %103 = vector.extract_strided_slice %1 {offsets = [0, 30], sizes = [16, 1], strides = [1, 1]} : vector<16x256xf32> to vector<16x1xf32>
    %104 = vector.broadcast %103 : vector<16x1xf32> to vector<16x128xf32>
    %105 = arith.mulf %78, %104 : vector<16x128xf32>
    %106 = vector.extract_strided_slice %1 {offsets = [0, 31], sizes = [16, 1], strides = [1, 1]} : vector<16x256xf32> to vector<16x1xf32>
    %107 = vector.broadcast %106 : vector<16x1xf32> to vector<16x128xf32>
    %108 = arith.mulf %61, %107 : vector<16x128xf32>
    %109 = arith.addf %105, %108 : vector<16x128xf32>
    %110 = vector.extract_strided_slice %1 {offsets = [0, 32], sizes = [16, 1], strides = [1, 1]} : vector<16x256xf32> to vector<16x1xf32>
    %111 = vector.broadcast %110 : vector<16x1xf32> to vector<16x128xf32>
    %112 = arith.mulf %80, %111 : vector<16x128xf32>
    %113 = arith.addf %109, %112 : vector<16x128xf32>
    %114 = vector.extract_strided_slice %1 {offsets = [0, 39], sizes = [16, 1], strides = [1, 1]} : vector<16x256xf32> to vector<16x1xf32>
    %115 = vector.broadcast %114 : vector<16x1xf32> to vector<16x128xf32>
    %116 = arith.mulf %78, %115 : vector<16x128xf32>
    %117 = vector.extract_strided_slice %1 {offsets = [0, 40], sizes = [16, 1], strides = [1, 1]} : vector<16x256xf32> to vector<16x1xf32>
    %118 = vector.broadcast %117 : vector<16x1xf32> to vector<16x128xf32>
    %119 = arith.mulf %61, %118 : vector<16x128xf32>
    %120 = arith.addf %116, %119 : vector<16x128xf32>
    %121 = vector.extract_strided_slice %1 {offsets = [0, 41], sizes = [16, 1], strides = [1, 1]} : vector<16x256xf32> to vector<16x1xf32>
    %122 = vector.broadcast %121 : vector<16x1xf32> to vector<16x128xf32>
    %123 = arith.mulf %80, %122 : vector<16x128xf32>
    %124 = arith.addf %120, %123 : vector<16x128xf32>
    %125 = vector.extract_strided_slice %1 {offsets = [0, 48], sizes = [16, 1], strides = [1, 1]} : vector<16x256xf32> to vector<16x1xf32>
    %126 = vector.broadcast %125 : vector<16x1xf32> to vector<16x128xf32>
    %127 = arith.mulf %78, %126 : vector<16x128xf32>
    %128 = vector.extract_strided_slice %1 {offsets = [0, 49], sizes = [16, 1], strides = [1, 1]} : vector<16x256xf32> to vector<16x1xf32>
    %129 = vector.broadcast %128 : vector<16x1xf32> to vector<16x128xf32>
    %130 = arith.mulf %61, %129 : vector<16x128xf32>
    %131 = arith.addf %127, %130 : vector<16x128xf32>
    %132 = vector.extract_strided_slice %1 {offsets = [0, 50], sizes = [16, 1], strides = [1, 1]} : vector<16x256xf32> to vector<16x1xf32>
    %133 = vector.broadcast %132 : vector<16x1xf32> to vector<16x128xf32>
    %134 = arith.mulf %80, %133 : vector<16x128xf32>
    %135 = arith.addf %131, %134 : vector<16x128xf32>
    %cst_10 = arith.constant 0.000000e+00 : f32
    %136 = vector.broadcast %cst_10 : f32 to vector<16x1xf32>
    %137 = vector.extract_strided_slice %68 {offsets = [0, 0], sizes = [16, 127], strides = [1, 1]} : vector<16x128xf32> to vector<16x127xf32>
    %138 = tpu.concatenate %136, %137 in 1 : vector<16x1xf32>, vector<16x127xf32> -> vector<16x128xf32>
    %139 = vector.extract_strided_slice %68 {offsets = [0, 1], sizes = [16, 127], strides = [1, 1]} : vector<16x128xf32> to vector<16x127xf32>
    %140 = tpu.concatenate %139, %136 in 1 : vector<16x127xf32>, vector<16x1xf32> -> vector<16x128xf32>
    %141 = vector.extract_strided_slice %1 {offsets = [0, 15], sizes = [16, 1], strides = [1, 1]} : vector<16x256xf32> to vector<16x1xf32>
    %142 = vector.broadcast %141 : vector<16x1xf32> to vector<16x128xf32>
    %143 = arith.mulf %138, %142 : vector<16x128xf32>
    %144 = vector.extract_strided_slice %1 {offsets = [0, 16], sizes = [16, 1], strides = [1, 1]} : vector<16x256xf32> to vector<16x1xf32>
    %145 = vector.broadcast %144 : vector<16x1xf32> to vector<16x128xf32>
    %146 = arith.mulf %68, %145 : vector<16x128xf32>
    %147 = arith.addf %143, %146 : vector<16x128xf32>
    %148 = vector.extract_strided_slice %1 {offsets = [0, 17], sizes = [16, 1], strides = [1, 1]} : vector<16x256xf32> to vector<16x1xf32>
    %149 = vector.broadcast %148 : vector<16x1xf32> to vector<16x128xf32>
    %150 = arith.mulf %140, %149 : vector<16x128xf32>
    %151 = arith.addf %147, %150 : vector<16x128xf32>
    %152 = arith.addf %91, %151 : vector<16x128xf32>
    %153 = vector.extract_strided_slice %1 {offsets = [0, 24], sizes = [16, 1], strides = [1, 1]} : vector<16x256xf32> to vector<16x1xf32>
    %154 = vector.broadcast %153 : vector<16x1xf32> to vector<16x128xf32>
    %155 = arith.mulf %138, %154 : vector<16x128xf32>
    %156 = vector.extract_strided_slice %1 {offsets = [0, 25], sizes = [16, 1], strides = [1, 1]} : vector<16x256xf32> to vector<16x1xf32>
    %157 = vector.broadcast %156 : vector<16x1xf32> to vector<16x128xf32>
    %158 = arith.mulf %68, %157 : vector<16x128xf32>
    %159 = arith.addf %155, %158 : vector<16x128xf32>
    %160 = vector.extract_strided_slice %1 {offsets = [0, 26], sizes = [16, 1], strides = [1, 1]} : vector<16x256xf32> to vector<16x1xf32>
    %161 = vector.broadcast %160 : vector<16x1xf32> to vector<16x128xf32>
    %162 = arith.mulf %140, %161 : vector<16x128xf32>
    %163 = arith.addf %159, %162 : vector<16x128xf32>
    %164 = arith.addf %102, %163 : vector<16x128xf32>
    %165 = vector.extract_strided_slice %1 {offsets = [0, 33], sizes = [16, 1], strides = [1, 1]} : vector<16x256xf32> to vector<16x1xf32>
    %166 = vector.broadcast %165 : vector<16x1xf32> to vector<16x128xf32>
    %167 = arith.mulf %138, %166 : vector<16x128xf32>
    %168 = vector.extract_strided_slice %1 {offsets = [0, 34], sizes = [16, 1], strides = [1, 1]} : vector<16x256xf32> to vector<16x1xf32>
    %169 = vector.broadcast %168 : vector<16x1xf32> to vector<16x128xf32>
    %170 = arith.mulf %68, %169 : vector<16x128xf32>
    %171 = arith.addf %167, %170 : vector<16x128xf32>
    %172 = vector.extract_strided_slice %1 {offsets = [0, 35], sizes = [16, 1], strides = [1, 1]} : vector<16x256xf32> to vector<16x1xf32>
    %173 = vector.broadcast %172 : vector<16x1xf32> to vector<16x128xf32>
    %174 = arith.mulf %140, %173 : vector<16x128xf32>
    %175 = arith.addf %171, %174 : vector<16x128xf32>
    %176 = arith.addf %113, %175 : vector<16x128xf32>
    %177 = vector.extract_strided_slice %1 {offsets = [0, 42], sizes = [16, 1], strides = [1, 1]} : vector<16x256xf32> to vector<16x1xf32>
    %178 = vector.broadcast %177 : vector<16x1xf32> to vector<16x128xf32>
    %179 = arith.mulf %138, %178 : vector<16x128xf32>
    %180 = vector.extract_strided_slice %1 {offsets = [0, 43], sizes = [16, 1], strides = [1, 1]} : vector<16x256xf32> to vector<16x1xf32>
    %181 = vector.broadcast %180 : vector<16x1xf32> to vector<16x128xf32>
    %182 = arith.mulf %68, %181 : vector<16x128xf32>
    %183 = arith.addf %179, %182 : vector<16x128xf32>
    %184 = vector.extract_strided_slice %1 {offsets = [0, 44], sizes = [16, 1], strides = [1, 1]} : vector<16x256xf32> to vector<16x1xf32>
    %185 = vector.broadcast %184 : vector<16x1xf32> to vector<16x128xf32>
    %186 = arith.mulf %140, %185 : vector<16x128xf32>
    %187 = arith.addf %183, %186 : vector<16x128xf32>
    %188 = arith.addf %124, %187 : vector<16x128xf32>
    %189 = vector.extract_strided_slice %1 {offsets = [0, 51], sizes = [16, 1], strides = [1, 1]} : vector<16x256xf32> to vector<16x1xf32>
    %190 = vector.broadcast %189 : vector<16x1xf32> to vector<16x128xf32>
    %191 = arith.mulf %138, %190 : vector<16x128xf32>
    %192 = vector.extract_strided_slice %1 {offsets = [0, 52], sizes = [16, 1], strides = [1, 1]} : vector<16x256xf32> to vector<16x1xf32>
    %193 = vector.broadcast %192 : vector<16x1xf32> to vector<16x128xf32>
    %194 = arith.mulf %68, %193 : vector<16x128xf32>
    %195 = arith.addf %191, %194 : vector<16x128xf32>
    %196 = vector.extract_strided_slice %1 {offsets = [0, 53], sizes = [16, 1], strides = [1, 1]} : vector<16x256xf32> to vector<16x1xf32>
    %197 = vector.broadcast %196 : vector<16x1xf32> to vector<16x128xf32>
    %198 = arith.mulf %140, %197 : vector<16x128xf32>
    %199 = arith.addf %195, %198 : vector<16x128xf32>
    %200 = arith.addf %135, %199 : vector<16x128xf32>
    %cst_11 = arith.constant 0.000000e+00 : f32
    %201 = vector.broadcast %cst_11 : f32 to vector<16x1xf32>
    %202 = vector.extract_strided_slice %75 {offsets = [0, 0], sizes = [16, 127], strides = [1, 1]} : vector<16x128xf32> to vector<16x127xf32>
    %203 = tpu.concatenate %201, %202 in 1 : vector<16x1xf32>, vector<16x127xf32> -> vector<16x128xf32>
    %204 = vector.extract_strided_slice %75 {offsets = [0, 1], sizes = [16, 127], strides = [1, 1]} : vector<16x128xf32> to vector<16x127xf32>
    %205 = tpu.concatenate %204, %201 in 1 : vector<16x127xf32>, vector<16x1xf32> -> vector<16x128xf32>
    %206 = vector.extract_strided_slice %1 {offsets = [0, 18], sizes = [16, 1], strides = [1, 1]} : vector<16x256xf32> to vector<16x1xf32>
    %207 = vector.broadcast %206 : vector<16x1xf32> to vector<16x128xf32>
    %208 = arith.mulf %203, %207 : vector<16x128xf32>
    %209 = vector.extract_strided_slice %1 {offsets = [0, 19], sizes = [16, 1], strides = [1, 1]} : vector<16x256xf32> to vector<16x1xf32>
    %210 = vector.broadcast %209 : vector<16x1xf32> to vector<16x128xf32>
    %211 = arith.mulf %75, %210 : vector<16x128xf32>
    %212 = arith.addf %208, %211 : vector<16x128xf32>
    %213 = vector.extract_strided_slice %1 {offsets = [0, 20], sizes = [16, 1], strides = [1, 1]} : vector<16x256xf32> to vector<16x1xf32>
    %214 = vector.broadcast %213 : vector<16x1xf32> to vector<16x128xf32>
    %215 = arith.mulf %205, %214 : vector<16x128xf32>
    %216 = arith.addf %212, %215 : vector<16x128xf32>
    %217 = arith.addf %152, %216 : vector<16x128xf32>
    %218 = vector.extract_strided_slice %1 {offsets = [0, 27], sizes = [16, 1], strides = [1, 1]} : vector<16x256xf32> to vector<16x1xf32>
    %219 = vector.broadcast %218 : vector<16x1xf32> to vector<16x128xf32>
    %220 = arith.mulf %203, %219 : vector<16x128xf32>
    %221 = vector.extract_strided_slice %1 {offsets = [0, 28], sizes = [16, 1], strides = [1, 1]} : vector<16x256xf32> to vector<16x1xf32>
    %222 = vector.broadcast %221 : vector<16x1xf32> to vector<16x128xf32>
    %223 = arith.mulf %75, %222 : vector<16x128xf32>
    %224 = arith.addf %220, %223 : vector<16x128xf32>
    %225 = vector.extract_strided_slice %1 {offsets = [0, 29], sizes = [16, 1], strides = [1, 1]} : vector<16x256xf32> to vector<16x1xf32>
    %226 = vector.broadcast %225 : vector<16x1xf32> to vector<16x128xf32>
    %227 = arith.mulf %205, %226 : vector<16x128xf32>
    %228 = arith.addf %224, %227 : vector<16x128xf32>
    %229 = arith.addf %164, %228 : vector<16x128xf32>
    %230 = vector.extract_strided_slice %1 {offsets = [0, 36], sizes = [16, 1], strides = [1, 1]} : vector<16x256xf32> to vector<16x1xf32>
    %231 = vector.broadcast %230 : vector<16x1xf32> to vector<16x128xf32>
    %232 = arith.mulf %203, %231 : vector<16x128xf32>
    %233 = vector.extract_strided_slice %1 {offsets = [0, 37], sizes = [16, 1], strides = [1, 1]} : vector<16x256xf32> to vector<16x1xf32>
    %234 = vector.broadcast %233 : vector<16x1xf32> to vector<16x128xf32>
    %235 = arith.mulf %75, %234 : vector<16x128xf32>
    %236 = arith.addf %232, %235 : vector<16x128xf32>
    %237 = vector.extract_strided_slice %1 {offsets = [0, 38], sizes = [16, 1], strides = [1, 1]} : vector<16x256xf32> to vector<16x1xf32>
    %238 = vector.broadcast %237 : vector<16x1xf32> to vector<16x128xf32>
    %239 = arith.mulf %205, %238 : vector<16x128xf32>
    %240 = arith.addf %236, %239 : vector<16x128xf32>
    %241 = arith.addf %176, %240 : vector<16x128xf32>
    %242 = vector.extract_strided_slice %1 {offsets = [0, 45], sizes = [16, 1], strides = [1, 1]} : vector<16x256xf32> to vector<16x1xf32>
    %243 = vector.broadcast %242 : vector<16x1xf32> to vector<16x128xf32>
    %244 = arith.mulf %203, %243 : vector<16x128xf32>
    %245 = vector.extract_strided_slice %1 {offsets = [0, 46], sizes = [16, 1], strides = [1, 1]} : vector<16x256xf32> to vector<16x1xf32>
    %246 = vector.broadcast %245 : vector<16x1xf32> to vector<16x128xf32>
    %247 = arith.mulf %75, %246 : vector<16x128xf32>
    %248 = arith.addf %244, %247 : vector<16x128xf32>
    %249 = vector.extract_strided_slice %1 {offsets = [0, 47], sizes = [16, 1], strides = [1, 1]} : vector<16x256xf32> to vector<16x1xf32>
    %250 = vector.broadcast %249 : vector<16x1xf32> to vector<16x128xf32>
    %251 = arith.mulf %205, %250 : vector<16x128xf32>
    %252 = arith.addf %248, %251 : vector<16x128xf32>
    %253 = arith.addf %188, %252 : vector<16x128xf32>
    %254 = vector.extract_strided_slice %1 {offsets = [0, 54], sizes = [16, 1], strides = [1, 1]} : vector<16x256xf32> to vector<16x1xf32>
    %255 = vector.broadcast %254 : vector<16x1xf32> to vector<16x128xf32>
    %256 = arith.mulf %203, %255 : vector<16x128xf32>
    %257 = vector.extract_strided_slice %1 {offsets = [0, 55], sizes = [16, 1], strides = [1, 1]} : vector<16x256xf32> to vector<16x1xf32>
    %258 = vector.broadcast %257 : vector<16x1xf32> to vector<16x128xf32>
    %259 = arith.mulf %75, %258 : vector<16x128xf32>
    %260 = arith.addf %256, %259 : vector<16x128xf32>
    %261 = vector.extract_strided_slice %1 {offsets = [0, 56], sizes = [16, 1], strides = [1, 1]} : vector<16x256xf32> to vector<16x1xf32>
    %262 = vector.broadcast %261 : vector<16x1xf32> to vector<16x128xf32>
    %263 = arith.mulf %205, %262 : vector<16x128xf32>
    %264 = arith.addf %260, %263 : vector<16x128xf32>
    %265 = arith.addf %200, %264 : vector<16x128xf32>
    %266 = vector.extract_strided_slice %1 {offsets = [0, 57], sizes = [16, 1], strides = [1, 1]} : vector<16x256xf32> to vector<16x1xf32>
    %267 = vector.broadcast %266 : vector<16x1xf32> to vector<16x128xf32>
    %268 = arith.addf %217, %267 : vector<16x128xf32>
    %cst_12 = arith.constant 0.000000e+00 : f32
    %269 = vector.broadcast %cst_12 : f32 to vector<16x128xf32>
    %270 = arith.maximumf %268, %269 : vector<16x128xf32>
    %271 = vector.extract_strided_slice %1 {offsets = [0, 58], sizes = [16, 1], strides = [1, 1]} : vector<16x256xf32> to vector<16x1xf32>
    %272 = vector.broadcast %271 : vector<16x1xf32> to vector<16x128xf32>
    %273 = arith.addf %229, %272 : vector<16x128xf32>
    %cst_13 = arith.constant 0.000000e+00 : f32
    %274 = vector.broadcast %cst_13 : f32 to vector<16x128xf32>
    %275 = arith.maximumf %273, %274 : vector<16x128xf32>
    %276 = vector.extract_strided_slice %1 {offsets = [0, 59], sizes = [16, 1], strides = [1, 1]} : vector<16x256xf32> to vector<16x1xf32>
    %277 = vector.broadcast %276 : vector<16x1xf32> to vector<16x128xf32>
    %278 = arith.addf %241, %277 : vector<16x128xf32>
    %cst_14 = arith.constant 0.000000e+00 : f32
    %279 = vector.broadcast %cst_14 : f32 to vector<16x128xf32>
    %280 = arith.maximumf %278, %279 : vector<16x128xf32>
    %281 = vector.extract_strided_slice %1 {offsets = [0, 60], sizes = [16, 1], strides = [1, 1]} : vector<16x256xf32> to vector<16x1xf32>
    %282 = vector.broadcast %281 : vector<16x1xf32> to vector<16x128xf32>
    %283 = arith.addf %253, %282 : vector<16x128xf32>
    %cst_15 = arith.constant 0.000000e+00 : f32
    %284 = vector.broadcast %cst_15 : f32 to vector<16x128xf32>
    %285 = arith.maximumf %283, %284 : vector<16x128xf32>
    %286 = vector.extract_strided_slice %1 {offsets = [0, 61], sizes = [16, 1], strides = [1, 1]} : vector<16x256xf32> to vector<16x1xf32>
    %287 = vector.broadcast %286 : vector<16x1xf32> to vector<16x128xf32>
    %288 = arith.addf %265, %287 : vector<16x128xf32>
    %cst_16 = arith.constant 0.000000e+00 : f32
    %289 = vector.broadcast %cst_16 : f32 to vector<16x128xf32>
    %290 = arith.maximumf %288, %289 : vector<16x128xf32>
    %cst_17 = arith.constant 0.000000e+00 : f32
    %291 = vector.broadcast %cst_17 : f32 to vector<16x1xf32>
    %292 = vector.extract_strided_slice %270 {offsets = [0, 0], sizes = [16, 127], strides = [1, 1]} : vector<16x128xf32> to vector<16x127xf32>
    %293 = tpu.concatenate %291, %292 in 1 : vector<16x1xf32>, vector<16x127xf32> -> vector<16x128xf32>
    %294 = vector.extract_strided_slice %270 {offsets = [0, 1], sizes = [16, 127], strides = [1, 1]} : vector<16x128xf32> to vector<16x127xf32>
    %295 = tpu.concatenate %294, %291 in 1 : vector<16x127xf32>, vector<16x1xf32> -> vector<16x128xf32>
    %296 = vector.extract_strided_slice %1 {offsets = [0, 62], sizes = [16, 1], strides = [1, 1]} : vector<16x256xf32> to vector<16x1xf32>
    %297 = vector.broadcast %296 : vector<16x1xf32> to vector<16x128xf32>
    %298 = arith.mulf %293, %297 : vector<16x128xf32>
    %299 = vector.extract_strided_slice %1 {offsets = [0, 63], sizes = [16, 1], strides = [1, 1]} : vector<16x256xf32> to vector<16x1xf32>
    %300 = vector.broadcast %299 : vector<16x1xf32> to vector<16x128xf32>
    %301 = arith.mulf %270, %300 : vector<16x128xf32>
    %302 = arith.addf %298, %301 : vector<16x128xf32>
    %303 = vector.extract_strided_slice %1 {offsets = [0, 64], sizes = [16, 1], strides = [1, 1]} : vector<16x256xf32> to vector<16x1xf32>
    %304 = vector.broadcast %303 : vector<16x1xf32> to vector<16x128xf32>
    %305 = arith.mulf %295, %304 : vector<16x128xf32>
    %306 = arith.addf %302, %305 : vector<16x128xf32>
    %307 = vector.extract_strided_slice %1 {offsets = [0, 77], sizes = [16, 1], strides = [1, 1]} : vector<16x256xf32> to vector<16x1xf32>
    %308 = vector.broadcast %307 : vector<16x1xf32> to vector<16x128xf32>
    %309 = arith.mulf %293, %308 : vector<16x128xf32>
    %310 = vector.extract_strided_slice %1 {offsets = [0, 78], sizes = [16, 1], strides = [1, 1]} : vector<16x256xf32> to vector<16x1xf32>
    %311 = vector.broadcast %310 : vector<16x1xf32> to vector<16x128xf32>
    %312 = arith.mulf %270, %311 : vector<16x128xf32>
    %313 = arith.addf %309, %312 : vector<16x128xf32>
    %314 = vector.extract_strided_slice %1 {offsets = [0, 79], sizes = [16, 1], strides = [1, 1]} : vector<16x256xf32> to vector<16x1xf32>
    %315 = vector.broadcast %314 : vector<16x1xf32> to vector<16x128xf32>
    %316 = arith.mulf %295, %315 : vector<16x128xf32>
    %317 = arith.addf %313, %316 : vector<16x128xf32>
    %318 = vector.extract_strided_slice %1 {offsets = [0, 92], sizes = [16, 1], strides = [1, 1]} : vector<16x256xf32> to vector<16x1xf32>
    %319 = vector.broadcast %318 : vector<16x1xf32> to vector<16x128xf32>
    %320 = arith.mulf %293, %319 : vector<16x128xf32>
    %321 = vector.extract_strided_slice %1 {offsets = [0, 93], sizes = [16, 1], strides = [1, 1]} : vector<16x256xf32> to vector<16x1xf32>
    %322 = vector.broadcast %321 : vector<16x1xf32> to vector<16x128xf32>
    %323 = arith.mulf %270, %322 : vector<16x128xf32>
    %324 = arith.addf %320, %323 : vector<16x128xf32>
    %325 = vector.extract_strided_slice %1 {offsets = [0, 94], sizes = [16, 1], strides = [1, 1]} : vector<16x256xf32> to vector<16x1xf32>
    %326 = vector.broadcast %325 : vector<16x1xf32> to vector<16x128xf32>
    %327 = arith.mulf %295, %326 : vector<16x128xf32>
    %328 = arith.addf %324, %327 : vector<16x128xf32>
    %329 = vector.extract_strided_slice %1 {offsets = [0, 107], sizes = [16, 1], strides = [1, 1]} : vector<16x256xf32> to vector<16x1xf32>
    %330 = vector.broadcast %329 : vector<16x1xf32> to vector<16x128xf32>
    %331 = arith.mulf %293, %330 : vector<16x128xf32>
    %332 = vector.extract_strided_slice %1 {offsets = [0, 108], sizes = [16, 1], strides = [1, 1]} : vector<16x256xf32> to vector<16x1xf32>
    %333 = vector.broadcast %332 : vector<16x1xf32> to vector<16x128xf32>
    %334 = arith.mulf %270, %333 : vector<16x128xf32>
    %335 = arith.addf %331, %334 : vector<16x128xf32>
    %336 = vector.extract_strided_slice %1 {offsets = [0, 109], sizes = [16, 1], strides = [1, 1]} : vector<16x256xf32> to vector<16x1xf32>
    %337 = vector.broadcast %336 : vector<16x1xf32> to vector<16x128xf32>
    %338 = arith.mulf %295, %337 : vector<16x128xf32>
    %339 = arith.addf %335, %338 : vector<16x128xf32>
    %340 = vector.extract_strided_slice %1 {offsets = [0, 122], sizes = [16, 1], strides = [1, 1]} : vector<16x256xf32> to vector<16x1xf32>
    %341 = vector.broadcast %340 : vector<16x1xf32> to vector<16x128xf32>
    %342 = arith.mulf %293, %341 : vector<16x128xf32>
    %343 = vector.extract_strided_slice %1 {offsets = [0, 123], sizes = [16, 1], strides = [1, 1]} : vector<16x256xf32> to vector<16x1xf32>
    %344 = vector.broadcast %343 : vector<16x1xf32> to vector<16x128xf32>
    %345 = arith.mulf %270, %344 : vector<16x128xf32>
    %346 = arith.addf %342, %345 : vector<16x128xf32>
    %347 = vector.extract_strided_slice %1 {offsets = [0, 124], sizes = [16, 1], strides = [1, 1]} : vector<16x256xf32> to vector<16x1xf32>
    %348 = vector.broadcast %347 : vector<16x1xf32> to vector<16x128xf32>
    %349 = arith.mulf %295, %348 : vector<16x128xf32>
    %350 = arith.addf %346, %349 : vector<16x128xf32>
    %cst_18 = arith.constant 0.000000e+00 : f32
    %351 = vector.broadcast %cst_18 : f32 to vector<16x1xf32>
    %352 = vector.extract_strided_slice %275 {offsets = [0, 0], sizes = [16, 127], strides = [1, 1]} : vector<16x128xf32> to vector<16x127xf32>
    %353 = tpu.concatenate %351, %352 in 1 : vector<16x1xf32>, vector<16x127xf32> -> vector<16x128xf32>
    %354 = vector.extract_strided_slice %275 {offsets = [0, 1], sizes = [16, 127], strides = [1, 1]} : vector<16x128xf32> to vector<16x127xf32>
    %355 = tpu.concatenate %354, %351 in 1 : vector<16x127xf32>, vector<16x1xf32> -> vector<16x128xf32>
    %356 = vector.extract_strided_slice %1 {offsets = [0, 65], sizes = [16, 1], strides = [1, 1]} : vector<16x256xf32> to vector<16x1xf32>
    %357 = vector.broadcast %356 : vector<16x1xf32> to vector<16x128xf32>
    %358 = arith.mulf %353, %357 : vector<16x128xf32>
    %359 = vector.extract_strided_slice %1 {offsets = [0, 66], sizes = [16, 1], strides = [1, 1]} : vector<16x256xf32> to vector<16x1xf32>
    %360 = vector.broadcast %359 : vector<16x1xf32> to vector<16x128xf32>
    %361 = arith.mulf %275, %360 : vector<16x128xf32>
    %362 = arith.addf %358, %361 : vector<16x128xf32>
    %363 = vector.extract_strided_slice %1 {offsets = [0, 67], sizes = [16, 1], strides = [1, 1]} : vector<16x256xf32> to vector<16x1xf32>
    %364 = vector.broadcast %363 : vector<16x1xf32> to vector<16x128xf32>
    %365 = arith.mulf %355, %364 : vector<16x128xf32>
    %366 = arith.addf %362, %365 : vector<16x128xf32>
    %367 = arith.addf %306, %366 : vector<16x128xf32>
    %368 = vector.extract_strided_slice %1 {offsets = [0, 80], sizes = [16, 1], strides = [1, 1]} : vector<16x256xf32> to vector<16x1xf32>
    %369 = vector.broadcast %368 : vector<16x1xf32> to vector<16x128xf32>
    %370 = arith.mulf %353, %369 : vector<16x128xf32>
    %371 = vector.extract_strided_slice %1 {offsets = [0, 81], sizes = [16, 1], strides = [1, 1]} : vector<16x256xf32> to vector<16x1xf32>
    %372 = vector.broadcast %371 : vector<16x1xf32> to vector<16x128xf32>
    %373 = arith.mulf %275, %372 : vector<16x128xf32>
    %374 = arith.addf %370, %373 : vector<16x128xf32>
    %375 = vector.extract_strided_slice %1 {offsets = [0, 82], sizes = [16, 1], strides = [1, 1]} : vector<16x256xf32> to vector<16x1xf32>
    %376 = vector.broadcast %375 : vector<16x1xf32> to vector<16x128xf32>
    %377 = arith.mulf %355, %376 : vector<16x128xf32>
    %378 = arith.addf %374, %377 : vector<16x128xf32>
    %379 = arith.addf %317, %378 : vector<16x128xf32>
    %380 = vector.extract_strided_slice %1 {offsets = [0, 95], sizes = [16, 1], strides = [1, 1]} : vector<16x256xf32> to vector<16x1xf32>
    %381 = vector.broadcast %380 : vector<16x1xf32> to vector<16x128xf32>
    %382 = arith.mulf %353, %381 : vector<16x128xf32>
    %383 = vector.extract_strided_slice %1 {offsets = [0, 96], sizes = [16, 1], strides = [1, 1]} : vector<16x256xf32> to vector<16x1xf32>
    %384 = vector.broadcast %383 : vector<16x1xf32> to vector<16x128xf32>
    %385 = arith.mulf %275, %384 : vector<16x128xf32>
    %386 = arith.addf %382, %385 : vector<16x128xf32>
    %387 = vector.extract_strided_slice %1 {offsets = [0, 97], sizes = [16, 1], strides = [1, 1]} : vector<16x256xf32> to vector<16x1xf32>
    %388 = vector.broadcast %387 : vector<16x1xf32> to vector<16x128xf32>
    %389 = arith.mulf %355, %388 : vector<16x128xf32>
    %390 = arith.addf %386, %389 : vector<16x128xf32>
    %391 = arith.addf %328, %390 : vector<16x128xf32>
    %392 = vector.extract_strided_slice %1 {offsets = [0, 110], sizes = [16, 1], strides = [1, 1]} : vector<16x256xf32> to vector<16x1xf32>
    %393 = vector.broadcast %392 : vector<16x1xf32> to vector<16x128xf32>
    %394 = arith.mulf %353, %393 : vector<16x128xf32>
    %395 = vector.extract_strided_slice %1 {offsets = [0, 111], sizes = [16, 1], strides = [1, 1]} : vector<16x256xf32> to vector<16x1xf32>
    %396 = vector.broadcast %395 : vector<16x1xf32> to vector<16x128xf32>
    %397 = arith.mulf %275, %396 : vector<16x128xf32>
    %398 = arith.addf %394, %397 : vector<16x128xf32>
    %399 = vector.extract_strided_slice %1 {offsets = [0, 112], sizes = [16, 1], strides = [1, 1]} : vector<16x256xf32> to vector<16x1xf32>
    %400 = vector.broadcast %399 : vector<16x1xf32> to vector<16x128xf32>
    %401 = arith.mulf %355, %400 : vector<16x128xf32>
    %402 = arith.addf %398, %401 : vector<16x128xf32>
    %403 = arith.addf %339, %402 : vector<16x128xf32>
    %404 = vector.extract_strided_slice %1 {offsets = [0, 125], sizes = [16, 1], strides = [1, 1]} : vector<16x256xf32> to vector<16x1xf32>
    %405 = vector.broadcast %404 : vector<16x1xf32> to vector<16x128xf32>
    %406 = arith.mulf %353, %405 : vector<16x128xf32>
    %407 = vector.extract_strided_slice %1 {offsets = [0, 126], sizes = [16, 1], strides = [1, 1]} : vector<16x256xf32> to vector<16x1xf32>
    %408 = vector.broadcast %407 : vector<16x1xf32> to vector<16x128xf32>
    %409 = arith.mulf %275, %408 : vector<16x128xf32>
    %410 = arith.addf %406, %409 : vector<16x128xf32>
    %411 = vector.extract_strided_slice %1 {offsets = [0, 127], sizes = [16, 1], strides = [1, 1]} : vector<16x256xf32> to vector<16x1xf32>
    %412 = vector.broadcast %411 : vector<16x1xf32> to vector<16x128xf32>
    %413 = arith.mulf %355, %412 : vector<16x128xf32>
    %414 = arith.addf %410, %413 : vector<16x128xf32>
    %415 = arith.addf %350, %414 : vector<16x128xf32>
    %cst_19 = arith.constant 0.000000e+00 : f32
    %416 = vector.broadcast %cst_19 : f32 to vector<16x1xf32>
    %417 = vector.extract_strided_slice %280 {offsets = [0, 0], sizes = [16, 127], strides = [1, 1]} : vector<16x128xf32> to vector<16x127xf32>
    %418 = tpu.concatenate %416, %417 in 1 : vector<16x1xf32>, vector<16x127xf32> -> vector<16x128xf32>
    %419 = vector.extract_strided_slice %280 {offsets = [0, 1], sizes = [16, 127], strides = [1, 1]} : vector<16x128xf32> to vector<16x127xf32>
    %420 = tpu.concatenate %419, %416 in 1 : vector<16x127xf32>, vector<16x1xf32> -> vector<16x128xf32>
    %421 = vector.extract_strided_slice %1 {offsets = [0, 68], sizes = [16, 1], strides = [1, 1]} : vector<16x256xf32> to vector<16x1xf32>
    %422 = vector.broadcast %421 : vector<16x1xf32> to vector<16x128xf32>
    %423 = arith.mulf %418, %422 : vector<16x128xf32>
    %424 = vector.extract_strided_slice %1 {offsets = [0, 69], sizes = [16, 1], strides = [1, 1]} : vector<16x256xf32> to vector<16x1xf32>
    %425 = vector.broadcast %424 : vector<16x1xf32> to vector<16x128xf32>
    %426 = arith.mulf %280, %425 : vector<16x128xf32>
    %427 = arith.addf %423, %426 : vector<16x128xf32>
    %428 = vector.extract_strided_slice %1 {offsets = [0, 70], sizes = [16, 1], strides = [1, 1]} : vector<16x256xf32> to vector<16x1xf32>
    %429 = vector.broadcast %428 : vector<16x1xf32> to vector<16x128xf32>
    %430 = arith.mulf %420, %429 : vector<16x128xf32>
    %431 = arith.addf %427, %430 : vector<16x128xf32>
    %432 = arith.addf %367, %431 : vector<16x128xf32>
    %433 = vector.extract_strided_slice %1 {offsets = [0, 83], sizes = [16, 1], strides = [1, 1]} : vector<16x256xf32> to vector<16x1xf32>
    %434 = vector.broadcast %433 : vector<16x1xf32> to vector<16x128xf32>
    %435 = arith.mulf %418, %434 : vector<16x128xf32>
    %436 = vector.extract_strided_slice %1 {offsets = [0, 84], sizes = [16, 1], strides = [1, 1]} : vector<16x256xf32> to vector<16x1xf32>
    %437 = vector.broadcast %436 : vector<16x1xf32> to vector<16x128xf32>
    %438 = arith.mulf %280, %437 : vector<16x128xf32>
    %439 = arith.addf %435, %438 : vector<16x128xf32>
    %440 = vector.extract_strided_slice %1 {offsets = [0, 85], sizes = [16, 1], strides = [1, 1]} : vector<16x256xf32> to vector<16x1xf32>
    %441 = vector.broadcast %440 : vector<16x1xf32> to vector<16x128xf32>
    %442 = arith.mulf %420, %441 : vector<16x128xf32>
    %443 = arith.addf %439, %442 : vector<16x128xf32>
    %444 = arith.addf %379, %443 : vector<16x128xf32>
    %445 = vector.extract_strided_slice %1 {offsets = [0, 98], sizes = [16, 1], strides = [1, 1]} : vector<16x256xf32> to vector<16x1xf32>
    %446 = vector.broadcast %445 : vector<16x1xf32> to vector<16x128xf32>
    %447 = arith.mulf %418, %446 : vector<16x128xf32>
    %448 = vector.extract_strided_slice %1 {offsets = [0, 99], sizes = [16, 1], strides = [1, 1]} : vector<16x256xf32> to vector<16x1xf32>
    %449 = vector.broadcast %448 : vector<16x1xf32> to vector<16x128xf32>
    %450 = arith.mulf %280, %449 : vector<16x128xf32>
    %451 = arith.addf %447, %450 : vector<16x128xf32>
    %452 = vector.extract_strided_slice %1 {offsets = [0, 100], sizes = [16, 1], strides = [1, 1]} : vector<16x256xf32> to vector<16x1xf32>
    %453 = vector.broadcast %452 : vector<16x1xf32> to vector<16x128xf32>
    %454 = arith.mulf %420, %453 : vector<16x128xf32>
    %455 = arith.addf %451, %454 : vector<16x128xf32>
    %456 = arith.addf %391, %455 : vector<16x128xf32>
    %457 = vector.extract_strided_slice %1 {offsets = [0, 113], sizes = [16, 1], strides = [1, 1]} : vector<16x256xf32> to vector<16x1xf32>
    %458 = vector.broadcast %457 : vector<16x1xf32> to vector<16x128xf32>
    %459 = arith.mulf %418, %458 : vector<16x128xf32>
    %460 = vector.extract_strided_slice %1 {offsets = [0, 114], sizes = [16, 1], strides = [1, 1]} : vector<16x256xf32> to vector<16x1xf32>
    %461 = vector.broadcast %460 : vector<16x1xf32> to vector<16x128xf32>
    %462 = arith.mulf %280, %461 : vector<16x128xf32>
    %463 = arith.addf %459, %462 : vector<16x128xf32>
    %464 = vector.extract_strided_slice %1 {offsets = [0, 115], sizes = [16, 1], strides = [1, 1]} : vector<16x256xf32> to vector<16x1xf32>
    %465 = vector.broadcast %464 : vector<16x1xf32> to vector<16x128xf32>
    %466 = arith.mulf %420, %465 : vector<16x128xf32>
    %467 = arith.addf %463, %466 : vector<16x128xf32>
    %468 = arith.addf %403, %467 : vector<16x128xf32>
    %469 = vector.extract_strided_slice %1 {offsets = [0, 128], sizes = [16, 1], strides = [1, 1]} : vector<16x256xf32> to vector<16x1xf32>
    %470 = vector.broadcast %469 : vector<16x1xf32> to vector<16x128xf32>
    %471 = arith.mulf %418, %470 : vector<16x128xf32>
    %472 = vector.extract_strided_slice %1 {offsets = [0, 129], sizes = [16, 1], strides = [1, 1]} : vector<16x256xf32> to vector<16x1xf32>
    %473 = vector.broadcast %472 : vector<16x1xf32> to vector<16x128xf32>
    %474 = arith.mulf %280, %473 : vector<16x128xf32>
    %475 = arith.addf %471, %474 : vector<16x128xf32>
    %476 = vector.extract_strided_slice %1 {offsets = [0, 130], sizes = [16, 1], strides = [1, 1]} : vector<16x256xf32> to vector<16x1xf32>
    %477 = vector.broadcast %476 : vector<16x1xf32> to vector<16x128xf32>
    %478 = arith.mulf %420, %477 : vector<16x128xf32>
    %479 = arith.addf %475, %478 : vector<16x128xf32>
    %480 = arith.addf %415, %479 : vector<16x128xf32>
    %cst_20 = arith.constant 0.000000e+00 : f32
    %481 = vector.broadcast %cst_20 : f32 to vector<16x1xf32>
    %482 = vector.extract_strided_slice %285 {offsets = [0, 0], sizes = [16, 127], strides = [1, 1]} : vector<16x128xf32> to vector<16x127xf32>
    %483 = tpu.concatenate %481, %482 in 1 : vector<16x1xf32>, vector<16x127xf32> -> vector<16x128xf32>
    %484 = vector.extract_strided_slice %285 {offsets = [0, 1], sizes = [16, 127], strides = [1, 1]} : vector<16x128xf32> to vector<16x127xf32>
    %485 = tpu.concatenate %484, %481 in 1 : vector<16x127xf32>, vector<16x1xf32> -> vector<16x128xf32>
    %486 = vector.extract_strided_slice %1 {offsets = [0, 71], sizes = [16, 1], strides = [1, 1]} : vector<16x256xf32> to vector<16x1xf32>
    %487 = vector.broadcast %486 : vector<16x1xf32> to vector<16x128xf32>
    %488 = arith.mulf %483, %487 : vector<16x128xf32>
    %489 = vector.extract_strided_slice %1 {offsets = [0, 72], sizes = [16, 1], strides = [1, 1]} : vector<16x256xf32> to vector<16x1xf32>
    %490 = vector.broadcast %489 : vector<16x1xf32> to vector<16x128xf32>
    %491 = arith.mulf %285, %490 : vector<16x128xf32>
    %492 = arith.addf %488, %491 : vector<16x128xf32>
    %493 = vector.extract_strided_slice %1 {offsets = [0, 73], sizes = [16, 1], strides = [1, 1]} : vector<16x256xf32> to vector<16x1xf32>
    %494 = vector.broadcast %493 : vector<16x1xf32> to vector<16x128xf32>
    %495 = arith.mulf %485, %494 : vector<16x128xf32>
    %496 = arith.addf %492, %495 : vector<16x128xf32>
    %497 = arith.addf %432, %496 : vector<16x128xf32>
    %498 = vector.extract_strided_slice %1 {offsets = [0, 86], sizes = [16, 1], strides = [1, 1]} : vector<16x256xf32> to vector<16x1xf32>
    %499 = vector.broadcast %498 : vector<16x1xf32> to vector<16x128xf32>
    %500 = arith.mulf %483, %499 : vector<16x128xf32>
    %501 = vector.extract_strided_slice %1 {offsets = [0, 87], sizes = [16, 1], strides = [1, 1]} : vector<16x256xf32> to vector<16x1xf32>
    %502 = vector.broadcast %501 : vector<16x1xf32> to vector<16x128xf32>
    %503 = arith.mulf %285, %502 : vector<16x128xf32>
    %504 = arith.addf %500, %503 : vector<16x128xf32>
    %505 = vector.extract_strided_slice %1 {offsets = [0, 88], sizes = [16, 1], strides = [1, 1]} : vector<16x256xf32> to vector<16x1xf32>
    %506 = vector.broadcast %505 : vector<16x1xf32> to vector<16x128xf32>
    %507 = arith.mulf %485, %506 : vector<16x128xf32>
    %508 = arith.addf %504, %507 : vector<16x128xf32>
    %509 = arith.addf %444, %508 : vector<16x128xf32>
    %510 = vector.extract_strided_slice %1 {offsets = [0, 101], sizes = [16, 1], strides = [1, 1]} : vector<16x256xf32> to vector<16x1xf32>
    %511 = vector.broadcast %510 : vector<16x1xf32> to vector<16x128xf32>
    %512 = arith.mulf %483, %511 : vector<16x128xf32>
    %513 = vector.extract_strided_slice %1 {offsets = [0, 102], sizes = [16, 1], strides = [1, 1]} : vector<16x256xf32> to vector<16x1xf32>
    %514 = vector.broadcast %513 : vector<16x1xf32> to vector<16x128xf32>
    %515 = arith.mulf %285, %514 : vector<16x128xf32>
    %516 = arith.addf %512, %515 : vector<16x128xf32>
    %517 = vector.extract_strided_slice %1 {offsets = [0, 103], sizes = [16, 1], strides = [1, 1]} : vector<16x256xf32> to vector<16x1xf32>
    %518 = vector.broadcast %517 : vector<16x1xf32> to vector<16x128xf32>
    %519 = arith.mulf %485, %518 : vector<16x128xf32>
    %520 = arith.addf %516, %519 : vector<16x128xf32>
    %521 = arith.addf %456, %520 : vector<16x128xf32>
    %522 = vector.extract_strided_slice %1 {offsets = [0, 116], sizes = [16, 1], strides = [1, 1]} : vector<16x256xf32> to vector<16x1xf32>
    %523 = vector.broadcast %522 : vector<16x1xf32> to vector<16x128xf32>
    %524 = arith.mulf %483, %523 : vector<16x128xf32>
    %525 = vector.extract_strided_slice %1 {offsets = [0, 117], sizes = [16, 1], strides = [1, 1]} : vector<16x256xf32> to vector<16x1xf32>
    %526 = vector.broadcast %525 : vector<16x1xf32> to vector<16x128xf32>
    %527 = arith.mulf %285, %526 : vector<16x128xf32>
    %528 = arith.addf %524, %527 : vector<16x128xf32>
    %529 = vector.extract_strided_slice %1 {offsets = [0, 118], sizes = [16, 1], strides = [1, 1]} : vector<16x256xf32> to vector<16x1xf32>
    %530 = vector.broadcast %529 : vector<16x1xf32> to vector<16x128xf32>
    %531 = arith.mulf %485, %530 : vector<16x128xf32>
    %532 = arith.addf %528, %531 : vector<16x128xf32>
    %533 = arith.addf %468, %532 : vector<16x128xf32>
    %534 = vector.extract_strided_slice %1 {offsets = [0, 131], sizes = [16, 1], strides = [1, 1]} : vector<16x256xf32> to vector<16x1xf32>
    %535 = vector.broadcast %534 : vector<16x1xf32> to vector<16x128xf32>
    %536 = arith.mulf %483, %535 : vector<16x128xf32>
    %537 = vector.extract_strided_slice %1 {offsets = [0, 132], sizes = [16, 1], strides = [1, 1]} : vector<16x256xf32> to vector<16x1xf32>
    %538 = vector.broadcast %537 : vector<16x1xf32> to vector<16x128xf32>
    %539 = arith.mulf %285, %538 : vector<16x128xf32>
    %540 = arith.addf %536, %539 : vector<16x128xf32>
    %541 = vector.extract_strided_slice %1 {offsets = [0, 133], sizes = [16, 1], strides = [1, 1]} : vector<16x256xf32> to vector<16x1xf32>
    %542 = vector.broadcast %541 : vector<16x1xf32> to vector<16x128xf32>
    %543 = arith.mulf %485, %542 : vector<16x128xf32>
    %544 = arith.addf %540, %543 : vector<16x128xf32>
    %545 = arith.addf %480, %544 : vector<16x128xf32>
    %cst_21 = arith.constant 0.000000e+00 : f32
    %546 = vector.broadcast %cst_21 : f32 to vector<16x1xf32>
    %547 = vector.extract_strided_slice %290 {offsets = [0, 0], sizes = [16, 127], strides = [1, 1]} : vector<16x128xf32> to vector<16x127xf32>
    %548 = tpu.concatenate %546, %547 in 1 : vector<16x1xf32>, vector<16x127xf32> -> vector<16x128xf32>
    %549 = vector.extract_strided_slice %290 {offsets = [0, 1], sizes = [16, 127], strides = [1, 1]} : vector<16x128xf32> to vector<16x127xf32>
    %550 = tpu.concatenate %549, %546 in 1 : vector<16x127xf32>, vector<16x1xf32> -> vector<16x128xf32>
    %551 = vector.extract_strided_slice %1 {offsets = [0, 74], sizes = [16, 1], strides = [1, 1]} : vector<16x256xf32> to vector<16x1xf32>
    %552 = vector.broadcast %551 : vector<16x1xf32> to vector<16x128xf32>
    %553 = arith.mulf %548, %552 : vector<16x128xf32>
    %554 = vector.extract_strided_slice %1 {offsets = [0, 75], sizes = [16, 1], strides = [1, 1]} : vector<16x256xf32> to vector<16x1xf32>
    %555 = vector.broadcast %554 : vector<16x1xf32> to vector<16x128xf32>
    %556 = arith.mulf %290, %555 : vector<16x128xf32>
    %557 = arith.addf %553, %556 : vector<16x128xf32>
    %558 = vector.extract_strided_slice %1 {offsets = [0, 76], sizes = [16, 1], strides = [1, 1]} : vector<16x256xf32> to vector<16x1xf32>
    %559 = vector.broadcast %558 : vector<16x1xf32> to vector<16x128xf32>
    %560 = arith.mulf %550, %559 : vector<16x128xf32>
    %561 = arith.addf %557, %560 : vector<16x128xf32>
    %562 = arith.addf %497, %561 : vector<16x128xf32>
    %563 = vector.extract_strided_slice %1 {offsets = [0, 89], sizes = [16, 1], strides = [1, 1]} : vector<16x256xf32> to vector<16x1xf32>
    %564 = vector.broadcast %563 : vector<16x1xf32> to vector<16x128xf32>
    %565 = arith.mulf %548, %564 : vector<16x128xf32>
    %566 = vector.extract_strided_slice %1 {offsets = [0, 90], sizes = [16, 1], strides = [1, 1]} : vector<16x256xf32> to vector<16x1xf32>
    %567 = vector.broadcast %566 : vector<16x1xf32> to vector<16x128xf32>
    %568 = arith.mulf %290, %567 : vector<16x128xf32>
    %569 = arith.addf %565, %568 : vector<16x128xf32>
    %570 = vector.extract_strided_slice %1 {offsets = [0, 91], sizes = [16, 1], strides = [1, 1]} : vector<16x256xf32> to vector<16x1xf32>
    %571 = vector.broadcast %570 : vector<16x1xf32> to vector<16x128xf32>
    %572 = arith.mulf %550, %571 : vector<16x128xf32>
    %573 = arith.addf %569, %572 : vector<16x128xf32>
    %574 = arith.addf %509, %573 : vector<16x128xf32>
    %575 = vector.extract_strided_slice %1 {offsets = [0, 104], sizes = [16, 1], strides = [1, 1]} : vector<16x256xf32> to vector<16x1xf32>
    %576 = vector.broadcast %575 : vector<16x1xf32> to vector<16x128xf32>
    %577 = arith.mulf %548, %576 : vector<16x128xf32>
    %578 = vector.extract_strided_slice %1 {offsets = [0, 105], sizes = [16, 1], strides = [1, 1]} : vector<16x256xf32> to vector<16x1xf32>
    %579 = vector.broadcast %578 : vector<16x1xf32> to vector<16x128xf32>
    %580 = arith.mulf %290, %579 : vector<16x128xf32>
    %581 = arith.addf %577, %580 : vector<16x128xf32>
    %582 = vector.extract_strided_slice %1 {offsets = [0, 106], sizes = [16, 1], strides = [1, 1]} : vector<16x256xf32> to vector<16x1xf32>
    %583 = vector.broadcast %582 : vector<16x1xf32> to vector<16x128xf32>
    %584 = arith.mulf %550, %583 : vector<16x128xf32>
    %585 = arith.addf %581, %584 : vector<16x128xf32>
    %586 = arith.addf %521, %585 : vector<16x128xf32>
    %587 = vector.extract_strided_slice %1 {offsets = [0, 119], sizes = [16, 1], strides = [1, 1]} : vector<16x256xf32> to vector<16x1xf32>
    %588 = vector.broadcast %587 : vector<16x1xf32> to vector<16x128xf32>
    %589 = arith.mulf %548, %588 : vector<16x128xf32>
    %590 = vector.extract_strided_slice %1 {offsets = [0, 120], sizes = [16, 1], strides = [1, 1]} : vector<16x256xf32> to vector<16x1xf32>
    %591 = vector.broadcast %590 : vector<16x1xf32> to vector<16x128xf32>
    %592 = arith.mulf %290, %591 : vector<16x128xf32>
    %593 = arith.addf %589, %592 : vector<16x128xf32>
    %594 = vector.extract_strided_slice %1 {offsets = [0, 121], sizes = [16, 1], strides = [1, 1]} : vector<16x256xf32> to vector<16x1xf32>
    %595 = vector.broadcast %594 : vector<16x1xf32> to vector<16x128xf32>
    %596 = arith.mulf %550, %595 : vector<16x128xf32>
    %597 = arith.addf %593, %596 : vector<16x128xf32>
    %598 = arith.addf %533, %597 : vector<16x128xf32>
    %599 = vector.extract_strided_slice %1 {offsets = [0, 134], sizes = [16, 1], strides = [1, 1]} : vector<16x256xf32> to vector<16x1xf32>
    %600 = vector.broadcast %599 : vector<16x1xf32> to vector<16x128xf32>
    %601 = arith.mulf %548, %600 : vector<16x128xf32>
    %602 = vector.extract_strided_slice %1 {offsets = [0, 135], sizes = [16, 1], strides = [1, 1]} : vector<16x256xf32> to vector<16x1xf32>
    %603 = vector.broadcast %602 : vector<16x1xf32> to vector<16x128xf32>
    %604 = arith.mulf %290, %603 : vector<16x128xf32>
    %605 = arith.addf %601, %604 : vector<16x128xf32>
    %606 = vector.extract_strided_slice %1 {offsets = [0, 136], sizes = [16, 1], strides = [1, 1]} : vector<16x256xf32> to vector<16x1xf32>
    %607 = vector.broadcast %606 : vector<16x1xf32> to vector<16x128xf32>
    %608 = arith.mulf %550, %607 : vector<16x128xf32>
    %609 = arith.addf %605, %608 : vector<16x128xf32>
    %610 = arith.addf %545, %609 : vector<16x128xf32>
    %611 = vector.extract_strided_slice %1 {offsets = [0, 137], sizes = [16, 1], strides = [1, 1]} : vector<16x256xf32> to vector<16x1xf32>
    %612 = vector.broadcast %611 : vector<16x1xf32> to vector<16x128xf32>
    %613 = arith.addf %562, %612 : vector<16x128xf32>
    %cst_22 = arith.constant 0.000000e+00 : f32
    %614 = vector.broadcast %cst_22 : f32 to vector<16x128xf32>
    %615 = arith.maximumf %613, %614 : vector<16x128xf32>
    %616 = vector.extract_strided_slice %1 {offsets = [0, 138], sizes = [16, 1], strides = [1, 1]} : vector<16x256xf32> to vector<16x1xf32>
    %617 = vector.broadcast %616 : vector<16x1xf32> to vector<16x128xf32>
    %618 = arith.addf %574, %617 : vector<16x128xf32>
    %cst_23 = arith.constant 0.000000e+00 : f32
    %619 = vector.broadcast %cst_23 : f32 to vector<16x128xf32>
    %620 = arith.maximumf %618, %619 : vector<16x128xf32>
    %621 = vector.extract_strided_slice %1 {offsets = [0, 139], sizes = [16, 1], strides = [1, 1]} : vector<16x256xf32> to vector<16x1xf32>
    %622 = vector.broadcast %621 : vector<16x1xf32> to vector<16x128xf32>
    %623 = arith.addf %586, %622 : vector<16x128xf32>
    %cst_24 = arith.constant 0.000000e+00 : f32
    %624 = vector.broadcast %cst_24 : f32 to vector<16x128xf32>
    %625 = arith.maximumf %623, %624 : vector<16x128xf32>
    %626 = vector.extract_strided_slice %1 {offsets = [0, 140], sizes = [16, 1], strides = [1, 1]} : vector<16x256xf32> to vector<16x1xf32>
    %627 = vector.broadcast %626 : vector<16x1xf32> to vector<16x128xf32>
    %628 = arith.addf %598, %627 : vector<16x128xf32>
    %cst_25 = arith.constant 0.000000e+00 : f32
    %629 = vector.broadcast %cst_25 : f32 to vector<16x128xf32>
    %630 = arith.maximumf %628, %629 : vector<16x128xf32>
    %631 = vector.extract_strided_slice %1 {offsets = [0, 141], sizes = [16, 1], strides = [1, 1]} : vector<16x256xf32> to vector<16x1xf32>
    %632 = vector.broadcast %631 : vector<16x1xf32> to vector<16x128xf32>
    %633 = arith.addf %610, %632 : vector<16x128xf32>
    %cst_26 = arith.constant 0.000000e+00 : f32
    %634 = vector.broadcast %cst_26 : f32 to vector<16x128xf32>
    %635 = arith.maximumf %633, %634 : vector<16x128xf32>
    %636 = arith.addf %615, %620 : vector<16x128xf32>
    %637 = arith.addf %636, %625 : vector<16x128xf32>
    %638 = arith.addf %637, %630 : vector<16x128xf32>
    %639 = arith.addf %638, %635 : vector<16x128xf32>
    %cst_27 = arith.constant 2.000000e-01 : f32
    %640 = vector.broadcast %cst_27 : f32 to vector<16x128xf32>
    %641 = arith.mulf %639, %640 : vector<16x128xf32>
    %642 = arith.truncf %641 : vector<16x128xf32> to vector<16x128xbf16>
    %c0_28 = arith.constant 0 : index
    %c0_29 = arith.constant 0 : index
    %643 = vector.load %arg3[%c0_28, %c0_29] : memref<128x256xbf16, #tpu.memory_space<vmem>>, vector<128x256xbf16>
    %cst_30 = arith.constant dense<0.000000e+00> : vector<16x256xf32>
    %644 = tpu.matmul %642, %643, %cst_30 {dimension_numbers = #tpu.dot_dimension_numbers<[1], [0], [0], [1], [0, 0, 1, 1], [], []>} : vector<16x128xbf16>, vector<128x256xbf16>, vector<16x256xf32> -> vector<16x256xf32>
    %c0_31 = arith.constant 0 : index
    %c0_32 = arith.constant 0 : index
    %645 = vector.load %arg4[%c0_31, %c0_32] : memref<1x256xf32, #tpu.memory_space<vmem>>, vector<1x256xf32>
    %646 = vector.broadcast %645 : vector<1x256xf32> to vector<16x256xf32>
    %647 = arith.addf %644, %646 : vector<16x256xf32>
    %648 = vector.extract_strided_slice %1 {offsets = [0, 142], sizes = [16, 1], strides = [1, 1]} : vector<16x256xf32> to vector<16x1xf32>
    %cst_33 = arith.constant 5.000000e-01 : f32
    %649 = vector.broadcast %cst_33 : f32 to vector<16x1xf32>
    %650 = arith.cmpf ogt, %648, %649 : vector<16x1xf32>
    %651 = vector.extract_strided_slice %647 {offsets = [0, 0], sizes = [16, 128], strides = [1, 1]} : vector<16x256xf32> to vector<16x128xf32>
    %652 = vector.extract_strided_slice %647 {offsets = [0, 128], sizes = [16, 128], strides = [1, 1]} : vector<16x256xf32> to vector<16x128xf32>
    %653 = vector.shape_cast %650 : vector<16x1xi1> to vector<16x1xi1>
    %654 = vector.broadcast %653 : vector<16x1xi1> to vector<16x128xi1>
    %655 = arith.select %654, %651, %652 : vector<16x128xi1>, vector<16x128xf32>
    %c0_34 = arith.constant 0 : index
    %c0_35 = arith.constant 0 : index
    %656 = vector.load %arg5[%c0_34, %c0_35] : memref<16x128xf32, #tpu.memory_space<vmem>>, vector<16x128xf32>
    tpu.vector_store %arg5[%c0_34, %c0_35], %655 {strides = array<i32>} : memref<16x128xf32, #tpu.memory_space<vmem>>, vector<16x128xf32>,
    return
  }
  func.func @transform_0(%arg0: i32) -> (i32, i32) {
    %c0_i32 = arith.constant 0 : i32
    %c0_i32_0 = arith.constant 0 : i32
    return %arg0, %c0_i32 : i32, i32
  }
  func.func @transform_1(%arg0: i32) -> (i32, i32) {
    %c0_i32 = arith.constant 0 : i32
    %c0_i32_0 = arith.constant 0 : i32
    return %arg0, %c0_i32 : i32, i32
  }
  func.func @transform_2(%arg0: i32) -> (i32, i32) {
    %c0_i32 = arith.constant 0 : i32
    %c0_i32_0 = arith.constant 0 : i32
    %c0_i32_1 = arith.constant 0 : i32
    return %c0_i32, %c0_i32_0 : i32, i32
  }
  func.func @transform_3(%arg0: i32) -> (i32, i32) {
    %c0_i32 = arith.constant 0 : i32
    %c0_i32_0 = arith.constant 0 : i32
    %c0_i32_1 = arith.constant 0 : i32
    return %c0_i32, %c0_i32_0 : i32, i32
  }
  func.func @transform_4(%arg0: i32) -> (i32, i32) {
    %c0_i32 = arith.constant 0 : i32
    %c0_i32_0 = arith.constant 0 : i32
    return %arg0, %c0_i32 : i32, i32
  }
}

</mosaic_0001>

<bundles_post_ra>
// kernel: convnet_forward.1
= control target key start
LH: loop header
LB: loop body
LE: loop exit
PB: predicated region body
PF: predicated region fallthrough
CT: control target
= control target key end

     0   :  { %s3056_s15 = smov 0   ;;  %s4884_s0 = inlined_call_operand.vmem [shape: f32[32,128], index: 0, kind: input, shape index: {}]   ;;  %s4885_s1 = inlined_call_operand.vmem [shape: f32[32,256], index: 1, kind: input, shape index: {}]   ;;  %s4886_s2 = inlined_call_operand.vmem [shape: bf16[128,256], index: 2, kind: input, shape index: {}]   ;;  %s4887_s3 = inlined_call_operand.vmem [shape: f32[1,256], index: 3, kind: input, shape index: {}]   ;;  %s4888_s4 = inlined_call_operand.vmem [shape: f32[32,128], index: 4, kind: output, shape index: {}]  }
   0x1 LB: > { %s2369_s16 = sadd.s32 4294967295, %s2899_s15   ;;  %p2373_p0 = scmp.ge.s32.totalorder %s2899_s15, 1  ;;  %s2899_s15 = sphi %s3056_s15, %s14_s15  }
   0x2   : > { %p175_p1 = scmp.lt.s32.totalorder %s2899_s15, 3 }
   0x4   : > { %p176_p2 = pnand %p2373_p0, %p175_p1 }
   0x6   : > { %179 = sbr.rel (%p176_p2) target bundleno = 1581 (0x62d), region = 36 }
   0xb   : > { %s2374_s17 = sshll.u32 %s2369_s16, 1  ;;  %v4917_v0 = vmov 0   ;;  %v4913_v1 = vmov 1   ;;  %s2903_s26 = smov 127   ;;  %v4911_v6 = vmov 2   ;;  %v4901_v7 = vmov 3  }
   0xc   : > { %2602 = vset.pattern.permute.xlu2 %v4917_v0  ;;  %p208_p3 = scmp.lt.s32.totalorder %s2374_s17, 3  ;;  %2604 = vset.pattern.permute.xlu1 %v4913_v1  ;;  %s2904_s27 = smov 1   ;;  %v4915_v8 = vmov 4   ;;  %v4897_v9 = vmov 6   ;;  %v4899_v10 = vmov 5   ;;  %v4895_v11 = vmov 8  }
   0xd   : > { %2603 = vset.pattern.permute.xlu0 %v4913_v1  ;;  %v4891_v12 = vmov 11   ;;  %v4909_v13 = vmov 7   ;;  %v4907_v14 = vmov 9   ;;  %v4893_v15 = vmov 10  }
   0xe   : > { %s5107_s17 = smov (!%p208_p3, %s2374_s17), 3  ;;  %v4905_v20 = vmov 12   ;;  %v4889_v23 = vmov 13   ;;  %v4903_v31 = vmov 14   ;;  %vm240_vm0 = vcmask 7168  }
   0xf   : > { %s2447_s18 = sshll.u32 %s5107_s17, 4  ;;  %s2375_s19 = sshll.u32 %s5107_s17, 3  ;;  %vm249_vm1 = vcmask 1039360   ;;  %v2918_v55 = vmov 21  }
  0x10   : > { %s3074_s22 = scalar_lea.vmem %s4885_s1, %s2447_s18  ;;  %s211_s25 = scalar_lea.vmem %s4884_s0, %s2375_s19 }
  0x11   : > { %v3082_v2 = vld [vmem:[%s3074_s22] sm:$0xff]  ;;  %v3092_v4 = vld [vmem:[%s3074_s22 + $0x10] sm:$0xff]  ;;  %v3094_v5 = vld [vmem:[%s211_s25 + $0x8] sm:$0xff]  ;;  %s224_s29 = scalar_lea.vmem %s4888_s4, %s2375_s19 }
  0x12   : > { %v3084_v3 = vld [vmem:[%s211_s25] sm:$0xff]  ;;  %254 = vperm.xlu2 %2602, %v3082_v2  }
  0x13   : > { %243 = vrot.lane.b32.xlu1 %v3084_v3, %s2903_s26  ;;  %234 = vrot.lane.b32.xlu0 %v3084_v3, %s2904_s27 }
  0x1a   : > { %259 = vperm.xlu2 %2602, %v3092_v4  }
  0x1b   : > { %245 = vrot.lane.b32.xlu1 %v3094_v5, %s2903_s26  ;;  %236 = vrot.lane.b32.xlu0 %v3094_v5, %s2904_s27 }
  0x22   : > { %2605 = vset.pattern.permute.xlu2 %v4911_v6 }
  0x23   : > { %269 = vperm.xlu1 %2604, %v3092_v4   ;;  %265 = vperm.xlu0 %2603, %v3082_v2  }
  0x24   : > { %277 = vperm.xlu2 %2605, %v3082_v2  }
  0x2b   : > { %2606 = vset.pattern.permute.xlu1 %v4911_v6  ;;  %2608 = vset.pattern.permute.xlu0 %v4901_v7  ;;  %v2951_v6 = vmov 53  }
  0x2c   : > { %2607 = vset.pattern.permute.xlu2 %v4901_v7  ;;  %281 = vperm.xlu1 %2606, %v3092_v4  }
  0x2d   : > { %293 = vperm.xlu0 %2608, %v3092_v4   ;;  %289 = vperm.xlu2 %2607, %v3082_v2  }
  0x34   : > { %2609 = vset.pattern.permute.xlu1 %v4915_v8 }
  0x35   : > { %2613 = vset.pattern.permute.xlu0 %v4897_v9  ;;  %2610 = vset.pattern.permute.xlu2 %v4915_v8 }
  0x36   : > { %299 = vperm.xlu1 %2609, %v3082_v2   ;;  %323 = vperm.xlu0 %2613, %v3082_v2  }
  0x37   : > { %303 = vperm.xlu2 %2610, %v3092_v4  }
  0x3e   : > { %2611 = vset.pattern.permute.xlu1 %v4899_v10  ;;  %2618 = vset.pattern.permute.xlu0 %v4895_v11 }
  0x3f   : > { %2612 = vset.pattern.permute.xlu2 %v4899_v10  ;;  %311 = vperm.xlu1 %2611, %v3082_v2  }
  0x40   : > { %349 = vperm.xlu0 %2618, %v3092_v4   ;;  %315 = vperm.xlu2 %2612, %v3092_v4  }
  0x47   : > { %2614 = vset.pattern.permute.xlu1 %v4897_v9 }
  0x48   : > { %2623 = vset.pattern.permute.xlu0 %v4891_v12  ;;  %2615 = vset.pattern.permute.xlu2 %v4909_v13 }
  0x49   : > { %327 = vperm.xlu1 %2614, %v3092_v4   ;;  %381 = vperm.xlu0 %2623, %v3082_v2  }
  0x4a   : > { %333 = vperm.xlu2 %2615, %v3082_v2  }
  0x51   : > { %2616 = vset.pattern.permute.xlu1 %v4909_v13  ;;  %2627 = vset.pattern.permute.xlu0 %v4889_v23 }
  0x52   : > { %2617 = vset.pattern.permute.xlu2 %v4895_v11  ;;  %337 = vperm.xlu1 %2616, %v3092_v4   ;;  %v4920_v11 = vmov 54  }
  0x53   : > { %345 = vperm.xlu2 %2617, %v3082_v2   ;;  %487 = vperm.xlu0 %2627, %v3082_v2  }
  0x5a   : > { %2619 = vset.pattern.permute.xlu1 %v4907_v14 }
  0x5b   : > { %2620 = vset.pattern.permute.xlu2 %v4907_v14  ;;  %357 = vperm.xlu1 %2619, %v3082_v2  }
  0x5c   : > { %361 = vperm.xlu2 %2620, %v3092_v4   ;;  %2632 = vset.pattern.permute.xlu0 %v2918_v55 }
  0x63   : > { %2621 = vset.pattern.permute.xlu1 %v4893_v15 }
  0x64   : > { %2622 = vset.pattern.permute.xlu2 %v4893_v15  ;;  %369 = vperm.xlu1 %2621, %v3082_v2  }
  0x65   : > { %373 = vperm.xlu2 %2622, %v3092_v4  }
  0x6c   : > { %2624 = vset.pattern.permute.xlu1 %v4891_v12  ;;  %v255_v16 = vpop.permute.xlu2 %254 }
  0x6d   : > { %385 = vperm.xlu1 %2624, %v3092_v4   ;;  %2626 = vset.pattern.permute.xlu2 %v4905_v20 }
  0x6e   : > { %481 = vperm.xlu2 %2626, %v3092_v4  }
  0x74   : > { %v260_v17 = vpop.permute.xlu2 %259 }
  0x75   : > { %2625 = vset.pattern.permute.xlu1 %v4905_v20 }
  0x76   : > { %477 = vperm.xlu1 %2625, %v3082_v2   ;;  %2629 = vset.pattern.permute.xlu2 %v4903_v31 }
  0x77   : > { %499 = vperm.xlu2 %2629, %v3082_v2  }
  0x7e   : > { %v278_v18 = vpop.permute.xlu2 %277  ;;  %2628 = vset.pattern.permute.xlu1 %v4889_v23  ;;  %v2948_v23 = vmov 51  }
  0x7f   : > { %491 = vperm.xlu1 %2628, %v3092_v4   ;;  %2631 = vset.pattern.permute.xlu2 %v2918_v55 }
  0x85   : > { %v244_v19 = vpop.permute.xlu1 %243  ;;  %v235_v28 = vpop.permute.xlu0 %234 }
  0x86   : > { %v241_v47 = vsel %vm240_vm0, 0.0, %v235_v28  ;;  %v250_v52 = vsel %vm249_vm1, %v244_v19, 0.0 }
  0x87   : > { %v290_v21 = vpop.permute.xlu2 %289  ;;  %2630 = vset.pattern.permute.xlu1 %v4903_v31  ;;  %v262_v51 = vmul.f32 %v255_v16, %v241_v47  ;;  %v284_v54 = vmul.f32 %v278_v18, %v250_v52  ;;  %v4919_v31 = vmov 57  }
  0x88   : > { %v296_v62 = vmul.f32 %v290_v21, %v241_v47 }
  0x8d   : > { %v246_v22 = vpop.permute.xlu1 %245  ;;  %v237_v32 = vpop.permute.xlu0 %236 }
  0x8e   : > { %v242_v34 = vsel %vm240_vm0, 0.0, %v237_v32  ;;  %v251_v36 = vsel %vm249_vm1, %v246_v22, 0.0 }
  0x8f   : > { %v263_v37 = vmul.f32 %v260_v17, %v242_v34 }
  0x91   : > { %v304_v24 = vpop.permute.xlu2 %303 }
  0x92   : > { %v307_v17 = vmul.f32 %v304_v24, %v3094_v5 }
  0x95   : > { %v270_v25 = vpop.permute.xlu1 %269  ;;  %v266_v45 = vpop.permute.xlu0 %265 }
  0x96   : > { %v273_v35 = vmul.f32 %v270_v25, %v3094_v5  ;;  %v272_v48 = vmul.f32 %v266_v45, %v3084_v3 }
  0x98   : > { %v275_v40 = vadd.f32 %v273_v35, %v263_v37  ;;  %v274_v53 = vadd.f32 %v272_v48, %v262_v51  ;;  %v2922_v51 = vmov 23  }
  0x9a   : > { %v316_v26 = vpop.permute.xlu2 %315  ;;  %v286_v56 = vadd.f32 %v284_v54, %v274_v53  ;;  %v2924_v53 = vmov 49   ;;  %v2925_v54 = vmov 31  }
  0x9b   : > { %v319_v35 = vmul.f32 %v316_v26, %v251_v36 }
  0x9e   : > { %v282_v27 = vpop.permute.xlu1 %281 }
  0x9f   : > { %v285_v38 = vmul.f32 %v282_v27, %v251_v36  ;;  %v294_v50 = vpop.permute.xlu0 %293 }
  0xa0   : > { %v297_v16 = vmul.f32 %v294_v50, %v242_v34  ;;  %v2921_v50 = vmov 32  }
  0xa1   : > { %v287_v41 = vadd.f32 %v285_v38, %v275_v40 }
  0xa2   : > { %v309_v22 = vadd.f32 %v307_v17, %v297_v16 }
  0xa4   : > { %v334_v29 = vpop.permute.xlu2 %333 }
  0xa5   : > { %v340_v21 = vmul.f32 %v334_v29, %v3084_v3 }
  0xa8   : > { %v300_v30 = vpop.permute.xlu1 %299  ;;  %v324_v57 = vpop.permute.xlu0 %323 }
  0xa9   : > { %v306_v60 = vmul.f32 %v300_v30, %v3084_v3  ;;  %v330_v24 = vmul.f32 %v324_v57, %v241_v47  ;;  %v2927_v57 = vmov 39  }
  0xab   : > { %v308_v18 = vadd.f32 %v306_v60, %v296_v62  ;;  %v2928_v60 = vmov 40  }
  0xad   : > { %v346_v33 = vpop.permute.xlu2 %345 }
  0xb1   : > { %v312_v39 = vpop.permute.xlu1 %311 }
  0xb2   : > { %v318_v63 = vmul.f32 %v312_v39, %v250_v52  ;;  %v350_v28 = vpop.permute.xlu0 %349  ;;  %v321_v39 = vadd.f32 %v319_v35, %v309_v22 }
  0xb4   : > { %v320_v19 = vadd.f32 %v318_v63, %v308_v18 }
  0xb6   : > { %v362_v42 = vpop.permute.xlu2 %361 }
  0xb7   : > { %v365_v43 = vadd.f32 %v362_v42, %v287_v41  ;;  %v352_v41 = vmul.f32 %v346_v33, %v250_v52  ;;  %v2923_v52 = vmov 41  }
  0xb9   : > { %v3157_v44 = vmax.f32 %v365_v43, 0.0 }
  0xbb   : > { %v328_v46 = vpop.permute.xlu1 %327  ;;  %404 = vrot.lane.b32.xlu0 %v3157_v44, %s2903_s26  ;;  %396 = vrot.lane.b32.xlu1 %v3157_v44, %s2904_s27  ;;  %v382_v29 = vpop.permute.xlu0 %381 }
  0xbc   : > { %v331_v30 = vmul.f32 %v328_v46, %v242_v34  ;;  %v342_v34 = vadd.f32 %v340_v21, %v330_v24 }
  0xbe   : > { %v354_v46 = vadd.f32 %v352_v41, %v342_v34 }
  0xbf   : > { %v374_v37 = vpop.permute.xlu2 %373 }
  0xc0   : > { %v377_v26 = vadd.f32 %v374_v37, %v321_v39  ;;  %v388_v48 = vadd.f32 %v382_v29, %v354_v46  ;;  %v2931_v39 = vmov 50  }
  0xc2   : > { %v3182_v45 = vmax.f32 %v377_v26, 0.0  ;;  %v3192_v33 = vmax.f32 %v388_v48, 0.0  ;;  %v2933_v48 = vmov 17  }
  0xc4   : > { %v338_v49 = vpop.permute.xlu1 %337 }
  0xc5   : > { %v341_v25 = vmul.f32 %v338_v49, %v3094_v5  ;;  %v353_v5 = vmul.f32 %v350_v28, %v251_v36  ;;  %v2919_v36 = vmov 30   ;;  %v2920_v49 = vmov 22   ;;  %v3227_v17 = vpop.permute.xlu0 %487 }
  0xc7   : > { %v343_v40 = vadd.f32 %v341_v25, %v331_v30 }
  0xc8   : > { %v3214_v55 = vpop.permute.xlu2 %481 }
  0xc9   : > { %v355_v42 = vadd.f32 %v353_v5, %v343_v40  ;;  %v2932_v40 = vmov 16  }
  0xcd   : > { %v358_v58 = vpop.permute.xlu1 %357 }
  0xce   : > { %v364_v59 = vadd.f32 %v358_v58, %v286_v56  ;;  %v2926_v56 = vmov 15  }
  0xd0   : > { %v3167_v61 = vmax.f32 %v364_v59, 0.0 }
  0xd1   : > { %v3221_v59 = vpop.permute.xlu2 %499 }
  0xd2   : > { %394 = vrot.lane.b32.xlu2 %v3167_v61, %s2904_s27 }
  0xd6   : > { %v370_v27 = vpop.permute.xlu1 %369 }
  0xd7   : > { %v376_v32 = vadd.f32 %v370_v27, %v320_v19 }
  0xd9   : > { %v3173_v38 = vmax.f32 %v376_v32, 0.0  ;;  %v2929_v32 = vmov 48  }
  0xda   : > { %402 = vrot.lane.b32.xlu2 %v3167_v61, %s2903_s26 }
  0xdb   : > { %424 = vrot.lane.b32.xlu0 %v3173_v38, %s2903_s26  ;;  %416 = vrot.lane.b32.xlu1 %v3173_v38, %s2904_s27 }
  0xdf   : > { %v386_v43 = vpop.permute.xlu1 %385 }
  0xe0   : > { %v389_v3 = vadd.f32 %v386_v43, %v355_v42 }
  0xe2   : > { %v3184_v47 = vmax.f32 %v389_v3, 0.0  ;;  %418 = vrot.lane.b32.xlu2 %v3182_v45, %s2904_s27 }
  0xe3   : > { %426 = vrot.lane.b32.xlu1 %v3182_v45, %s2903_s26 }
  0xe4   : > { %440 = vrot.lane.b32.xlu0 %v3184_v47, %s2904_s27 }
  0xe8   : > { %v3218_v58 = vpop.permute.xlu1 %477 }
  0xea   : > { %438 = vrot.lane.b32.xlu2 %v3192_v33, %s2904_s27 }
  0xeb   : > { %446 = vrot.lane.b32.xlu1 %v3192_v33, %s2903_s26 }
  0xec   : > { %515 = vperm.xlu0 %2632, %v3092_v4  }
  0xf1   : > { %v3225_v62 = vpop.permute.xlu1 %491 }
  0xf2   : > { %448 = vrot.lane.b32.xlu2 %v3184_v47, %s2903_s26 }
  0xf3   : > { %503 = vperm.xlu1 %2630, %v3092_v4  }
  0xf4   : > { %2637 = vset.pattern.permute.xlu0 %v2919_v36 }
  0xf5   : > { %545 = vperm.xlu0 %2637, %v3082_v2  }
  0xfa   : > { %511 = vperm.xlu2 %2631, %v3082_v2  }
  0xfb   : > { %2633 = vset.pattern.permute.xlu1 %v2920_v49 }
  0xfc   : > { %521 = vperm.xlu1 %2633, %v3082_v2  }
  0xfd   : > { %2642 = vset.pattern.permute.xlu0 %v2921_v50 }
  0xfe   : > { %571 = vperm.xlu0 %2642, %v3092_v4  }
 0x102   : > { %2634 = vset.pattern.permute.xlu2 %v2920_v49  ;;  %v2934_v49 = vmov 26  }
 0x103   : > { %525 = vperm.xlu2 %2634, %v3092_v4  }
 0x104   : > { %2635 = vset.pattern.permute.xlu1 %v2922_v51 }
 0x105   : > { %533 = vperm.xlu1 %2635, %v3082_v2  }
 0x106   : > { %2647 = vset.pattern.permute.xlu0 %v2923_v52 }
 0x107   : > { %601 = vperm.xlu0 %2647, %v3082_v2  }
 0x10b   : > { %2636 = vset.pattern.permute.xlu2 %v2922_v51 }
 0x10c   : > { %537 = vperm.xlu2 %2636, %v3092_v4  }
 0x10d   : > { %2638 = vset.pattern.permute.xlu1 %v2919_v36 }
 0x10e   : > { %549 = vperm.xlu1 %2638, %v3092_v4  }
 0x10f   : > { %2652 = vset.pattern.permute.xlu0 %v2924_v53 }
 0x110   : > { %627 = vperm.xlu0 %2652, %v3092_v4  }
 0x114   : > { %2639 = vset.pattern.permute.xlu2 %v2925_v54 }
 0x115   : > { %555 = vperm.xlu2 %2639, %v3082_v2  }
 0x116   : > { %2640 = vset.pattern.permute.xlu1 %v2925_v54 }
 0x117   : > { %559 = vperm.xlu1 %2640, %v3092_v4  }
 0x118   : > { %2656 = vset.pattern.permute.xlu0 %v2926_v56 }
 0x119   : > { %669 = vperm.xlu0 %2656, %v3092_v4  }
 0x11d   : > { %2641 = vset.pattern.permute.xlu2 %v2921_v50 }
 0x11e   : > { %567 = vperm.xlu2 %2641, %v3082_v2  }
 0x11f   : > { %2643 = vset.pattern.permute.xlu1 %v2927_v57 }
 0x120   : > { %579 = vperm.xlu1 %2643, %v3082_v2  }
 0x126   : > { %2644 = vset.pattern.permute.xlu2 %v2927_v57  ;;  %v2935_v57 = vmov 35  }
 0x127   : > { %583 = vperm.xlu2 %2644, %v3092_v4  }
 0x128   : > { %2645 = vset.pattern.permute.xlu1 %v2928_v60 }
 0x129   : > { %589 = vperm.xlu1 %2645, %v3082_v2  }
 0x12c   : > { %v395_v63 = vpop.permute.xlu2 %394 }
 0x12d   : > { %v400_v16 = vsel %vm240_vm0, 0.0, %v395_v63  ;;  %v397_v19 = vpop.permute.xlu1 %396  ;;  %v405_v30 = vpop.permute.xlu0 %404  ;;  %v2936_v63 = vmov 25  }
 0x12e   : > { %v410_v18 = vmax.f32 %v400_v16, %v3167_v61  ;;  %v401_v28 = vsel %vm240_vm0, 0.0, %v397_v19  ;;  %v2930_v61 = vmov 24   ;;  %v409_v21 = vsel %vm249_vm1, %v405_v30, 0.0 }
 0x12f   : > { %2646 = vset.pattern.permute.xlu2 %v2928_v60  ;;  %v411_v35 = vmax.f32 %v401_v28, %v3157_v44  ;;  %2661 = vset.pattern.permute.xlu0 %v2930_v61  ;;  %v2938_v28 = vmov 52  }
 0x130   : > { %593 = vperm.xlu2 %2646, %v3092_v4  }
 0x131   : > { %2648 = vset.pattern.permute.xlu1 %v2923_v52  ;;  %v3243_v24 = vmax.f32 %v411_v35, %v409_v21 }
 0x132   : > { %605 = vperm.xlu1 %2648, %v3092_v4  }
 0x134   : > { %v403_v22 = vpop.permute.xlu2 %402 }
 0x135   : > { %v408_v25 = vsel %vm249_vm1, %v403_v22, 0.0 }
 0x136   : > { %v3234_v27 = vmax.f32 %v410_v18, %v408_v25  ;;  %v2937_v18 = vmov 43  }
 0x138   : > { %460 = vrot.lane.b32.xlu0 %v3234_v27, %s2904_s27  ;;  %2649 = vset.pattern.permute.xlu2 %v2929_v32 }
 0x139   : > { %613 = vperm.xlu2 %2649, %v3082_v2  }
 0x13a   : > { %2650 = vset.pattern.permute.xlu1 %v2929_v32 }
 0x13b   : > { %617 = vperm.xlu1 %2650, %v3092_v4  }
 0x13c   : > { %v419_v37 = vpop.permute.xlu2 %418 }
 0x13d   : > { %v423_v52 = vsel %vm240_vm0, 0.0, %v419_v37 }
 0x13e   : > { %v433_v54 = vmax.f32 %v423_v52, %v3182_v45 }
 0x140   : > { %470 = vrot.lane.b32.xlu0 %v3243_v24, %s2903_s26 }
 0x141   : > { %2651 = vset.pattern.permute.xlu2 %v2924_v53 }
 0x142   : > { %623 = vperm.xlu2 %2651, %v3082_v2  }
 0x143   : > { %2653 = vset.pattern.permute.xlu1 %v2931_v39 }
 0x144   : > { %635 = vperm.xlu1 %2653, %v3082_v2   ;;  %v3249_v44 = vpop.permute.xlu2 %438 }
 0x14a   : > { %2654 = vset.pattern.permute.xlu2 %v2931_v39  ;;  %v2939_v39 = vmov 33  }
 0x14b   : > { %639 = vperm.xlu2 %2654, %v3092_v4  }
 0x14c   : > { %2657 = vset.pattern.permute.xlu1 %v2932_v40  ;;  %v3252_v5 = vpop.permute.xlu2 %448 }
 0x14d   : > { %v417_v26 = vpop.permute.xlu1 %416  ;;  %v425_v34 = vpop.permute.xlu0 %424  ;;  %675 = vperm.xlu1 %2657, %v3082_v2   ;;  %v453_v37 = vsel %vm249_vm1, %v3252_v5, 0.0 }
 0x14e   : > { %v422_v41 = vsel %vm240_vm0, 0.0, %v417_v26  ;;  %v430_v43 = vsel %vm249_vm1, %v425_v34, 0.0  ;;  %v2940_v26 = vmov 18   ;;  %v2941_v34 = vmov 34  }
 0x14f   : > { %v432_v42 = vmax.f32 %v422_v41, %v3173_v38 }
 0x151   : > { %v3258_v3 = vmax.f32 %v432_v42, %v430_v43 }
 0x153   : > { %656 = vrot.lane.b32.xlu0 %v3258_v3, %s2903_s26  ;;  %2655 = vset.pattern.permute.xlu2 %v2926_v56 }
 0x154   : > { %665 = vperm.xlu2 %2655, %v3082_v2   ;;  %v3263_v29 = vpop.permute.xlu2 %511 }
 0x155   : > { %v427_v46 = vpop.permute.xlu1 %426  ;;  %2659 = vset.pattern.permute.xlu1 %v2933_v48 }
 0x156   : > { %687 = vperm.xlu1 %2659, %v3082_v2   ;;  %v431_v53 = vsel %vm249_vm1, %v427_v46, 0.0  ;;  %v441_v45 = vpop.permute.xlu0 %440  ;;  %v2942_v46 = vmov 20  }
 0x157   : > { %v3285_v56 = vmax.f32 %v433_v54, %v431_v53  ;;  %v445_v25 = vsel %vm240_vm0, 0.0, %v441_v45  ;;  %v2943_v53 = vmov 29   ;;  %v2944_v54 = vmov 42  }
 0x158   : > { %v455_v30 = vmax.f32 %v445_v25, %v3184_v47  ;;  %v2945_v25 = vmov 37  }
 0x15a   : > { %v3319_v21 = vmax.f32 %v455_v30, %v453_v37  ;;  %v2946_v30 = vmov 44  }
 0x15b   : > { %701 = vperm.xlu0 %2661, %v3082_v2  }
 0x15c   : > { %2658 = vset.pattern.permute.xlu2 %v2932_v40 }
 0x15d   : > { %v3267_v38 = vpop.permute.xlu1 %446  ;;  %679 = vperm.xlu2 %2658, %v3092_v4   ;;  %v3270_v36 = vpop.permute.xlu2 %525 }
 0x15e   : > { %4965 = vst [vmem:[#allocation2_spill] sm:$0xff] %v3270_v36  ;;  %462 = vrot.lane.b32.xlu1 %v3243_v24, %s2904_s27  ;;  %v3307_v32 = vpop.permute.xlu0 %515 }
 0x15f   : > { %2662 = vset.pattern.permute.xlu1 %v2930_v61  ;;  %4967 = vst [vmem:[#allocation4_spill] sm:$0xff] %v3307_v32 }
 0x163   : > { %2666 = vset.pattern.permute.xlu0 %v2934_v49 }
 0x164   : > { %727 = vperm.xlu0 %2666, %v3092_v4  }
 0x165   : > { %v3275_v50 = vpop.permute.xlu1 %503  ;;  %2660 = vset.pattern.permute.xlu2 %v2933_v48 }
 0x166   : > { %648 = vrot.lane.b32.xlu1 %v3258_v3, %s2904_s27  ;;  %691 = vperm.xlu2 %2660, %v3092_v4   ;;  %v3280_v51 = vpop.permute.xlu2 %537 }
 0x167   : > { %4966 = vst [vmem:[#allocation3_spill] sm:$0xff] %v3280_v51  ;;  %v3324_v40 = vpop.permute.xlu0 %545 }
 0x16c   : > { %2671 = vset.pattern.permute.xlu0 %v2935_v57 }
 0x16d   : > { %759 = vperm.xlu0 %2671, %v3082_v2  }
 0x16e   : > { %658 = vrot.lane.b32.xlu1 %v3285_v56, %s2903_s26  ;;  %v3290_v60 = vpop.permute.xlu1 %521  ;;  %468 = vrot.lane.b32.xlu2 %v3234_v27, %s2903_s26 }
 0x16f   : > { %2663 = vset.pattern.permute.xlu2 %v2936_v63  ;;  %v3294_v16 = vpop.permute.xlu2 %555  ;;  %v528_v14 = vmul.f32 %v3290_v60, %v3234_v27 }
 0x170   : > { %v3335_v42 = vpop.permute.xlu0 %571 }
 0x175   : > { %2676 = vset.pattern.permute.xlu0 %v2937_v18 }
 0x176   : > { %787 = vperm.xlu0 %2676, %v3092_v4   ;;  %705 = vperm.xlu1 %2662, %v3092_v4  }
 0x177   : > { %650 = vrot.lane.b32.xlu2 %v3285_v56, %s2904_s27  ;;  %v3301_v19 = vpop.permute.xlu1 %533 }
 0x178   : > { %v3303_v22 = vpop.permute.xlu2 %567 }
 0x17e   : > { %2681 = vset.pattern.permute.xlu0 %v2938_v28  ;;  %2664 = vset.pattern.permute.xlu1 %v2936_v63 }
 0x17f   : > { %711 = vperm.xlu2 %2663, %v3082_v2   ;;  %819 = vperm.xlu0 %2681, %v3082_v2  }
 0x180   : > { %715 = vperm.xlu1 %2664, %v3092_v4   ;;  %v3312_v35 = vpop.permute.xlu1 %549 }
 0x181   : > { %v3315_v61 = vpop.permute.xlu2 %583 }
 0x187   : > { %2665 = vset.pattern.permute.xlu2 %v2934_v49  ;;  %848 = vrot.lane.b32.xlu0 %v3319_v21, %s2904_s27  ;;  %v3343_v49 = vpop.permute.xlu0 %601 }
 0x188   : > { %2667 = vset.pattern.permute.xlu1 %v2939_v39  ;;  %723 = vperm.xlu2 %2665, %v3082_v2  }
 0x189   : > { %737 = vperm.xlu1 %2667, %v3082_v2   ;;  %v3327_v47 = vpop.permute.xlu1 %559  ;;  %2685 = vset.pattern.permute.xlu0 %v2940_v26 }
 0x18a   : > { %v3330_v5 = vpop.permute.xlu2 %593 }
 0x18f   : > { %863 = vperm.xlu0 %2685, %v3082_v2   ;;  %v3355_v45 = vpop.permute.xlu0 %627 }
 0x190   : > { %2668 = vset.pattern.permute.xlu2 %v2939_v39 }
 0x191   : > { %2669 = vset.pattern.permute.xlu1 %v2941_v34  ;;  %741 = vperm.xlu2 %2668, %v3092_v4  }
 0x192   : > { %747 = vperm.xlu1 %2669, %v3082_v2   ;;  %v580_v41 = vpop.permute.xlu1 %579 }
 0x193   : > { %v3337_v43 = vpop.permute.xlu2 %613 }
 0x197   : > { %2690 = vset.pattern.permute.xlu0 %v2942_v46 }
 0x198   : > { %889 = vperm.xlu0 %2690, %v3092_v4  }
 0x199   : > { %2670 = vset.pattern.permute.xlu2 %v2941_v34  ;;  %v3366_v34 = vpop.permute.xlu0 %669 }
 0x19a   : > { %2672 = vset.pattern.permute.xlu1 %v2935_v57  ;;  %751 = vperm.xlu2 %2670, %v3092_v4  }
 0x19b   : > { %763 = vperm.xlu1 %2672, %v3092_v4   ;;  %v590_v48 = vpop.permute.xlu1 %589 }
 0x19c   : > { %v3345_v52 = vpop.permute.xlu2 %623 }
 0x1a0   : > { %2695 = vset.pattern.permute.xlu0 %v2943_v53 }
 0x1a1   : > { %921 = vperm.xlu0 %2695, %v3082_v2  }
 0x1a2   : > { %2673 = vset.pattern.permute.xlu2 %v2944_v54 }
 0x1a3   : > { %2674 = vset.pattern.permute.xlu1 %v2944_v54  ;;  %773 = vperm.xlu2 %2673, %v3082_v2   ;;  %v2947_v54 = vmov 46  }
 0x1a4   : > { %777 = vperm.xlu1 %2674, %v3092_v4   ;;  %v3351_v57 = vpop.permute.xlu1 %605 }
 0x1a5   : > { %v3353_v63 = vpop.permute.xlu2 %639 }
 0x1a9   : > { %2700 = vset.pattern.permute.xlu0 %v2945_v25 }
 0x1aa   : > { %949 = vperm.xlu0 %2700, %v3092_v4   ;;  %v461_v15 = vpop.permute.xlu0 %460 }
 0x1ab   : > { %2675 = vset.pattern.permute.xlu2 %v2937_v18  ;;  %v3384_v10 = vsel %vm240_vm0, 0.0, %v461_v15  ;;  %v562_v15 = vmul.f32 %v3294_v16, %v3234_v27  ;;  %v630_v16 = vmul.f32 %v3345_v52, %v3234_v27 }
 0x1ac   : > { %2677 = vset.pattern.permute.xlu1 %v2946_v30  ;;  %783 = vperm.xlu2 %2675, %v3082_v2   ;;  %v586_v20 = vmul.f32 %v580_v41, %v3384_v10  ;;  %v620_v13 = vmul.f32 %v3337_v43, %v3384_v10 }
 0x1ad   : > { %795 = vperm.xlu1 %2677, %v3082_v2   ;;  %v3362_v37 = vpop.permute.xlu1 %617 }
 0x1ae   : > { %v3364_v39 = vpop.permute.xlu2 %665 }
 0x1b2   : > { %2705 = vset.pattern.permute.xlu0 %v2947_v54  ;;  %v471_v7 = vpop.permute.xlu0 %470 }
 0x1b3   : > { %981 = vperm.xlu0 %2705, %v3082_v2  }
 0x1b4   : > { %2678 = vset.pattern.permute.xlu2 %v2946_v30 }
 0x1b5   : > { %2679 = vset.pattern.permute.xlu1 %v2948_v23  ;;  %799 = vperm.xlu2 %2678, %v3092_v4  }
 0x1b6   : > { %809 = vperm.xlu1 %2679, %v3082_v2   ;;  %v636_v18 = vpop.permute.xlu1 %635 }
 0x1b7   : > { %v3372_v12 = vpop.permute.xlu2 %679 }
 0x1bb   : > { %2710 = vset.pattern.permute.xlu0 %v4920_v11 }
 0x1bc   : > { %1011 = vperm.xlu0 %2710, %v3092_v4  }
 0x1bd   : > { %2680 = vset.pattern.permute.xlu2 %v2948_v23  ;;  %v518_v23 = vmul.f32 %v3263_v29, %v3384_v10  ;;  %v444_v29 = vsel %vm240_vm0, 0.0, %v3249_v44 }
 0x1be   : > { %2682 = vset.pattern.permute.xlu1 %v2938_v28  ;;  %813 = vperm.xlu2 %2680, %v3092_v4   ;;  %v552_v28 = vmul.f32 %v3324_v40, %v3384_v10  ;;  %v596_v40 = vmul.f32 %v590_v48, %v3234_v27 }
 0x1bf   : > { %823 = vperm.xlu1 %2682, %v3092_v4   ;;  %v3379_v30 = vpop.permute.xlu1 %675  ;;  %v530_v1 = vadd.f32 %v528_v14, %v518_v23  ;;  %v454_v14 = vmax.f32 %v444_v29, %v3192_v33 }
 0x1c0   : > { %v3381_v9 = vpop.permute.xlu2 %691  ;;  %v598_v0 = vadd.f32 %v596_v40, %v586_v20 }
 0x1c4   : > { %2715 = vset.pattern.permute.xlu0 %v4919_v31  ;;  %v452_v31 = vsel %vm249_vm1, %v3267_v38, 0.0 }
 0x1c5   : > { %1043 = vperm.xlu0 %2715, %v3082_v2   ;;  %v3419_v11 = vpop.permute.xlu0 %656 }
 0x1c6   : > { %2683 = vset.pattern.permute.xlu2 %v2951_v6 }
 0x1c7   : > { %2684 = vset.pattern.permute.xlu1 %v2951_v6  ;;  %831 = vperm.xlu2 %2683, %v3082_v2   ;;  %v564_v6 = vadd.f32 %v562_v15, %v552_v28 }
 0x1c8   : > { %835 = vperm.xlu1 %2684, %v3092_v4   ;;  %v3404_v41 = vpop.permute.xlu1 %687  ;;  %v469_v60 = vpop.permute.xlu2 %468 }
 0x1c9   : > { %v3409_v43 = vsel %vm249_vm1, %v469_v60, 0.0  ;;  %v632_v60 = vadd.f32 %v630_v16, %v620_v13  ;;  %v3438_v13 = vsel %vm249_vm1, %v471_v7, 0.0 }
 0x1ca   : > { %v540_v44 = vmul.f32 %v3301_v19, %v3409_v43  ;;  %v574_v48 = vmul.f32 %v3303_v22, %v3409_v43  ;;  %v608_v8 = vmul.f32 %v3343_v49, %v3409_v43  ;;  %v642_v52 = vmul.f32 %v636_v18, %v3409_v43 }
 0x1cb   : > { %v3431_v49 = vmax.f32 %v454_v14, %v452_v31  ;;  %v597_v31 = vmul.f32 %v3330_v5, %v3243_v24  ;;  %v631_v18 = vmul.f32 %v3355_v45, %v3243_v24  ;;  %v609_v5 = vmul.f32 %v3351_v57, %v3438_v13 }
 0x1cc   : > { %v3423_v23 = vadd.f32 %v540_v44, %v530_v1  ;;  %v3425_v19 = vadd.f32 %v574_v48, %v564_v6  ;;  %v3427_v28 = vadd.f32 %v608_v8, %v598_v0  ;;  %v3429_v22 = vadd.f32 %v642_v52, %v632_v60 }
 0x1cd   : > { %v2952_v0 = vmov 19   ;;  %v563_v8 = vmul.f32 %v3327_v47, %v3243_v24  ;;  %v3456_v15 = vpop.permute.xlu0 %701  ;;  %v575_v47 = vmul.f32 %v3335_v42, %v3438_v13  ;;  %v2953_v60 = vmov 27  }
 0x1ce   : > { %4968 = vst [vmem:[#allocation5_spill] sm:$0xff] %v3425_v19 }
 0x1cf   : > { %4969 = vst [vmem:[#allocation6_spill] sm:$0xff] %v3429_v22  ;;  %846 = vrot.lane.b32.xlu2 %v3431_v49, %s2904_s27 }
 0x1d0   : > { %854 = vrot.lane.b32.xlu1 %v3431_v49, %s2903_s26  ;;  %v463_v20 = vpop.permute.xlu1 %462  ;;  %2687 = vset.pattern.permute.xlu2 %v2952_v0 }
 0x1d1   : > { %v3441_v1 = vsel %vm240_vm0, 0.0, %v463_v20  ;;  %v3443_v33 = vpop.permute.xlu2 %650  ;;  %2686 = vset.pattern.permute.xlu1 %v2940_v26  ;;  %v4921_v20 = vmov 59  }
 0x1d2   : > { %v553_v38 = vmul.f32 %v3312_v35, %v3441_v1  ;;  %v587_v7 = vmul.f32 %v3315_v61, %v3441_v1  ;;  %v621_v26 = vmul.f32 %v3362_v37, %v3441_v1  ;;  %v643_v35 = vmul.f32 %v3353_v63, %v3438_v13  ;;  %2720 = vset.pattern.permute.xlu0 %v4921_v20 }
 0x1d3   : > { %1071 = vperm.xlu0 %2720, %v3092_v4  }
 0x1d4   : > { %v565_v29 = vadd.f32 %v563_v8, %v553_v38  ;;  %v599_v40 = vadd.f32 %v597_v31, %v587_v7  ;;  %v633_v61 = vadd.f32 %v631_v18, %v621_v26  ;;  %v2955_v8 = vmov 28  }
 0x1d5   : > { %v2956_v26 = vmov 36  }
 0x1d6   : > { %v3466_v16 = vadd.f32 %v575_v47, %v565_v29  ;;  %v3468_v45 = vadd.f32 %v609_v5, %v599_v40  ;;  %v3470_v6 = vadd.f32 %v643_v35, %v633_v61  ;;  %v3479_v37 = vpop.permute.xlu0 %727  ;;  %v2957_v35 = vmov 38  }
 0x1d7   : > { %856 = vrot.lane.b32.xlu2 %v3319_v21, %s2903_s26  ;;  %4971 = vst [vmem:[#allocation8_spill] sm:$0xff] %v3479_v37 }
 0x1d8   : > { %4970 = vst [vmem:[#allocation7_spill] sm:$0xff] %v3468_v45  ;;  %867 = vperm.xlu1 %2686, %v3092_v4   ;;  %v3475_v42 = vpop.permute.xlu1 %648  ;;  %v2959_v45 = vmov 47  }
 0x1d9   : > { %v3477_v57 = vpop.permute.xlu2 %711 }
 0x1df   : > { %873 = vperm.xlu2 %2687, %v3082_v2   ;;  %v3487_v48 = vpop.permute.xlu0 %759 }
 0x1e0   : > { %2688 = vset.pattern.permute.xlu1 %v2952_v0  ;;  %v3482_v63 = vpop.permute.xlu1 %658  ;;  %4972 = vst [vmem:[#allocation9_spill] sm:$0xff] %v3487_v48  ;;  %v2961_v48 = vmov 56  }
 0x1e1   : > { %877 = vperm.xlu1 %2688, %v3092_v4  }
 0x1e2   : > { %v3485_v44 = vpop.permute.xlu2 %723 }
 0x1e7   : > { %2689 = vset.pattern.permute.xlu2 %v2942_v46 }
 0x1e8   : > { %v3490_v52 = vpop.permute.xlu1 %705  ;;  %885 = vperm.xlu2 %2689, %v3082_v2   ;;  %v3498_v0 = vpop.permute.xlu0 %787 }
 0x1e9   : > { %4973 = vst [vmem:[#allocation10_spill] sm:$0xff] %v3490_v52  ;;  %2691 = vset.pattern.permute.xlu1 %v2953_v60  ;;  %v506_v52 = vmul.f32 %v3221_v59, %v3409_v43 }
 0x1ea   : > { %899 = vperm.xlu1 %2691, %v3082_v2   ;;  %4974 = vst [vmem:[#allocation11_spill] sm:$0xff] %v3498_v0 }
 0x1eb   : > { %v3494_v14 = vpop.permute.xlu2 %741 }
 0x1f0   : > { %2692 = vset.pattern.permute.xlu2 %v2953_v60 }
 0x1f1   : > { %903 = vperm.xlu2 %2692, %v3092_v4   ;;  %v3506_v38 = vpop.permute.xlu0 %819 }
 0x1f2   : > { %v3501_v46 = vpop.permute.xlu1 %715  ;;  %2693 = vset.pattern.permute.xlu1 %v2955_v8  ;;  %4975 = vst [vmem:[#allocation12_spill] sm:$0xff] %v3506_v38 }
 0x1f3   : > { %909 = vperm.xlu1 %2693, %v3082_v2  }
 0x1f4   : > { %v3504_v31 = vpop.permute.xlu2 %751 }
 0x1f9   : > { %2694 = vset.pattern.permute.xlu2 %v2955_v8  ;;  %v3518_v5 = vpop.permute.xlu0 %848  ;;  %v2958_v8 = vmov 45  }
 0x1fa   : > { %913 = vperm.xlu2 %2694, %v3092_v4  }
 0x1fb   : > { %v3509_v7 = vpop.permute.xlu1 %737  ;;  %2696 = vset.pattern.permute.xlu1 %v2943_v53 }
 0x1fc   : > { %4976 = vst [vmem:[#allocation13_spill] sm:$0xff] %v3509_v7  ;;  %925 = vperm.xlu1 %2696, %v3092_v4  }
 0x1fd   : > { %v3513_v18 = vpop.permute.xlu2 %773 }
 0x201   : > { %v864_v53 = vpop.permute.xlu0 %863 }
 0x202   : > { %2697 = vset.pattern.permute.xlu2 %v2956_v26 }
 0x203   : > { %935 = vperm.xlu2 %2697, %v3082_v2  }
 0x204   : > { %v3516_v47 = vpop.permute.xlu1 %747  ;;  %2698 = vset.pattern.permute.xlu1 %v2956_v26 }
 0x205   : > { %4977 = vst [vmem:[#allocation14_spill] sm:$0xff] %v3516_v47  ;;  %939 = vperm.xlu1 %2698, %v3092_v4   ;;  %v682_v47 = vmul.f32 %v3379_v30, %v3258_v3 }
 0x206   : > { %v3521_v29 = vpop.permute.xlu2 %783 }
 0x20b   : > { %2699 = vset.pattern.permute.xlu2 %v2945_v25  ;;  %v3533_v25 = vpop.permute.xlu0 %889 }
 0x20c   : > { %945 = vperm.xlu2 %2699, %v3082_v2  }
 0x20d   : > { %v3525_v40 = vpop.permute.xlu1 %763  ;;  %2701 = vset.pattern.permute.xlu1 %v2957_v35 }
 0x20e   : > { %957 = vperm.xlu1 %2701, %v3082_v2  }
 0x20f   : > { %v3528_v61 = vpop.permute.xlu2 %799 }
 0x210   : > { %4978 = vst [vmem:[#allocation15_spill] sm:$0xff] %v3528_v61  ;;  %v4982_v61 = vmov 54  }
 0x213   : > { %v3546_v22 = vpop.permute.xlu0 %921 }
 0x214   : > { %2702 = vset.pattern.permute.xlu2 %v2957_v35  ;;  %v3543_v35 = vld [vmem:[%s3074_s22 + $0x10] sm:$0xff] }
 0x215   : > { %961 = vperm.xlu2 %2702, %v3092_v4  }
 0x216   : > { %v3531_v60 = vpop.permute.xlu1 %777  ;;  %2703 = vset.pattern.permute.xlu1 %v2958_v8 }
 0x217   : > { %4979 = vst [vmem:[#allocation16_spill] sm:$0xff] %v3531_v60  ;;  %971 = vperm.xlu1 %2703, %v3082_v2   ;;  %v3551_v2 = vld [vmem:[%s3074_s22] sm:$0xff] }
 0x218   : > { %v3536_v26 = vpop.permute.xlu2 %813 }
 0x21d   : > { %2704 = vset.pattern.permute.xlu2 %v2958_v8 }
 0x21e   : > { %975 = vperm.xlu2 %2704, %v3092_v4  }
 0x21f   : > { %v3539_v20 = vpop.permute.xlu1 %795  ;;  %2706 = vset.pattern.permute.xlu1 %v2947_v54  ;;  %v3557_v54 = vpop.permute.xlu0 %949 }
 0x220   : > { %985 = vperm.xlu1 %2706, %v3543_v35  }
 0x221   : > { %v3548_v38 = vpop.permute.xlu2 %831 }
 0x222   : > { %4980 = vst [vmem:[#allocation17_spill] sm:$0xff] %v3548_v38  ;;  %v2960_v38 = vmov 55  }
 0x226   : > { %2707 = vset.pattern.permute.xlu2 %v2959_v45 }
 0x227   : > { %993 = vperm.xlu2 %2707, %v3551_v2   ;;  %v3566_v19 = vpop.permute.xlu0 %981 }
 0x228   : > { %v3554_v8 = vpop.permute.xlu1 %809  ;;  %2708 = vset.pattern.permute.xlu1 %v2959_v45  ;;  %v3570_v45 = vsel %vm240_vm0, 0.0, %v3475_v42  ;;  %v484_v42 = vmul.f32 %v3218_v58, %v3384_v10  ;;  %v494_v10 = vmul.f32 %v3227_v17, %v3234_v27 }
 0x229   : > { %4981 = vst [vmem:[#allocation18_spill] sm:$0xff] %v3554_v8  ;;  %997 = vperm.xlu1 %2708, %v3543_v35   ;;  %v847_v4 = vpop.permute.xlu2 %846 }
 0x22f   : > { %2709 = vset.pattern.permute.xlu2 %v4982_v61  ;;  %v672_v61 = vmul.f32 %v3364_v39, %v3570_v45  ;;  %v3587_v39 = vsel %vm240_vm0, 0.0, %v847_v4  ;;  %v3589_v37 = vpop.permute.xlu0 %1011 }
 0x230   : > { %1007 = vperm.xlu2 %2709, %v3551_v2   ;;  %v870_v58 = vmul.f32 %v864_v53, %v3587_v39 }
 0x231   : > { %v3561_v0 = vpop.permute.xlu1 %823  ;;  %2711 = vset.pattern.permute.xlu1 %v2960_v38  ;;  %v3563_v60 = vpop.permute.xlu2 %856  ;;  %v684_v51 = vadd.f32 %v682_v47, %v672_v61  ;;  %v496_v47 = vadd.f32 %v494_v10, %v484_v42 }
 0x232   : > { %1017 = vperm.xlu1 %2711, %v3551_v2  }
 0x233   : > { %v508_v17 = vadd.f32 %v506_v52, %v496_v47  ;;  %v4984_v52 = vmov 59  }
 0x238   : > { %2712 = vset.pattern.permute.xlu2 %v2960_v38  ;;  %v3584_v38 = vsel %vm249_vm1, %v3419_v11, 0.0 }
 0x239   : > { %1021 = vperm.xlu2 %2712, %v3543_v35   ;;  %v874_v7 = vpop.permute.xlu2 %873  ;;  %v694_v36 = vmul.f32 %v3404_v41, %v3584_v38  ;;  %v4983_v41 = vmov 57  }
 0x23a   : > { %v3575_v8 = vpop.permute.xlu1 %835  ;;  %2713 = vset.pattern.permute.xlu1 %v2961_v48  ;;  %v880_v30 = vmul.f32 %v874_v7, %v3431_v49 }
 0x23b   : > { %1029 = vperm.xlu1 %2713, %v3551_v2   ;;  %v696_v4 = vadd.f32 %v694_v36, %v684_v51  ;;  %v2962_v51 = vmov 58  }
 0x23c   : > { %v882_v59 = vadd.f32 %v880_v30, %v870_v58  ;;  %v2963_v58 = vmov 60  }
 0x23d   : > { %v698_v7 = vadd.f32 %v696_v4, %v508_v17  ;;  %v730_v17 = vmul.f32 %v3485_v44, %v3584_v38 }
 0x241   : > { %2714 = vset.pattern.permute.xlu2 %v2961_v48  ;;  %v1044_v48 = vpop.permute.xlu0 %1043 }
 0x242   : > { %v855_v11 = vpop.permute.xlu1 %854  ;;  %1033 = vperm.xlu2 %2714, %v3543_v35   ;;  %v886_v32 = vpop.permute.xlu2 %885 }
 0x243   : > { %v3600_v61 = vsel %vm249_vm1, %v855_v11, 0.0  ;;  %2716 = vset.pattern.permute.xlu1 %v4983_v41  ;;  %v2964_v41 = vmov 61  }
 0x244   : > { %v892_v43 = vmul.f32 %v886_v32, %v3600_v61  ;;  %1047 = vperm.xlu1 %2716, %v3543_v35  }
 0x246   : > { %v894_v27 = vadd.f32 %v892_v43, %v882_v59  ;;  %v708_v59 = vmul.f32 %v3456_v15, %v3570_v45  ;;  %v718_v43 = vmul.f32 %v3477_v57, %v3258_v3  ;;  %v928_v57 = vmul.f32 %v3546_v22, %v3600_v61 }
 0x248   : > { %v896_v53 = vadd.f32 %v894_v27, %v698_v7  ;;  %v720_v27 = vadd.f32 %v718_v43, %v708_v59 }
 0x24a   : > { %v1050_v42 = vadd.f32 %v1044_v48, %v896_v53  ;;  %v3606_v36 = vpop.permute.xlu1 %867  ;;  %2717 = vset.pattern.permute.xlu2 %v2962_v51  ;;  %v732_v48 = vadd.f32 %v730_v17, %v720_v27  ;;  %v3651_v17 = vsel %vm240_vm0, 0.0, %v3443_v33 }
 0x24b   : > { %1055 = vperm.xlu2 %2717, %v3551_v2   ;;  %v3611_v11 = vpop.permute.xlu2 %903  ;;  %v745_v22 = vmul.f32 %v3494_v14, %v3651_v17  ;;  %v3671_v14 = vsel %vm249_vm1, %v3563_v60, 0.0  ;;  %v790_v60 = vmul.f32 %v3521_v29, %v3258_v3 }
 0x24c   : > { %v3608_v10 = vmax.f32 %v1050_v42, 0.0  ;;  %2718 = vset.pattern.permute.xlu1 %v2962_v51  ;;  %v734_v44 = vadd.f32 %v732_v48, %v3423_v23  ;;  %v3655_v23 = vsel %vm249_vm1, %v3482_v63, 0.0  ;;  %v3663_v48 = vsel %vm240_vm0, 0.0, %v3518_v5 }
 0x24d   : > { %1059 = vperm.xlu1 %2718, %v3543_v35   ;;  %v767_v27 = vmul.f32 %v3525_v40, %v3655_v23 }
 0x24e   : > { %1104 = vrot.lane.b32.xlu0 %v3608_v10, %s2904_s27 }
 0x253   : > { %v3616_v32 = vpop.permute.xlu1 %877  ;;  %2719 = vset.pattern.permute.xlu2 %v4984_v52  ;;  %v2965_v52 = vmov 62  }
 0x254   : > { %1067 = vperm.xlu2 %2719, %v3551_v2   ;;  %v3620_v30 = vpop.permute.xlu2 %913 }
 0x255   : > { %2721 = vset.pattern.permute.xlu1 %v2963_v58 }
 0x256   : > { %1079 = vperm.xlu1 %2721, %v3551_v2  }
 0x25c   : > { %v900_v47 = vpop.permute.xlu1 %899  ;;  %2722 = vset.pattern.permute.xlu2 %v2963_v58 }
 0x25d   : > { %1083 = vperm.xlu2 %2722, %v3543_v35   ;;  %v3624_v4 = vpop.permute.xlu2 %935  ;;  %v906_v53 = vmul.f32 %v900_v47, %v3587_v39 }
 0x25e   : > { %2723 = vset.pattern.permute.xlu1 %v2964_v41 }
 0x25f   : > { %1091 = vperm.xlu1 %2723, %v3551_v2  }
 0x265   : > { %v910_v7 = vpop.permute.xlu1 %909  ;;  %2724 = vset.pattern.permute.xlu2 %v2964_v41  ;;  %v755_v41 = vmul.f32 %v3504_v31, %v3285_v56 }
 0x266   : > { %v916_v42 = vmul.f32 %v910_v7, %v3431_v49  ;;  %1095 = vperm.xlu2 %2724, %v3543_v35   ;;  %v3636_v51 = vpop.permute.xlu2 %945 }
 0x267   : > { %2725 = vset.pattern.permute.xlu1 %v2965_v52  ;;  %v757_v7 = vadd.f32 %v755_v41, %v745_v22  ;;  %v2967_v22 = vmov 77  }
 0x268   : > { %v918_v15 = vadd.f32 %v916_v42, %v906_v53  ;;  %v953_v53 = vmul.f32 %v3557_v54, %v3319_v21 }
 0x269   : > { %v769_v33 = vadd.f32 %v767_v27, %v757_v7 }
 0x26a   : > { %v930_v58 = vadd.f32 %v928_v57, %v918_v15 }
 0x26b   : > { %v771_v5 = vadd.f32 %v769_v33, %v3466_v16  ;;  %v802_v16 = vmul.f32 %v3539_v20, %v3584_v38 }
 0x26c   : > { %v3641_v59 = vadd.f32 %v930_v58, %v734_v44  ;;  %v2966_v44 = vmov 64  }
 0x26e   : > { %v3643_v43 = vpop.permute.xlu1 %925  ;;  %1112 = vrot.lane.b32.xlu2 %v3608_v10, %s2903_s26 }
 0x26f   : > { %v962_v47 = vpop.permute.xlu2 %961  ;;  %2726 = vset.pattern.permute.xlu2 %v2965_v52 }
 0x270   : > { %v965_v40 = vmul.f32 %v962_v47, %v3671_v14  ;;  %v780_v47 = vmul.f32 %v3513_v18, %v3570_v45 }
 0x272   : > { %v792_v41 = vadd.f32 %v790_v60, %v780_v47 }
 0x274   : > { %v804_v7 = vadd.f32 %v802_v16, %v792_v41  ;;  %v2969_v16 = vmov 79  }
 0x276   : > { %1125 = vperm.xlu2 %2726, %v3543_v35   ;;  %v806_v20 = vadd.f32 %v804_v7, %v3427_v28  ;;  %v839_v28 = vmul.f32 %v3575_v8, %v3655_v23 }
 0x277   : > { %v940_v31 = vpop.permute.xlu1 %939 }
 0x278   : > { %v943_v63 = vmul.f32 %v940_v31, %v3663_v48  ;;  %v3673_v42 = vpop.permute.xlu2 %975  ;;  %v988_v31 = vmul.f32 %v3566_v19, %v3431_v49 }
 0x27a   : > { %v955_v52 = vadd.f32 %v953_v53, %v943_v63 }
 0x27c   : > { %v967_v15 = vadd.f32 %v965_v40, %v955_v52  ;;  %v2968_v52 = vmov 78  }
 0x27e   : > { %v3677_v57 = vadd.f32 %v967_v15, %v771_v5  ;;  %2729 = vset.pattern.permute.xlu2 %v2966_v44  ;;  %v827_v15 = vmul.f32 %v3561_v0, %v3285_v56 }
 0x27f   : > { %1143 = vperm.xlu2 %2729, %v3551_v2  }
 0x280   : > { %v3681_v54 = vpop.permute.xlu1 %957 }
 0x281   : > { %v994_v58 = vpop.permute.xlu2 %993 }
 0x282   : > { %v1000_v18 = vmul.f32 %v994_v58, %v3600_v61  ;;  %v817_v58 = vmul.f32 %v3536_v26, %v3651_v17 }
 0x284   : > { %v829_v60 = vadd.f32 %v827_v15, %v817_v58  ;;  %v673_v15 = vmul.f32 %v3366_v34, %v3651_v17  ;;  %v683_v58 = vmul.f32 %v3372_v12, %v3285_v56  ;;  %v507_v12 = vmul.f32 %v3275_v50, %v3438_v13 }
 0x286   : > { %v841_v0 = vadd.f32 %v839_v28, %v829_v60  ;;  %v695_v28 = vmul.f32 %v3381_v9, %v3655_v23  ;;  %v871_v60 = vmul.f32 %v3606_v36, %v3663_v48  ;;  %v893_v36 = vmul.f32 %v3533_v25, %v3671_v14 }
 0x287   : > { %2731 = vset.pattern.permute.xlu2 %v2967_v22  ;;  %v2974_v25 = vmov 108  }
 0x288   : > { %1155 = vperm.xlu2 %2731, %v3551_v2   ;;  %v843_v8 = vadd.f32 %v841_v0, %v3470_v6  ;;  %v881_v6 = vmul.f32 %v3616_v32, %v3319_v21  ;;  %v685_v0 = vadd.f32 %v683_v58, %v673_v15 }
 0x289   : > { %v972_v27 = vpop.permute.xlu1 %971 }
 0x28a   : > { %v978_v33 = vmul.f32 %v972_v27, %v3587_v39  ;;  %v3694_v29 = vpop.permute.xlu2 %1007  ;;  %v1015_v27 = vmul.f32 %v3589_v37, %v3663_v48 }
 0x28c   : > { %v990_v53 = vadd.f32 %v988_v31, %v978_v33 }
 0x28e   : > { %v1002_v63 = vadd.f32 %v1000_v18, %v990_v53  ;;  %v2970_v53 = vmov 93  }
 0x290   : > { %v3698_v40 = vadd.f32 %v1002_v63, %v806_v20  ;;  %2734 = vset.pattern.permute.xlu2 %v2968_v52  ;;  %v2971_v20 = vmov 63  }
 0x291   : > { %1169 = vperm.xlu2 %2734, %v3543_v35   ;;  %2727 = vset.pattern.permute.xlu0 %v2971_v20 }
 0x292   : > { %v3702_v5 = vpop.permute.xlu1 %985 }
 0x293   : > { %v1022_v19 = vpop.permute.xlu2 %1021 }
 0x294   : > { %v1025_v47 = vmul.f32 %v1022_v19, %v3319_v21  ;;  %v485_v19 = vmul.f32 %v3214_v55, %v3441_v1  ;;  %v883_v55 = vadd.f32 %v881_v6, %v871_v60 }
 0x296   : > { %v1027_v31 = vadd.f32 %v1025_v47, %v1015_v27  ;;  %v495_v47 = vmul.f32 %v3225_v62, %v3243_v24  ;;  %v2972_v27 = vmov 94  }
 0x298   : > { %v497_v32 = vadd.f32 %v495_v47, %v485_v19  ;;  %v719_v47 = vmul.f32 %v3501_v46, %v3285_v56 }
 0x299   : > { %2736 = vset.pattern.permute.xlu2 %v2969_v16 }
 0x29a   : > { %1181 = vperm.xlu2 %2736, %v3543_v35   ;;  %v509_v62 = vadd.f32 %v507_v12, %v497_v32 }
 0x29b   : > { %v3713_v41 = vpop.permute.xlu1 %997 }
 0x29c   : > { %v1034_v7 = vpop.permute.xlu2 %1033 }
 0x29d   : > { %v1037_v26 = vmul.f32 %v1034_v7, %v3671_v14  ;;  %v697_v7 = vadd.f32 %v695_v28, %v685_v0  ;;  %v2975_v28 = vmov 122   ;;  %v4988_v0 = vld [vmem:[#allocation10_spill] sm:$0xff] }
 0x29e   : > { %v709_v12 = vmul.f32 %v4988_v0, %v3651_v17 }
 0x29f   : > { %v1039_v33 = vadd.f32 %v1037_v26, %v1027_v31  ;;  %v895_v31 = vadd.f32 %v893_v36, %v883_v55  ;;  %v699_v26 = vadd.f32 %v697_v7, %v509_v62  ;;  %v4987_v55 = vld [vmem:[#allocation4_spill] sm:$0xff]  ;;  %v4989_v7 = vld [vmem:[#allocation2_spill] sm:$0xff] }
 0x2a0   : > { %v519_v32 = vmul.f32 %v4987_v55, %v3441_v1  ;;  %v529_v36 = vmul.f32 %v4989_v7, %v3243_v24  ;;  %v721_v62 = vadd.f32 %v719_v47, %v709_v12  ;;  %v907_v1 = vmul.f32 %v3611_v11, %v3663_v48 }
 0x2a1   : > { %v3719_v18 = vadd.f32 %v1039_v33, %v843_v8  ;;  %v2973_v33 = vmov 107   ;;  %v897_v8 = vadd.f32 %v895_v31, %v699_v26  ;;  %v4990_v31 = vld [vmem:[#allocation8_spill] sm:$0xff]  ;;  %v2977_v55 = vmov 92  }
 0x2a2   : > { %2739 = vset.pattern.permute.xlu2 %v2970_v53  ;;  %v731_v26 = vmul.f32 %v4990_v31, %v3655_v23  ;;  %v531_v24 = vadd.f32 %v529_v36, %v519_v32  ;;  %v2978_v31 = vmov 124  }
 0x2a3   : > { %4985 = vst [vmem:[#allocation19_spill] sm:$0xff] %v3719_v18  ;;  %1199 = vperm.xlu2 %2739, %v3551_v2  }
 0x2a4   : > { %v3723_v63 = vpop.permute.xlu1 %1017 }
 0x2a5   : > { %v3725_v37 = vpop.permute.xlu2 %1055 }
 0x2ab   : > { %2741 = vset.pattern.permute.xlu2 %v2972_v27 }
 0x2ac   : > { %1211 = vperm.xlu2 %2741, %v3551_v2  }
 0x2ad   : > { %v3743_v34 = vpop.permute.xlu1 %1029 }
 0x2ae   : > { %v3747_v9 = vpop.permute.xlu2 %1067 }
 0x2b4   : > { %2744 = vset.pattern.permute.xlu2 %v2973_v33 }
 0x2b5   : > { %1227 = vperm.xlu2 %2744, %v3543_v35  }
 0x2b6   : > { %v1048_v19 = vpop.permute.xlu1 %1047 }
 0x2b7   : > { %v1051_v15 = vadd.f32 %v1048_v19, %v897_v8  ;;  %v3753_v6 = vpop.permute.xlu2 %1083  ;;  %v929_v8 = vmul.f32 %v3643_v43, %v3671_v14  ;;  %v4991_v19 = vld [vmem:[#allocation3_spill] sm:$0xff] }
 0x2b9   : > { %v3755_v50 = vmax.f32 %v1051_v15, 0.0  ;;  %v541_v15 = vmul.f32 %v4991_v19, %v3438_v13  ;;  %v4928_v19 = vmov 95  }
 0x2bb   : > { %1106 = vrot.lane.b32.xlu1 %v3755_v50, %s2904_s27  ;;  %1114 = vrot.lane.b32.xlu0 %v3755_v50, %s2903_s26  ;;  %v543_v12 = vadd.f32 %v541_v15, %v531_v24  ;;  %v2985_v24 = vmov 82   ;;  %v4924_v15 = vmov 97  }
 0x2bd   : > { %2746 = vset.pattern.permute.xlu2 %v2974_v25 }
 0x2be   : > { %1237 = vperm.xlu2 %2746, %v3543_v35  }
 0x2bf   : > { %v1060_v7 = vpop.permute.xlu1 %1059 }
 0x2c0   : > { %v3763_v58 = vpop.permute.xlu2 %1095 }
 0x2c1   : > { %4986 = vst [vmem:[#allocation20_spill] sm:$0xff] %v3763_v58  ;;  %v4932_v58 = vmov 125  }
 0x2c3   : > { %1121 = vperm.xlu1 %2725, %v3551_v2   ;;  %1131 = vperm.xlu0 %2727, %v3551_v2  }
 0x2c6   : > { %2749 = vset.pattern.permute.xlu2 %v2975_v28 }
 0x2c7   : > { %1257 = vperm.xlu2 %2749, %v3551_v2  }
 0x2c8   : > { %v3769_v60 = vpop.permute.xlu2 %1112 }
 0x2cb   : > { %2728 = vset.pattern.permute.xlu1 %v2971_v20  ;;  %2732 = vset.pattern.permute.xlu0 %v2967_v22  ;;  %v917_v22 = vmul.f32 %v3620_v30, %v3319_v21  ;;  %v2976_v20 = vmov 123   ;;  %v733_v30 = vadd.f32 %v731_v26, %v721_v62  ;;  %v2979_v62 = vmov 65  }
 0x2cc   : > { %1135 = vperm.xlu1 %2728, %v3543_v35   ;;  %1159 = vperm.xlu0 %2732, %v3543_v35  }
 0x2cd   : > { %v919_v47 = vadd.f32 %v917_v22, %v907_v1  ;;  %v735_v11 = vadd.f32 %v733_v30, %v543_v12  ;;  %v2980_v22 = vmov 109   ;;  %v3857_v30 = vpop.permute.xlu1 %1079  ;;  %v2989_v12 = vmov 111  }
 0x2cf   : > { %2751 = vset.pattern.permute.xlu2 %v2976_v20  ;;  %v931_v0 = vadd.f32 %v929_v8, %v919_v47  ;;  %v4930_v8 = vmov 80   ;;  %v1072_v47 = vpop.permute.xlu0 %1071 }
 0x2d0   : > { %1267 = vperm.xlu2 %2751, %v3551_v2   ;;  %v3785_v46 = vpop.permute.xlu2 %1125 }
 0x2d1   : > { %v933_v43 = vadd.f32 %v931_v0, %v735_v11 }
 0x2d3   : > { %v1063_v32 = vadd.f32 %v1060_v7, %v933_v43 }
 0x2d4   : > { %2730 = vset.pattern.permute.xlu1 %v2966_v44  ;;  %2737 = vset.pattern.permute.xlu0 %v2977_v55 }
 0x2d5   : > { %1147 = vperm.xlu1 %2730, %v3543_v35   ;;  %1189 = vperm.xlu0 %2737, %v3551_v2   ;;  %v3806_v44 = vmax.f32 %v1063_v32, 0.0  ;;  %v3869_v7 = vpop.permute.xlu1 %1091  ;;  %v4923_v32 = vmov 126  }
 0x2d7   : > { %v3867_v11 = vpop.permute.xlu0 %1104 }
 0x2d8   : > { %2754 = vset.pattern.permute.xlu2 %v2978_v31 }
 0x2d9   : > { %1283 = vperm.xlu2 %2754, %v3543_v35   ;;  %v3800_v13 = vpop.permute.xlu2 %1143 }
 0x2dd   : > { %2733 = vset.pattern.permute.xlu1 %v2968_v52  ;;  %2742 = vset.pattern.permute.xlu0 %v2972_v27  ;;  %v1062_v27 = vadd.f32 %v3725_v37, %v3641_v59 }
 0x2de   : > { %1165 = vperm.xlu1 %2733, %v3551_v2   ;;  %1215 = vperm.xlu0 %2742, %v3543_v35  }
 0x2df   : > { %v3826_v1 = vmax.f32 %v1062_v27, 0.0 }
 0x2e1   : > { %1294 = vrot.lane.b32.xlu2 %v3806_v44, %s2904_s27 }
 0x2e2   : > { %v3810_v36 = vpop.permute.xlu2 %1155  ;;  %2755 = vset.pattern.permute.xlu2 %v2979_v62 }
 0x2e3   : > { %4992 = vst [vmem:[#allocation4_spill] sm:$0xff] %v3810_v36 }
 0x2e6   : > { %2735 = vset.pattern.permute.xlu1 %v2969_v16  ;;  %2747 = vset.pattern.permute.xlu0 %v2980_v22  ;;  %v2981_v16 = vmov 66  }
 0x2e7   : > { %1177 = vperm.xlu1 %2735, %v3551_v2   ;;  %1245 = vperm.xlu0 %2747, %v3551_v2  }
 0x2e9   : > { %1309 = vperm.xlu2 %2755, %v3551_v2  }
 0x2eb   : > { %v3816_v52 = vpop.permute.xlu2 %1169 }
 0x2ef   : > { %2738 = vset.pattern.permute.xlu1 %v2977_v55  ;;  %2752 = vset.pattern.permute.xlu0 %v2976_v20  ;;  %v4931_v20 = vmov 67   ;;  %v4925_v55 = vmov 96  }
 0x2f0   : > { %1193 = vperm.xlu1 %2738, %v3543_v35   ;;  %1271 = vperm.xlu0 %2752, %v3543_v35  }
 0x2f1   : > { %2758 = vset.pattern.permute.xlu2 %v2981_v16 }
 0x2f2   : > { %1323 = vperm.xlu2 %2758, %v3543_v35  }
 0x2f4   : > { %v3824_v26 = vpop.permute.xlu2 %1181 }
 0x2f8   : > { %2740 = vset.pattern.permute.xlu1 %v2970_v53  ;;  %1300 = vrot.lane.b32.xlu0 %v3826_v1, %s2903_s26  ;;  %v4929_v53 = vmov 81  }
 0x2f9   : > { %1203 = vperm.xlu1 %2740, %v3543_v35   ;;  %2756 = vset.pattern.permute.xlu0 %v2979_v62 }
 0x2fa   : > { %2760 = vset.pattern.permute.xlu2 %v4931_v20 }
 0x2fb   : > { %1335 = vperm.xlu2 %2760, %v3543_v35  }
 0x2fd   : > { %v3834_v59 = vpop.permute.xlu2 %1199 }
 0x300   : > { %1313 = vperm.xlu0 %2756, %v3543_v35  }
 0x301   : > { %2743 = vset.pattern.permute.xlu1 %v2973_v33 }
 0x302   : > { %1223 = vperm.xlu1 %2743, %v3551_v2  }
 0x303   : > { %2763 = vset.pattern.permute.xlu2 %v4929_v53 }
 0x304   : > { %1355 = vperm.xlu2 %2763, %v3551_v2  }
 0x306   : > { %v3841_v37 = vpop.permute.xlu2 %1211 }
 0x308   : > { %2761 = vset.pattern.permute.xlu0 %v4930_v8  ;;  %v4996_v8 = vld [vmem:[#allocation13_spill] sm:$0xff] }
 0x309   : > { %1345 = vperm.xlu0 %2761, %v3551_v2  }
 0x30a   : > { %2745 = vset.pattern.permute.xlu1 %v2974_v25 }
 0x30b   : > { %1233 = vperm.xlu1 %2745, %v3551_v2  }
 0x30c   : > { %2765 = vset.pattern.permute.xlu2 %v2985_v24 }
 0x30d   : > { %1367 = vperm.xlu2 %2765, %v3551_v2  }
 0x30f   : > { %v3848_v33 = vpop.permute.xlu2 %1227 }
 0x311   : > { %2766 = vset.pattern.permute.xlu0 %v2985_v24 }
 0x312   : > { %1371 = vperm.xlu0 %2766, %v3543_v35  }
 0x313   : > { %2748 = vset.pattern.permute.xlu1 %v2980_v22 }
 0x314   : > { %1249 = vperm.xlu1 %2748, %v3543_v35  }
 0x315   : > { %2768 = vset.pattern.permute.xlu2 %v4928_v19  ;;  %v1173_v19 = vmul.f32 %v3816_v52, %v3755_v50 }
 0x316   : > { %1385 = vperm.xlu2 %2768, %v3543_v35  }
 0x318   : > { %v3854_v25 = vpop.permute.xlu2 %1237 }
 0x31a   : > { %2771 = vset.pattern.permute.xlu0 %v4924_v15 }
 0x31b   : > { %1403 = vperm.xlu0 %2771, %v3551_v2  }
 0x31c   : > { %2750 = vset.pattern.permute.xlu1 %v2975_v28  ;;  %v4922_v28 = vmov 110  }
 0x31d   : > { %1261 = vperm.xlu1 %2750, %v3543_v35  }
 0x31e   : > { %2770 = vset.pattern.permute.xlu2 %v4925_v55 }
 0x31f   : > { %1395 = vperm.xlu2 %2770, %v3543_v35  }
 0x321   : > { %v3864_v0 = vpop.permute.xlu2 %1257 }
 0x322   : > { %4993 = vst [vmem:[#allocation10_spill] sm:$0xff] %v3864_v0 }
 0x323   : > { %2776 = vset.pattern.permute.xlu0 %v2989_v12 }
 0x324   : > { %1431 = vperm.xlu0 %2776, %v3543_v35  }
 0x325   : > { %2753 = vset.pattern.permute.xlu1 %v2978_v31  ;;  %v1075_v31 = vadd.f32 %v1072_v47, %v3677_v57  ;;  %v4926_v57 = vmov 68  }
 0x326   : > { %1279 = vperm.xlu1 %2753, %v3551_v2  }
 0x327   : > { %2773 = vset.pattern.permute.xlu2 %v4922_v28  ;;  %v3884_v27 = vmax.f32 %v1075_v31, 0.0 }
 0x328   : > { %1417 = vperm.xlu2 %2773, %v3551_v2  }
 0x32a   : > { %v3875_v43 = vpop.permute.xlu2 %1267 }
 0x32b   : > { %4994 = vst [vmem:[#allocation2_spill] sm:$0xff] %v3875_v43  ;;  %v952_v43 = vmul.f32 %v3636_v51, %v3431_v49  ;;  %v4998_v51 = vmov 67  }
 0x32c   : > { %2781 = vset.pattern.permute.xlu0 %v4923_v32 }
 0x32d   : > { %v1107_v62 = vpop.permute.xlu1 %1106  ;;  %v1115_v22 = vpop.permute.xlu0 %1114  ;;  %1463 = vperm.xlu0 %2781, %v3551_v2  }
 0x32e   : > { %1292 = vrot.lane.b32.xlu1 %v3826_v1, %s2904_s27  ;;  %v3906_v31 = vsel %vm249_vm1, %v1115_v22, 0.0 }
 0x32f   : > { %2757 = vset.pattern.permute.xlu1 %v2981_v16  ;;  %v4927_v16 = vmov 112   ;;  %v1185_v22 = vmul.f32 %v3824_v26, %v3906_v31  ;;  %v964_v26 = vmul.f32 %v3681_v54, %v3600_v61 }
 0x330   : > { %2775 = vset.pattern.permute.xlu2 %v2989_v12  ;;  %v3903_v12 = vsel %vm240_vm0, 0.0, %v1107_v62  ;;  %v744_v62 = vmul.f32 %v4996_v8, %v3570_v45 }
 0x331   : > { %1427 = vperm.xlu2 %2775, %v3551_v2  }
 0x333   : > { %v3886_v24 = vpop.permute.xlu2 %1283 }
 0x335   : > { %v3888_v28 = vpop.permute.xlu1 %1121  ;;  %v3890_v32 = vpop.permute.xlu0 %1131  ;;  %1492 = vrot.lane.b32.xlu0 %v3884_v27, %s2904_s27 }
 0x336   : > { %1302 = vrot.lane.b32.xlu1 %v3806_v44, %s2903_s26  ;;  %2785 = vset.pattern.permute.xlu0 %v4926_v57  ;;  %v4995_v57 = vld [vmem:[#allocation14_spill] sm:$0xff] }
 0x339   : > { %2778 = vset.pattern.permute.xlu2 %v4927_v16  ;;  %v754_v16 = vmul.f32 %v4995_v57, %v3258_v3 }
 0x33a   : > { %1443 = vperm.xlu2 %2778, %v3543_v35  }
 0x33b   : > { %v3899_v47 = vpop.permute.xlu2 %1294  ;;  %v756_v0 = vadd.f32 %v754_v16, %v744_v62 }
 0x33d   : > { %1507 = vperm.xlu0 %2785, %v3551_v2  }
 0x33e   : > { %v3908_v15 = vpop.permute.xlu1 %1135  ;;  %v1160_v55 = vpop.permute.xlu0 %1159  ;;  %1319 = vperm.xlu1 %2757, %v3551_v2  }
 0x33f   : > { %v1163_v53 = vmul.f32 %v1160_v55, %v3903_v12  ;;  %v4997_v55 = vld [vmem:[#allocation9_spill] sm:$0xff] }
 0x340   : > { %v766_v8 = vmul.f32 %v4997_v55, %v3584_v38 }
 0x341   : > { %v1175_v20 = vadd.f32 %v1173_v19, %v1163_v53  ;;  %v942_v53 = vmul.f32 %v3624_v4, %v3587_v39  ;;  %v4933_v19 = vmov 70   ;;  %v4999_v4 = vld [vmem:[#allocation5_spill] sm:$0xff] }
 0x342   : > { %2780 = vset.pattern.permute.xlu2 %v4932_v58  ;;  %v4936_v58 = vmov 127  }
 0x343   : > { %v3922_v36 = vadd.f32 %v1185_v22, %v1175_v20  ;;  %1457 = vperm.xlu2 %2780, %v3543_v35   ;;  %v3926_v52 = vpop.permute.xlu2 %1309  ;;  %v768_v20 = vadd.f32 %v766_v8, %v756_v0  ;;  %v954_v57 = vadd.f32 %v952_v43, %v942_v53  ;;  %v5000_v43 = vmov 80  }
 0x345   : > { %2790 = vset.pattern.permute.xlu0 %v4933_v19  ;;  %v966_v22 = vadd.f32 %v964_v26, %v954_v57  ;;  %v770_v55 = vadd.f32 %v768_v20, %v4999_v4  ;;  %v5003_v4 = vmov 81  }
 0x346   : > { %1533 = vperm.xlu0 %2790, %v3543_v35   ;;  %2759 = vset.pattern.permute.xlu1 %v4998_v51  ;;  %v4934_v51 = vmov 85  }
 0x347   : > { %v3937_v16 = vpop.permute.xlu1 %1147  ;;  %v3939_v62 = vpop.permute.xlu0 %1189  ;;  %1331 = vperm.xlu1 %2759, %v3551_v2   ;;  %v968_v54 = vadd.f32 %v966_v22, %v770_v55  ;;  %v4937_v22 = vmov 99  }
 0x349   : > { %v1074_v0 = vadd.f32 %v3747_v9, %v968_v54  ;;  %v4935_v9 = vmov 69  }
 0x34b   : > { %2783 = vset.pattern.permute.xlu2 %v4936_v58  ;;  %v3957_v20 = vmax.f32 %v1074_v0, 0.0 }
 0x34c   : > { %1475 = vperm.xlu2 %2783, %v3551_v2   ;;  %v3945_v19 = vpop.permute.xlu2 %1323 }
 0x34e   : > { %2795 = vset.pattern.permute.xlu0 %v4934_v51 }
 0x34f   : > { %1565 = vperm.xlu0 %2795, %v3551_v2   ;;  %2762 = vset.pattern.permute.xlu1 %v5000_v43  ;;  %v4938_v43 = vmov 114  }
 0x350   : > { %v3951_v8 = vpop.permute.xlu1 %1165  ;;  %v1216_v53 = vpop.permute.xlu0 %1215  ;;  %1349 = vperm.xlu1 %2762, %v3543_v35  }
 0x351   : > { %5001 = vst [vmem:[#allocation8_spill] sm:$0xff] %v3951_v8  ;;  %v3955_v26 = vmul.f32 %v1216_v53, %v3906_v31  ;;  %v5006_v53 = vmov 95   ;;  %v5011_v8 = vld [vmem:[#allocation15_spill] sm:$0xff] }
 0x353   : > { %5002 = vst [vmem:[#allocation3_spill] sm:$0xff] %v3955_v26 }
 0x354   : > { %1490 = vrot.lane.b32.xlu2 %v3957_v20, %s2904_s27 }
 0x355   : > { %v3961_v57 = vpop.permute.xlu2 %1335  ;;  %2787 = vset.pattern.permute.xlu2 %v4935_v9  ;;  %v5008_v9 = vld [vmem:[#allocation16_spill] sm:$0xff] }
 0x356   : > { %v781_v58 = vmul.f32 %v5008_v9, %v3651_v17  ;;  %v979_v17 = vmul.f32 %v3673_v42, %v3663_v48  ;;  %v1001_v9 = vmul.f32 %v3713_v41, %v3671_v14  ;;  %v5015_v14 = vld [vmem:[#allocation7_spill] sm:$0xff] }
 0x357   : > { %2800 = vset.pattern.permute.xlu0 %v4937_v22  ;;  %v5009_v22 = vld [vmem:[#allocation11_spill] sm:$0xff] }
 0x358   : > { %1593 = vperm.xlu0 %2800, %v3543_v35   ;;  %2764 = vset.pattern.permute.xlu1 %v5003_v4  ;;  %v791_v26 = vmul.f32 %v5009_v22, %v3285_v56 }
 0x359   : > { %v3967_v55 = vpop.permute.xlu1 %1177  ;;  %v3969_v54 = vpop.permute.xlu0 %1245  ;;  %1359 = vperm.xlu1 %2764, %v3543_v35  }
 0x35a   : > { %5004 = vst [vmem:[#allocation14_spill] sm:$0xff] %v3967_v55  ;;  %v3990_v55 = vld [vmem:[%s3074_s22 + $0x18] sm:$0xff] }
 0x35b   : > { %5005 = vst [vmem:[#allocation13_spill] sm:$0xff] %v3969_v54  ;;  %v803_v54 = vmul.f32 %v5011_v8, %v3655_v23  ;;  %v1086_v23 = vadd.f32 %v3857_v30, %v3698_v40  ;;  %v5014_v8 = vmov 70   ;;  %v4939_v40 = vmov 72  }
 0x35c   : > { %1500 = vrot.lane.b32.xlu2 %v3884_v27, %s2903_s26 }
 0x35d   : > { %v4013_v41 = vmax.f32 %v1086_v23, 0.0  ;;  %v5020_v23 = vmov 110  }
 0x35e   : > { %v3974_v0 = vpop.permute.xlu2 %1355 }
 0x360   : > { %2805 = vset.pattern.permute.xlu0 %v4938_v43  ;;  %v793_v43 = vadd.f32 %v791_v26, %v781_v58  ;;  %v5012_v58 = vmov 96  }
 0x361   : > { %1625 = vperm.xlu0 %2805, %v3551_v2   ;;  %2767 = vset.pattern.permute.xlu1 %v5006_v53  ;;  %v989_v53 = vmul.f32 %v3702_v5, %v3319_v21 }
 0x362   : > { %v3979_v4 = vpop.permute.xlu1 %1193  ;;  %v3981_v51 = vpop.permute.xlu0 %1271  ;;  %1381 = vperm.xlu1 %2767, %v3551_v2   ;;  %v805_v21 = vadd.f32 %v803_v54, %v793_v43  ;;  %v5017_v43 = vmov 97  }
 0x363   : > { %5007 = vst [vmem:[#allocation9_spill] sm:$0xff] %v3979_v4  ;;  %v5010_v4 = vmov 0   ;;  %v991_v5 = vadd.f32 %v989_v53, %v979_v17  ;;  %v4941_v17 = vmov 83  }
 0x364   : > { %1517 = vperm.xlu2 %2787, %v3551_v2   ;;  %v807_v42 = vadd.f32 %v805_v21, %v5015_v14 }
 0x365   : > { %v1003_v48 = vadd.f32 %v1001_v9, %v991_v5 }
 0x367   : > { %v3994_v18 = vpop.permute.xlu2 %1367 }
 0x369   : > { %2810 = vset.pattern.permute.xlu0 %v5010_v4 }
 0x36a   : > { %1657 = vperm.xlu0 %2810, %v3990_v55   ;;  %v1301_v56 = vpop.permute.xlu0 %1300  ;;  %2769 = vset.pattern.permute.xlu1 %v5012_v58  ;;  %v1005_v58 = vadd.f32 %v1003_v48, %v807_v42  ;;  %v5021_v42 = vmov 112  }
 0x36b   : > { %v4005_v26 = vpop.permute.xlu1 %1203  ;;  %1391 = vperm.xlu1 %2769, %v3551_v2  }
 0x36c   : > { %5013 = vst [vmem:[#allocation5_spill] sm:$0xff] %v4005_v26  ;;  %2789 = vset.pattern.permute.xlu2 %v5014_v8  ;;  %v1087_v30 = vadd.f32 %v3753_v6, %v1005_v58  ;;  %v4940_v8 = vmov 84  }
 0x36d   : > { %1529 = vperm.xlu2 %2789, %v3551_v2  }
 0x36e   : > { %v4029_v9 = vmax.f32 %v1087_v30, 0.0  ;;  %v4943_v30 = vmov 86  }
 0x370   : > { %v4015_v22 = vpop.permute.xlu2 %1385  ;;  %5018 = vst [vmem:[#allocation11_spill] sm:$0xff] %v4029_v9 }
 0x371   : > { %5016 = vst [vmem:[#allocation16_spill] sm:$0xff] %v4015_v22 }
 0x372   : > { %1690 = vrot.lane.b32.xlu0 %v4013_v41, %s2904_s27  ;;  %v4019_v54 = vpop.permute.xlu0 %1313 }
 0x373   : > { %2772 = vset.pattern.permute.xlu1 %v5017_v43  ;;  %2817 = vset.pattern.permute.xlu0 %v4939_v40  ;;  %v4942_v43 = vmov 98  }
 0x374   : > { %v4024_v53 = vpop.permute.xlu1 %1223  ;;  %1407 = vperm.xlu1 %2772, %v3543_v35  }
 0x375   : > { %2792 = vset.pattern.permute.xlu2 %v4941_v17  ;;  %v5022_v17 = vmov 125  }
 0x376   : > { %1547 = vperm.xlu2 %2792, %v3543_v35  }
 0x379   : > { %v4033_v21 = vpop.permute.xlu2 %1395 }
 0x37a   : > { %1700 = vrot.lane.b32.xlu0 %v4029_v9, %s2903_s26  ;;  %5019 = vst [vmem:[#allocation15_spill] sm:$0xff] %v4033_v21  ;;  %v5023_v21 = vmov 99  }
 0x37b   : > { %v1346_v5 = vpop.permute.xlu0 %1345 }
 0x37c   : > { %2774 = vset.pattern.permute.xlu1 %v5020_v23  ;;  %v4055_v23 = vsel %vm249_vm1, %v1301_v56, 0.0  ;;  %v1287_v56 = vmul.f32 %v3886_v24, %v3906_v31  ;;  %v4947_v24 = vmov 100  }
 0x37d   : > { %v4036_v6 = vpop.permute.xlu1 %1233  ;;  %1421 = vperm.xlu1 %2774, %v3543_v35  }
 0x37e   : > { %2794 = vset.pattern.permute.xlu2 %v4940_v8 }
 0x37f   : > { %1557 = vperm.xlu2 %2794, %v3543_v35  }
 0x382   : > { %1717 = vperm.xlu0 %2817, %v3551_v2   ;;  %v4042_v48 = vpop.permute.xlu2 %1417 }
 0x384   : > { %v4044_v14 = vpop.permute.xlu0 %1371 }
 0x385   : > { %2777 = vset.pattern.permute.xlu1 %v5021_v42 }
 0x386   : > { %v4047_v58 = vpop.permute.xlu1 %1249  ;;  %1439 = vperm.xlu1 %2777, %v3551_v2  }
 0x387   : > { %2797 = vset.pattern.permute.xlu2 %v4942_v43  ;;  %v1275_v43 = vmul.f32 %v3981_v51, %v3755_v50 }
 0x388   : > { %1579 = vperm.xlu2 %2797, %v3551_v2  }
 0x38a   : > { %2822 = vset.pattern.permute.xlu0 %v4943_v30 }
 0x38b   : > { %1747 = vperm.xlu0 %2822, %v3543_v35   ;;  %v4057_v40 = vpop.permute.xlu2 %1427 }
 0x38d   : > { %v1404_v42 = vpop.permute.xlu0 %1403 }
 0x38e   : > { %v4060_v8 = vmul.f32 %v1404_v42, %v4055_v23  ;;  %2779 = vset.pattern.permute.xlu1 %v5022_v17  ;;  %v4946_v42 = vmov 101  }
 0x38f   : > { %v1262_v22 = vpop.permute.xlu1 %1261  ;;  %1453 = vperm.xlu1 %2779, %v3551_v2  }
 0x390   : > { %v1265_v30 = vmul.f32 %v1262_v22, %v3903_v12  ;;  %2799 = vset.pattern.permute.xlu2 %v5023_v21  ;;  %v5025_v22 = vmov 126  }
 0x391   : > { %1589 = vperm.xlu2 %2799, %v3551_v2  }
 0x392   : > { %v1277_v26 = vadd.f32 %v1275_v43, %v1265_v30  ;;  %v5029_v30 = vmov 127  }
 0x393   : > { %2827 = vset.pattern.permute.xlu0 %v4946_v42 }
 0x394   : > { %v4072_v17 = vadd.f32 %v1287_v56, %v1277_v26  ;;  %1779 = vperm.xlu0 %2827, %v3551_v2   ;;  %v4075_v9 = vpop.permute.xlu2 %1443  ;;  %v4948_v26 = vmov 103  }
 0x396   : > { %5024 = vst [vmem:[#allocation7_spill] sm:$0xff] %v4072_v17  ;;  %v4077_v51 = vpop.permute.xlu0 %1431  ;;  %v5031_v17 = vld [vmem:[#allocation12_spill] sm:$0xff] }
 0x397   : > { %2782 = vset.pattern.permute.xlu1 %v5025_v22  ;;  %v5030_v22 = vld [vmem:[#allocation18_spill] sm:$0xff] }
 0x398   : > { %v4080_v21 = vpop.permute.xlu1 %1279  ;;  %1467 = vperm.xlu1 %2782, %v3543_v35   ;;  %v816_v42 = vmul.f32 %v5030_v22, %v3570_v45  ;;  %v1374_v45 = vmul.f32 %v3994_v18, %v4055_v23 }
 0x399   : > { %5026 = vst [vmem:[#allocation21_spill] sm:$0xff] %v4080_v21  ;;  %2802 = vset.pattern.permute.xlu2 %v4947_v24  ;;  %v4098_v24 = vld [vmem:[%s3074_s22 + $0x10] sm:$0xff] }
 0x39a   : > { %1605 = vperm.xlu2 %2802, %v3543_v35  }
 0x39c   : > { %2832 = vset.pattern.permute.xlu0 %v4948_v26 }
 0x39d   : > { %1805 = vperm.xlu0 %2832, %v3543_v35   ;;  %v4087_v2 = vpop.permute.xlu2 %1457  ;;  %v1362_v35 = vmul.f32 %v3974_v0, %v3826_v1  ;;  %v4114_v0 = vsel %vm240_vm0, 0.0, %v3899_v47  ;;  %v1014_v47 = vmul.f32 %v3694_v29, %v3587_v39 }
 0x39e   : > { %5027 = vst [vmem:[#allocation22_spill] sm:$0xff] %v4087_v2  ;;  %v4950_v2 = vmov 113   ;;  %v1317_v18 = vmul.f32 %v4019_v54, %v4114_v0  ;;  %v1129_v54 = vmul.f32 %v3785_v46, %v3903_v12 }
 0x39f   : > { %v4089_v43 = vpop.permute.xlu0 %1463 }
 0x3a0   : > { %5028 = vst [vmem:[#allocation23_spill] sm:$0xff] %v4089_v43  ;;  %2784 = vset.pattern.permute.xlu1 %v5029_v30  ;;  %v1293_v56 = vpop.permute.xlu1 %1292  ;;  %v826_v30 = vmul.f32 %v5031_v17, %v3258_v3  ;;  %v1024_v43 = vmul.f32 %v3723_v63, %v3431_v49  ;;  %v1139_v3 = vmul.f32 %v3908_v15, %v3755_v50  ;;  %v4122_v17 = vld [vmem:[%s3074_s22] sm:$0xff]  ;;  %v5032_v49 = vld [vmem:[#allocation17_spill] sm:$0xff] }
 0x3a1   : > { %v4095_v21 = vsel %vm240_vm0, 0.0, %v1293_v56  ;;  %1479 = vperm.xlu1 %2784, %v4098_v24   ;;  %v838_v63 = vmul.f32 %v5032_v49, %v3584_v38  ;;  %v5033_v49 = vmov 68  }
 0x3a2   : > { %v1352_v26 = vmul.f32 %v1346_v5, %v4095_v21  ;;  %2804 = vset.pattern.permute.xlu2 %v4950_v2  ;;  %v828_v22 = vadd.f32 %v826_v30, %v816_v42  ;;  %v4949_v5 = vmov 118   ;;  %v1151_v30 = vmul.f32 %v3937_v16, %v3906_v31 }
 0x3a3   : > { %1619 = vperm.xlu2 %2804, %v4098_v24   ;;  %v1026_v29 = vadd.f32 %v1024_v43, %v1014_v47  ;;  %v4956_v2 = vmov 115   ;;  %v5034_v43 = vld [vmem:[#allocation6_spill] sm:$0xff] }
 0x3a4   : > { %v1364_v56 = vadd.f32 %v1362_v35, %v1352_v26  ;;  %v1036_v26 = vmul.f32 %v3743_v34, %v3600_v61  ;;  %v840_v39 = vadd.f32 %v838_v63, %v828_v22  ;;  %v1141_v34 = vadd.f32 %v1139_v3, %v1129_v54 }
 0x3a5   : > { %2837 = vset.pattern.permute.xlu0 %v4949_v5  ;;  %v5035_v63 = vmov 4  }
 0x3a6   : > { %1837 = vperm.xlu0 %2837, %v4122_v17   ;;  %v4125_v42 = vadd.f32 %v1374_v45, %v1364_v56  ;;  %v1476_v35 = vpop.permute.xlu2 %1475  ;;  %v1327_v45 = vmul.f32 %v3945_v19, %v3806_v44  ;;  %v1038_v19 = vadd.f32 %v1036_v26, %v1026_v29  ;;  %v1153_v5 = vadd.f32 %v1151_v30, %v1141_v34 }
 0x3a7   : > { %v4133_v15 = vpop.permute.xlu0 %1492  ;;  %v4142_v38 = vmul.f32 %v1476_v35, %v4055_v23  ;;  %v842_v22 = vadd.f32 %v840_v39, %v5034_v43  ;;  %v1138_v29 = vmul.f32 %v3890_v32, %v3608_v10 }
 0x3a8   : > { %v1303_v56 = vpop.permute.xlu1 %1302  ;;  %v1329_v46 = vadd.f32 %v1327_v45, %v1317_v18 }
 0x3a9   : > { %v4145_v61 = vsel %vm249_vm1, %v1303_v56, 0.0  ;;  %1498 = vrot.lane.b32.xlu1 %v3957_v20, %s2903_s26  ;;  %v1040_v18 = vadd.f32 %v1038_v19, %v842_v22  ;;  %v4167_v56 = vsel %vm240_vm0, 0.0, %v3867_v11  ;;  %v4191_v19 = vsel %vm249_vm1, %v3769_v60, 0.0 }
 0x3aa   : > { %v1339_v16 = vmul.f32 %v3961_v57, %v4145_v61  ;;  %2786 = vset.pattern.permute.xlu1 %v5033_v49  ;;  %v1128_v39 = vmul.f32 %v3888_v28, %v4167_v56  ;;  %v4953_v49 = vmov 74   ;;  %v5036_v22 = vmov 69  }
 0x3ab   : > { %2807 = vset.pattern.permute.xlu2 %v4956_v2  ;;  %v1098_v30 = vadd.f32 %v3869_v7, %v1040_v18  ;;  %v5037_v60 = vmov 1  }
 0x3ac   : > { %v1341_v35 = vadd.f32 %v1339_v16, %v1329_v46  ;;  %1637 = vperm.xlu2 %2807, %v4122_v17   ;;  %v1140_v11 = vadd.f32 %v1138_v29, %v1128_v39  ;;  %v1316_v16 = vmul.f32 %v3926_v52, %v4095_v21  ;;  %v1150_v52 = vmul.f32 %v3800_v13, %v4191_v19 }
 0x3ad   : > { %v4176_v34 = vmax.f32 %v1098_v30, 0.0 }
 0x3ae   : > { %2842 = vset.pattern.permute.xlu0 %v5035_v63  ;;  %v4156_v3 = vadd.f32 %v1341_v35, %v1153_v5  ;;  %v1491_v47 = vpop.permute.xlu2 %1490  ;;  %v4170_v5 = vld [vmem:[%s3074_s22 + $0x8] sm:$0xff] }
 0x3af   : > { %v1508_v57 = vpop.permute.xlu0 %1507  ;;  %1865 = vperm.xlu0 %2842, %v3990_v55   ;;  %v4160_v26 = vsel %vm240_vm0, 0.0, %v1491_v47 }
 0x3b0   : > { %v1320_v54 = vpop.permute.xlu1 %1319  ;;  %v1514_v45 = vmul.f32 %v1508_v57, %v4160_v26  ;;  %v1152_v57 = vadd.f32 %v1150_v52, %v1140_v11  ;;  %v5039_v11 = vmov 2   ;;  %v5040_v52 = vmov 84  }
 0x3b1   : > { %1511 = vperm.xlu1 %2786, %v4098_v24   ;;  %v1326_v7 = vmul.f32 %v1320_v54, %v3826_v1 }
 0x3b3   : > { %v1328_v18 = vadd.f32 %v1326_v7, %v1316_v16  ;;  %v5038_v16 = vmov 83  }
 0x3b4   : > { %2809 = vset.pattern.permute.xlu2 %v5010_v4  ;;  %v4959_v4 = vmov 73  }
 0x3b5   : > { %1652 = vperm.xlu2 %2809, %v4170_v5  }
 0x3b6   : > { %v1501_v46 = vpop.permute.xlu2 %1500 }
 0x3b7   : > { %1896 = vrot.lane.b32.xlu0 %v4176_v34, %s2903_s26  ;;  %v4186_v28 = vsel %vm249_vm1, %v1501_v46, 0.0 }
 0x3b8   : > { %v1534_v32 = vpop.permute.xlu0 %1533  ;;  %2846 = vset.pattern.permute.xlu0 %v4953_v49 }
 0x3b9   : > { %v4194_v35 = vmul.f32 %v1534_v32, %v4186_v28  ;;  %v1332_v43 = vpop.permute.xlu1 %1331  ;;  %2788 = vset.pattern.permute.xlu1 %v5036_v22  ;;  %v4951_v32 = vmov 89  }
 0x3ba   : > { %v1338_v47 = vmul.f32 %v1332_v43, %v4055_v23  ;;  %1521 = vperm.xlu1 %2788, %v4098_v24  }
 0x3bc   : > { %v1340_v54 = vadd.f32 %v1338_v47, %v1328_v18 }
 0x3bd   : > { %2812 = vset.pattern.permute.xlu2 %v5037_v60 }
 0x3be   : > { %v4201_v30 = vadd.f32 %v1340_v54, %v1152_v57  ;;  %1667 = vperm.xlu2 %2812, %v3990_v55   ;;  %v1518_v39 = vpop.permute.xlu2 %1517  ;;  %v1375_v57 = vmul.f32 %v4044_v14, %v4145_v61 }
 0x3bf   : > { %1909 = vperm.xlu0 %2846, %v4098_v24   ;;  %v1524_v29 = vmul.f32 %v1518_v39, %v3957_v20 }
 0x3c1   : > { %v4207_v46 = vpop.permute.xlu0 %1565  ;;  %v4209_v13 = vadd.f32 %v1524_v29, %v1514_v45  ;;  %v4952_v29 = vmov 91  }
 0x3c2   : > { %v1350_v7 = vpop.permute.xlu1 %1349  ;;  %2791 = vset.pattern.permute.xlu1 %v5038_v16  ;;  %v4232_v16 = vsel %vm240_vm0, 0.0, %v4133_v15  ;;  %v4955_v15 = vmov 106  }
 0x3c3   : > { %1543 = vperm.xlu1 %2791, %v4122_v17   ;;  %v1353_v18 = vmul.f32 %v1350_v7, %v4114_v0 }
 0x3c6   : > { %2814 = vset.pattern.permute.xlu2 %v5039_v11 }
 0x3c7   : > { %2851 = vset.pattern.permute.xlu0 %v4951_v32  ;;  %1679 = vperm.xlu2 %2814, %v3990_v55   ;;  %v4217_v43 = vpop.permute.xlu2 %1529 }
 0x3c8   : > { %1941 = vperm.xlu0 %2851, %v4122_v17  }
 0x3ca   : > { %v4219_v22 = vpop.permute.xlu0 %1593 }
 0x3cb   : > { %v1360_v45 = vpop.permute.xlu1 %1359  ;;  %2793 = vset.pattern.permute.xlu1 %v5040_v52 }
 0x3cc   : > { %v1363_v47 = vmul.f32 %v1360_v45, %v3806_v44  ;;  %1553 = vperm.xlu1 %2793, %v4122_v17   ;;  %v4954_v45 = vmov 71  }
 0x3ce   : > { %v1365_v54 = vadd.f32 %v1363_v47, %v1353_v18 }
 0x3cf   : > { %1698 = vrot.lane.b32.xlu2 %v4013_v41, %s2903_s26 }
 0x3d0   : > { %v1377_v39 = vadd.f32 %v1375_v57, %v1365_v54  ;;  %2856 = vset.pattern.permute.xlu0 %v4952_v29  ;;  %v1548_v7 = vpop.permute.xlu2 %1547  ;;  %2816 = vset.pattern.permute.xlu2 %v4954_v45  ;;  %v5041_v57 = vmov 85   ;;  %v1196_v54 = vmul.f32 %v3939_v62, %v4167_v56  ;;  %v5042_v45 = vmov 98  }
 0x3d1   : > { %1967 = vperm.xlu0 %2856, %v4098_v24   ;;  %v1551_v14 = vmul.f32 %v1548_v7, %v4232_v16 }
 0x3d2   : > { %v4238_v52 = vadd.f32 %v1377_v39, %v3922_v36  ;;  %v1206_v39 = vmul.f32 %v3834_v59, %v3608_v10 }
 0x3d3   : > { %v4240_v18 = vpop.permute.xlu0 %1625 }
 0x3d4   : > { %v1382_v47 = vpop.permute.xlu1 %1381  ;;  %2796 = vset.pattern.permute.xlu1 %v5041_v57 }
 0x3d5   : > { %1569 = vperm.xlu1 %2796, %v4098_v24   ;;  %v1388_v62 = vmul.f32 %v1382_v47, %v4095_v21 }
 0x3d7   : > { %1711 = vperm.xlu2 %2816, %v4098_v24  }
 0x3d9   : > { %2861 = vset.pattern.permute.xlu0 %v4955_v15  ;;  %v1558_v32 = vpop.permute.xlu2 %1557  ;;  %v1208_v15 = vadd.f32 %v1206_v39, %v1196_v54  ;;  %v5043_v39 = vmov 100  }
 0x3da   : > { %1999 = vperm.xlu0 %2861, %v4122_v17   ;;  %v1561_v36 = vmul.f32 %v1558_v32, %v3884_v27  ;;  %v1218_v32 = vmul.f32 %v3841_v37, %v4191_v19 }
 0x3dc   : > { %v1658_v7 = vpop.permute.xlu0 %1657  ;;  %v4252_v57 = vadd.f32 %v1561_v36, %v1551_v14  ;;  %v1220_v14 = vadd.f32 %v1218_v32, %v1208_v15  ;;  %v5044_v15 = vmov 86  }
 0x3dd   : > { %v4255_v29 = vmul.f32 %v1658_v7, %v4232_v16  ;;  %v1392_v49 = vpop.permute.xlu1 %1391  ;;  %2798 = vset.pattern.permute.xlu1 %v5042_v45  ;;  %v4958_v45 = vmov 120  }
 0x3de   : > { %v1398_v2 = vmul.f32 %v1392_v49, %v3826_v1  ;;  %1583 = vperm.xlu1 %2798, %v4098_v24  }
 0x3df   : > { %2819 = vset.pattern.permute.xlu2 %v4959_v4 }
 0x3e0   : > { %v1400_v59 = vadd.f32 %v1398_v2, %v1388_v62  ;;  %1729 = vperm.xlu2 %2819, %v4122_v17  }
 0x3e2   : > { %v1412_v36 = vadd.f32 %v4060_v8, %v1400_v59  ;;  %2866 = vset.pattern.permute.xlu0 %v4958_v45  ;;  %v1580_v47 = vpop.permute.xlu2 %1579  ;;  %v5045_v8 = vmov 7   ;;  %v1231_v59 = vmul.f32 %v3848_v33, %v3903_v12  ;;  %v1435_v45 = vmul.f32 %v4077_v51, %v3806_v44 }
 0x3e3   : > { %2027 = vperm.xlu0 %2866, %v4098_v24   ;;  %v1586_v49 = vmul.f32 %v1580_v47, %v4160_v26  ;;  %v5046_v47 = vmov 113   ;;  %v5047_v51 = vmov 9  }
 0x3e4   : > { %v4269_v54 = vpop.permute.xlu0 %1690  ;;  %v4271_v37 = vadd.f32 %v1412_v36, %v1220_v14 }
 0x3e6   : > { %v4273_v2 = vpop.permute.xlu1 %1407  ;;  %2801 = vset.pattern.permute.xlu1 %v5043_v39  ;;  %v1241_v39 = vmul.f32 %v3854_v25, %v3755_v50  ;;  %v1240_v25 = vmul.f32 %v4036_v6, %v3608_v10 }
 0x3e7   : > { %1601 = vperm.xlu1 %2801, %v4122_v17  }
 0x3e8   : > { %2821 = vset.pattern.permute.xlu2 %v5044_v15  ;;  %v1253_v15 = vmul.f32 %v4047_v58, %v3906_v31 }
 0x3e9   : > { %1743 = vperm.xlu2 %2821, %v4122_v17  }
 0x3eb   : > { %2871 = vset.pattern.permute.xlu0 %v5045_v8  ;;  %v1590_v7 = vpop.permute.xlu2 %1589  ;;  %v4963_v8 = vmov 88  }
 0x3ec   : > { %2059 = vperm.xlu0 %2871, %v4170_v5   ;;  %v4281_v62 = vpop.permute.xlu0 %1700  ;;  %v1596_v32 = vmul.f32 %v1590_v7, %v3957_v20  ;;  %v1243_v7 = vadd.f32 %v1241_v39, %v1231_v59  ;;  %v1434_v39 = vmul.f32 %v4057_v40, %v3826_v1 }
 0x3ee   : > { %v4286_v14 = vadd.f32 %v1596_v32, %v1586_v49  ;;  %v1447_v49 = vmul.f32 %v4075_v9, %v4145_v61  ;;  %v4960_v32 = vmov 87   ;;  %v1255_v31 = vadd.f32 %v1253_v15, %v1243_v7 }
 0x3ef   : > { %v1422_v36 = vpop.permute.xlu1 %1421  ;;  %2803 = vset.pattern.permute.xlu1 %v5046_v47  ;;  %v1424_v9 = vmul.f32 %v4042_v48, %v4095_v21  ;;  %v5048_v7 = vmov 114  }
 0x3f0   : > { %v1425_v4 = vmul.f32 %v1422_v36, %v4114_v0  ;;  %1615 = vperm.xlu1 %2803, %v4122_v17   ;;  %v1230_v36 = vmul.f32 %v4024_v53, %v4167_v56  ;;  %v5049_v53 = vld [vmem:[#allocation13_spill] sm:$0xff] }
 0x3f1   : > { %2824 = vset.pattern.permute.xlu2 %v4960_v32 }
 0x3f2   : > { %v1437_v33 = vadd.f32 %v1435_v45, %v1425_v4  ;;  %1757 = vperm.xlu2 %2824, %v4098_v24   ;;  %v1242_v47 = vadd.f32 %v1240_v25, %v1230_v36 }
 0x3f4   : > { %v1449_v58 = vadd.f32 %v1447_v49, %v1437_v33  ;;  %2876 = vset.pattern.permute.xlu0 %v5047_v51  ;;  %v4306_v59 = vpop.permute.xlu0 %1717  ;;  %v1606_v4 = vpop.permute.xlu2 %1605  ;;  %v1252_v33 = vmul.f32 %v5049_v53, %v4191_v19  ;;  %v1436_v49 = vadd.f32 %v1434_v39, %v1424_v9  ;;  %v5051_v9 = vmov 115  }
 0x3f5   : > { %2089 = vperm.xlu0 %2876, %v3990_v55   ;;  %v4312_v45 = vmul.f32 %v1606_v4, %v4186_v28  ;;  %v4343_v53 = vsel %vm240_vm0, 0.0, %v4269_v54 }
 0x3f6   : > { %v4314_v6 = vadd.f32 %v1449_v58, %v1255_v31  ;;  %v1254_v32 = vadd.f32 %v1252_v33, %v1242_v47  ;;  %v5050_v31 = vmov 12   ;;  %v5052_v47 = vld [vmem:[#allocation23_spill] sm:$0xff] }
 0x3f7   : > { %v1470_v39 = vmul.f32 %v5052_v47, %v3826_v1  ;;  %v4361_v47 = vsel %vm249_vm1, %v4281_v62, 0.0  ;;  %v5057_v62 = vld [vmem:[#allocation7_spill] sm:$0xff] }
 0x3f8   : > { %v1440_v15 = vpop.permute.xlu1 %1439  ;;  %2806 = vset.pattern.permute.xlu1 %v5048_v7  ;;  %v4961_v7 = vmov 102  }
 0x3f9   : > { %v1446_v48 = vmul.f32 %v1440_v15, %v4055_v23  ;;  %1629 = vperm.xlu1 %2806, %v4098_v24  }
 0x3fa   : > { %2826 = vset.pattern.permute.xlu2 %v4963_v8  ;;  %v5061_v8 = vmov 3  }
 0x3fb   : > { %v1448_v4 = vadd.f32 %v1446_v48, %v1436_v49  ;;  %1769 = vperm.xlu2 %2826, %v4098_v24   ;;  %v5053_v48 = vmov 14  }
 0x3fd   : > { %v4325_v25 = vadd.f32 %v1448_v4, %v1254_v32  ;;  %v4327_v40 = vpop.permute.xlu0 %1747  ;;  %2881 = vset.pattern.permute.xlu0 %v5050_v31  ;;  %v1620_v58 = vpop.permute.xlu2 %1619 }
 0x3fe   : > { %2121 = vperm.xlu0 %2881, %v4170_v5   ;;  %v4332_v23 = vmul.f32 %v1620_v58, %v4232_v16  ;;  %v5054_v58 = vld [vmem:[#allocation22_spill] sm:$0xff] }
 0x401   : > { %v1454_v36 = vpop.permute.xlu1 %1453  ;;  %2808 = vset.pattern.permute.xlu1 %v5051_v9 }
 0x402   : > { %v1460_v15 = vmul.f32 %v1454_v36, %v4095_v21  ;;  %1641 = vperm.xlu1 %2808, %v4098_v24   ;;  %v1461_v36 = vmul.f32 %v5054_v58, %v4114_v0 }
 0x403   : > { %2829 = vset.pattern.permute.xlu2 %v4961_v7 }
 0x404   : > { %v1472_v32 = vadd.f32 %v1470_v39, %v1460_v15  ;;  %1789 = vperm.xlu2 %2829, %v4122_v17  }
 0x406   : > { %v4346_v33 = vadd.f32 %v4142_v38, %v1472_v32  ;;  %v1780_v49 = vpop.permute.xlu0 %1779  ;;  %2886 = vset.pattern.permute.xlu0 %v5053_v48  ;;  %v1638_v21 = vpop.permute.xlu2 %1637  ;;  %v5055_v38 = vmov 103   ;;  %v5072_v48 = vmov 87  }
 0x407   : > { %v4350_v1 = vmul.f32 %v1780_v49, %v4343_v53 }
 0x40a   : > { %v1468_v4 = vpop.permute.xlu1 %1467  ;;  %2811 = vset.pattern.permute.xlu1 %v5037_v60 }
 0x40b   : > { %v1471_v9 = vmul.f32 %v1468_v4, %v3806_v44  ;;  %1663 = vperm.xlu1 %2811, %v4170_v5  }
 0x40c   : > { %2831 = vset.pattern.permute.xlu2 %v5055_v38 }
 0x40d   : > { %v1473_v54 = vadd.f32 %v1471_v9, %v1461_v36  ;;  %1801 = vperm.xlu2 %2831, %v4122_v17   ;;  %v4962_v36 = vmov 116  }
 0x40f   : > { %v1806_v39 = vpop.permute.xlu0 %1805  ;;  %v1653_v60 = vpop.permute.xlu2 %1652 }
 0x410   : > { %v4364_v15 = vmul.f32 %v1806_v39, %v4361_v47  ;;  %v4367_v32 = vmul.f32 %v1653_v60, %v4160_v26 }
 0x412   : > { %5056 = vst [vmem:[#allocation18_spill] sm:$0xff] %v4364_v15 }
 0x413   : > { %v1480_v49 = vpop.permute.xlu1 %1479  ;;  %2813 = vset.pattern.permute.xlu1 %v5039_v11 }
 0x414   : > { %v1483_v4 = vmul.f32 %v1480_v49, %v4145_v61  ;;  %1675 = vperm.xlu1 %2813, %v4170_v5   ;;  %v5058_v49 = vld [vmem:[#allocation11_spill] sm:$0xff] }
 0x415   : > { %2834 = vset.pattern.permute.xlu2 %v4962_v36 }
 0x416   : > { %v1485_v58 = vadd.f32 %v1483_v4, %v1473_v54  ;;  %1819 = vperm.xlu2 %2834, %v4098_v24   ;;  %v5059_v4 = vmov 71  }
 0x418   : > { %v1487_v9 = vadd.f32 %v1485_v58, %v5057_v62  ;;  %v1668_v38 = vpop.permute.xlu2 %1667  ;;  %v4964_v58 = vmov 117  }
 0x419   : > { %v1671_v39 = vmul.f32 %v1668_v38, %v3884_v27 }
 0x41b   : > { %v1499_v60 = vpop.permute.xlu1 %1498  ;;  %v1673_v7 = vadd.f32 %v1671_v39, %v4255_v29 }
 0x41c   : > { %v4378_v11 = vsel %vm249_vm1, %v1499_v60, 0.0  ;;  %1692 = vrot.lane.b32.xlu1 %v5058_v49, %s2904_s27 }
 0x41d   : > { %v1536_v54 = vmul.f32 %v4217_v43, %v4378_v11  ;;  %2815 = vset.pattern.permute.xlu1 %v5059_v4  ;;  %v4386_v36 = vmul.f32 %v1638_v21, %v4378_v11 }
 0x41e   : > { %2836 = vset.pattern.permute.xlu2 %v4964_v58  ;;  %v5062_v58 = vmov 72  }
 0x41f   : > { %v1538_v62 = vadd.f32 %v1536_v54, %v4209_v13  ;;  %1829 = vperm.xlu2 %2836, %v4098_v24   ;;  %v1838_v54 = vpop.permute.xlu0 %1837 }
 0x421   : > { %v4392_v29 = vadd.f32 %v1538_v62, %v4201_v30  ;;  %v1680_v38 = vpop.permute.xlu2 %1679 }
 0x422   : > { %v1683_v39 = vmul.f32 %v1680_v38, %v4186_v28 }
 0x423   : > { %v1512_v60 = vpop.permute.xlu1 %1511 }
 0x424   : > { %v1515_v43 = vmul.f32 %v1512_v60, %v4232_v16  ;;  %1707 = vperm.xlu1 %2815, %v4122_v17   ;;  %v1685_v21 = vadd.f32 %v1683_v39, %v1673_v7 }
 0x426   : > { %v4397_v4 = vadd.f32 %v1685_v21, %v1487_v9 }
 0x427   : > { %2839 = vset.pattern.permute.xlu2 %v5061_v8 }
 0x428   : > { %5060 = vst [vmem:[#allocation12_spill] sm:$0xff] %v4397_v4  ;;  %1851 = vperm.xlu2 %2839, %v4170_v5  }
 0x429   : > { %v1699_v13 = vpop.permute.xlu2 %1698 }
 0x42a   : > { %v4402_v30 = vsel %vm249_vm1, %v1699_v13, 0.0  ;;  %v5065_v13 = vmov 73  }
 0x42b   : > { %v4406_v38 = vmul.f32 %v1838_v54, %v4402_v30 }
 0x42c   : > { %v1522_v62 = vpop.permute.xlu1 %1521  ;;  %2818 = vset.pattern.permute.xlu1 %v5062_v58 }
 0x42d   : > { %5063 = vst [vmem:[#allocation17_spill] sm:$0xff] %v4406_v38  ;;  %v1525_v60 = vmul.f32 %v1522_v62, %v3884_v27  ;;  %1721 = vperm.xlu1 %2818, %v4098_v24   ;;  %v5066_v62 = vmov 5  }
 0x42f   : > { %v1527_v7 = vadd.f32 %v1525_v60, %v1515_v43 }
 0x430   : > { %2841 = vset.pattern.permute.xlu2 %v5035_v63 }
 0x431   : > { %v1539_v9 = vadd.f32 %v4194_v35, %v1527_v7  ;;  %1861 = vperm.xlu2 %2841, %v4170_v5   ;;  %v4413_v39 = vpop.permute.xlu2 %1711  ;;  %v5067_v35 = vld [vmem:[#allocation8_spill] sm:$0xff] }
 0x432   : > { %v1172_v43 = vmul.f32 %v5067_v35, %v3608_v10  ;;  %v5069_v7 = vld [vmem:[#allocation20_spill] sm:$0xff] }
 0x433   : > { %v4416_v21 = vadd.f32 %v1539_v9, %v4156_v3  ;;  %v5068_v3 = vld [vmem:[#allocation19_spill] sm:$0xff] }
 0x434   : > { %v1099_v9 = vadd.f32 %v5069_v7, %v5068_v3  ;;  %v1572_v3 = vmul.f32 %v4207_v46, %v4378_v11 }
 0x435   : > { %5064 = vst [vmem:[#allocation6_spill] sm:$0xff] %v4416_v21  ;;  %v1544_v58 = vpop.permute.xlu1 %1543  ;;  %2820 = vset.pattern.permute.xlu1 %v5065_v13  ;;  %v5070_v13 = vld [vmem:[#allocation4_spill] sm:$0xff] }
 0x436   : > { %v1550_v54 = vmul.f32 %v1544_v58, %v4160_v26  ;;  %1733 = vperm.xlu1 %2820, %v4098_v24   ;;  %v1162_v31 = vmul.f32 %v5070_v13, %v4167_v56  ;;  %v5071_v58 = vld [vmem:[#allocation14_spill] sm:$0xff]  ;;  %v4437_v51 = vmax.f32 %v1099_v9, 0.0  ;;  %v5076_v9 = vld [vmem:[#allocation15_spill] sm:$0xff] }
 0x437   : > { %v1184_v4 = vmul.f32 %v5071_v58, %v4191_v19 }
 0x438   : > { %v1174_v15 = vadd.f32 %v1172_v43, %v1162_v31 }
 0x439   : > { %2844 = vset.pattern.permute.xlu2 %v5066_v62 }
 0x43a   : > { %1877 = vperm.xlu2 %2844, %v3990_v55   ;;  %v1730_v63 = vpop.permute.xlu2 %1729 }
 0x43b   : > { %v4426_v60 = vmul.f32 %v1730_v63, %v4402_v30  ;;  %v1186_v63 = vadd.f32 %v1184_v4, %v1174_v15  ;;  %v5074_v15 = vmov 88  }
 0x43d   : > { %v1378_v13 = vadd.f32 %v4125_v42, %v1186_v63  ;;  %v5077_v63 = vld [vmem:[#allocation9_spill] sm:$0xff] }
 0x43e   : > { %v1554_v38 = vpop.permute.xlu1 %1553  ;;  %2823 = vset.pattern.permute.xlu1 %v5072_v48  ;;  %v5073_v48 = vmov 74  }
 0x43f   : > { %v1560_v35 = vmul.f32 %v1554_v38, %v3957_v20  ;;  %1753 = vperm.xlu1 %2823, %v4122_v17  }
 0x441   : > { %v1562_v7 = vadd.f32 %v1560_v35, %v1550_v54  ;;  %v5075_v54 = vld [vmem:[#allocation5_spill] sm:$0xff]  ;;  %v1399_v35 = vmul.f32 %v5076_v9, %v3806_v44  ;;  %v5079_v44 = vmov 101  }
 0x442   : > { %1890 = vrot.lane.b32.xlu2 %v4437_v51, %s2904_s27  ;;  %v1207_v42 = vmul.f32 %v5075_v54, %v3755_v50  ;;  %v3024_v54 = vmov 75  }
 0x443   : > { %v1574_v21 = vadd.f32 %v1572_v3, %v1562_v7  ;;  %v1744_v58 = vpop.permute.xlu2 %1743  ;;  %2845 = vset.pattern.permute.xlu2 %v5073_v48  ;;  %v1197_v3 = vmul.f32 %v5077_v63, %v3903_v12  ;;  %v5078_v7 = vld [vmem:[#allocation16_spill] sm:$0xff]  ;;  %v5080_v12 = vld [vmem:[#allocation3_spill] sm:$0xff] }
 0x444   : > { %v4446_v31 = vmul.f32 %v1744_v58, %v4343_v53 }
 0x445   : > { %v4448_v38 = vadd.f32 %v1574_v21, %v1378_v13  ;;  %v1389_v13 = vmul.f32 %v5078_v7, %v4114_v0  ;;  %v1209_v50 = vadd.f32 %v1207_v42, %v1197_v3  ;;  %v3025_v7 = vmov 76  }
 0x447   : > { %v1570_v43 = vpop.permute.xlu1 %1569  ;;  %2825 = vset.pattern.permute.xlu1 %v5074_v15  ;;  %v1401_v48 = vadd.f32 %v1399_v35, %v1389_v13  ;;  %v1221_v0 = vadd.f32 %v5080_v12, %v1209_v50  ;;  %v5081_v35 = vmov 102  }
 0x448   : > { %v1573_v46 = vmul.f32 %v1570_v43, %v4186_v28  ;;  %1765 = vperm.xlu1 %2825, %v4122_v17  }
 0x44a   : > { %v1575_v4 = vadd.f32 %v1573_v46, %v4252_v57  ;;  %1905 = vperm.xlu2 %2845, %v4122_v17   ;;  %v1411_v57 = vmul.f32 %v4273_v2, %v4145_v61 }
 0x44c   : > { %v4460_v21 = vadd.f32 %v1575_v4, %v4238_v52  ;;  %v4468_v58 = vpop.permute.xlu2 %1757  ;;  %v1597_v52 = vmul.f32 %v4219_v22, %v3884_v27  ;;  %v1413_v15 = vadd.f32 %v1411_v57, %v1401_v48 }
 0x44e   : > { %v1415_v61 = vadd.f32 %v1413_v15, %v1221_v0  ;;  %v3026_v15 = vmov 90  }
 0x450   : > { %v1584_v43 = vpop.permute.xlu1 %1583  ;;  %2828 = vset.pattern.permute.xlu1 %v5079_v44  ;;  %v1632_v44 = vmul.f32 %v4240_v18, %v3957_v20 }
 0x451   : > { %v1587_v46 = vmul.f32 %v1584_v43, %v4232_v16  ;;  %1783 = vperm.xlu1 %2828, %v4098_v24   ;;  %v5082_v43 = vmov 116  }
 0x452   : > { %2848 = vset.pattern.permute.xlu2 %v3024_v54 }
 0x453   : > { %v1599_v4 = vadd.f32 %v1597_v52, %v1587_v46  ;;  %1919 = vperm.xlu2 %2848, %v4098_v24  }
 0x455   : > { %v1611_v2 = vadd.f32 %v4312_v45, %v1599_v4  ;;  %v1770_v42 = vpop.permute.xlu2 %1769  ;;  %v5083_v4 = vmov 117  }
 0x456   : > { %v4480_v9 = vmul.f32 %v1770_v42, %v4361_v47  ;;  %v5084_v42 = vmov 91  }
 0x457   : > { %v4482_v22 = vadd.f32 %v1611_v2, %v1415_v61 }
 0x459   : > { %v1602_v16 = vpop.permute.xlu1 %1601  ;;  %2830 = vset.pattern.permute.xlu1 %v5081_v35 }
 0x45a   : > { %v1608_v63 = vmul.f32 %v1602_v16, %v4378_v11  ;;  %1793 = vperm.xlu1 %2830, %v4098_v24  }
 0x45b   : > { %2850 = vset.pattern.permute.xlu2 %v3025_v7 }
 0x45c   : > { %v1610_v3 = vadd.f32 %v1608_v63, %v4286_v14  ;;  %1931 = vperm.xlu2 %2850, %v4098_v24  }
 0x45e   : > { %v1612_v45 = vadd.f32 %v1610_v3, %v4271_v37  ;;  %v1790_v13 = vpop.permute.xlu2 %1789 }
 0x45f   : > { %v1796_v57 = vmul.f32 %v1790_v13, %v4013_v41 }
 0x461   : > { %v1798_v50 = vadd.f32 %v1796_v57, %v4350_v1  ;;  %v3028_v57 = vmov 105  }
 0x462   : > { %v1616_v48 = vpop.permute.xlu1 %1615  ;;  %2833 = vset.pattern.permute.xlu1 %v5082_v43 }
 0x463   : > { %v1622_v14 = vmul.f32 %v1616_v48, %v4160_v26  ;;  %1815 = vperm.xlu1 %2833, %v4122_v17  }
 0x464   : > { %2853 = vset.pattern.permute.xlu2 %v3026_v15 }
 0x465   : > { %v1634_v52 = vadd.f32 %v1632_v44, %v1622_v14  ;;  %1951 = vperm.xlu2 %2853, %v4122_v17   ;;  %v5088_v44 = vld [vmem:[#allocation21_spill] sm:$0xff] }
 0x467   : > { %v1646_v37 = vadd.f32 %v4386_v36, %v1634_v52  ;;  %v1802_v46 = vpop.permute.xlu2 %1801 }
 0x468   : > { %v1808_v1 = vmul.f32 %v1802_v46, %v4402_v30 }
 0x469   : > { %v4503_v12 = vadd.f32 %v1646_v37, %v4325_v25  ;;  %v5085_v25 = vmov 118  }
 0x46a   : > { %v1810_v0 = vadd.f32 %v1808_v1, %v1798_v50  ;;  %v5086_v50 = vld [vmem:[#allocation2_spill] sm:$0xff]  ;;  %v3029_v1 = vmov 119  }
 0x46b   : > { %v1630_v18 = vpop.permute.xlu1 %1629  ;;  %2835 = vset.pattern.permute.xlu1 %v5083_v4  ;;  %v1274_v48 = vmul.f32 %v5086_v50, %v3608_v10 }
 0x46c   : > { %v1633_v26 = vmul.f32 %v1630_v18, %v3884_v27  ;;  %1825 = vperm.xlu1 %2835, %v4122_v17   ;;  %v4508_v61 = vadd.f32 %v1810_v0, %v1612_v45  ;;  %v3027_v27 = vmov 104  }
 0x46d   : > { %2855 = vset.pattern.permute.xlu2 %v5084_v42  ;;  %v5089_v42 = vmov 120  }
 0x46e   : > { %v1635_v2 = vadd.f32 %v1633_v26, %v4332_v23  ;;  %1963 = vperm.xlu2 %2855, %v4122_v17  }
 0x470   : > { %v1820_v36 = vpop.permute.xlu2 %1819 }
 0x474   : > { %v1642_v16 = vpop.permute.xlu1 %1641  ;;  %2838 = vset.pattern.permute.xlu1 %v5085_v25 }
 0x475   : > { %v1645_v35 = vmul.f32 %v1642_v16, %v4186_v28  ;;  %1841 = vperm.xlu1 %2838, %v4098_v24  }
 0x476   : > { %2858 = vset.pattern.permute.xlu2 %v3027_v27 }
 0x477   : > { %v1647_v63 = vadd.f32 %v1645_v35, %v1635_v2  ;;  %1981 = vperm.xlu2 %2858, %v4098_v24  }
 0x479   : > { %v4519_v23 = vadd.f32 %v1647_v63, %v4314_v6  ;;  %v1830_v3 = vpop.permute.xlu2 %1829  ;;  %v5087_v6 = vld [vmem:[#allocation10_spill] sm:$0xff] }
 0x47a   : > { %v1264_v43 = vmul.f32 %v5087_v6, %v4167_v56  ;;  %v1833_v4 = vmul.f32 %v1830_v3, %v5058_v49 }
 0x47d   : > { %v1664_v45 = vpop.permute.xlu1 %1663  ;;  %2840 = vset.pattern.permute.xlu1 %v5061_v8  ;;  %v1286_v8 = vmul.f32 %v5088_v44, %v4191_v19  ;;  %v4587_v44 = vld [vmem:[%s3074_s22 + $0x18] sm:$0xff] }
 0x47e   : > { %v1670_v13 = vmul.f32 %v1664_v45, %v3957_v20  ;;  %1855 = vperm.xlu1 %2840, %v3990_v55   ;;  %v1276_v55 = vadd.f32 %v1274_v48, %v1264_v43  ;;  %v5090_v43 = vmov 6   ;;  %vm2286_vm2 = vcmp.gt.f32.partialorder %v4587_v44, 0.5 }
 0x47f   : > { %2860 = vset.pattern.permute.xlu2 %v3028_v57 }
 0x480   : > { %v1672_v28 = vadd.f32 %v1670_v13, %v4367_v32  ;;  %1991 = vperm.xlu2 %2860, %v4098_v24   ;;  %v1288_v32 = vadd.f32 %v1286_v8, %v1276_v55  ;;  %v3030_v13 = vmov 121  }
 0x482   : > { %v1852_v14 = vpop.permute.xlu2 %1851  ;;  %v1486_v10 = vadd.f32 %v4346_v33, %v1288_v32  ;;  %v1761_v33 = vmul.f32 %v4468_v58, %v5058_v49  ;;  %v5092_v32 = vld [vmem:[#allocation6_spill] sm:$0xff] }
 0x483   : > { %v1858_v20 = vmul.f32 %v1852_v14, %v4343_v53 }
 0x486   : > { %v1676_v52 = vpop.permute.xlu1 %1675  ;;  %2843 = vset.pattern.permute.xlu1 %v5066_v62 }
 0x487   : > { %v1682_v37 = vmul.f32 %v1676_v52, %v4378_v11  ;;  %1873 = vperm.xlu1 %2843, %v4170_v5   ;;  %v5091_v52 = vmov 8  }
 0x488   : > { %2863 = vset.pattern.permute.xlu2 %v3029_v1 }
 0x489   : > { %v1684_v46 = vadd.f32 %v1682_v37, %v1672_v28  ;;  %2013 = vperm.xlu2 %2863, %v4122_v17   ;;  %v4575_v28 = vpop.permute.xlu0 %1865 }
 0x48b   : > { %v4540_v56 = vadd.f32 %v1684_v46, %v1486_v10  ;;  %v1862_v19 = vpop.permute.xlu2 %1861 }
 0x48c   : > { %v1868_v0 = vmul.f32 %v1862_v19, %v4013_v41 }
 0x48e   : > { %v1693_v18 = vpop.permute.xlu1 %1692  ;;  %v4543_v62 = vadd.f32 %v1868_v0, %v1858_v20  ;;  %v5093_v0 = vmov 89  }
 0x48f   : > { %v4546_v11 = vsel %vm240_vm0, 0.0, %v1693_v18  ;;  %1888 = vrot.lane.b32.xlu1 %v4176_v34, %s2904_s27 }
 0x490   : > { %v1751_v26 = vmul.f32 %v4327_v40, %v4546_v11  ;;  %2847 = vset.pattern.permute.xlu1 %v3024_v54  ;;  %v1823_v2 = vmul.f32 %v1820_v36, %v4546_v11  ;;  %v1724_v54 = vmul.f32 %v4306_v59, %v4013_v41  ;;  %v1715_v48 = vmul.f32 %v4413_v39, %v4546_v11 }
 0x491   : > { %2865 = vset.pattern.permute.xlu2 %v5089_v42  ;;  %v4592_v14 = vpop.permute.xlu0 %1896 }
 0x492   : > { %v4558_v16 = vadd.f32 %v1833_v4, %v1823_v2  ;;  %v1763_v25 = vadd.f32 %v1761_v33, %v1751_v26  ;;  %2023 = vperm.xlu2 %2865, %v4122_v17   ;;  %v5094_v2 = vmov 9  }
 0x494   : > { %v1775_v35 = vadd.f32 %v4480_v9, %v1763_v25  ;;  %v1878_v63 = vpop.permute.xlu2 %1877 }
 0x495   : > { %v4563_v58 = vmul.f32 %v1878_v63, %v4361_v47 }
 0x496   : > { %v1708_v3 = vpop.permute.xlu1 %1707  ;;  %v4566_v40 = vadd.f32 %v1775_v35, %v4460_v21 }
 0x497   : > { %v1714_v36 = vmul.f32 %v1708_v3, %v4343_v53  ;;  %1898 = vrot.lane.b32.xlu1 %v4437_v51, %s2903_s26  ;;  %v5095_v3 = vmov 10  }
 0x499   : > { %v1726_v45 = vadd.f32 %v1724_v54, %v1714_v36  ;;  %v1910_v10 = vpop.permute.xlu0 %1909 }
 0x49a   : > { %2868 = vset.pattern.permute.xlu2 %v3030_v13 }
 0x49b   : > { %v1738_v9 = vadd.f32 %v4426_v60, %v1726_v45  ;;  %2039 = vperm.xlu2 %2868, %v4098_v24   ;;  %v5096_v45 = vmov 11  }
 0x49c   : > { %v1891_v21 = vpop.permute.xlu2 %1890 }
 0x49d   : > { %v4579_v50 = vadd.f32 %v1738_v9, %v4392_v29  ;;  %v4598_v55 = vsel %vm240_vm0, 0.0, %v1891_v21 }
 0x49f   : > { %v1722_v59 = vpop.permute.xlu1 %1721  ;;  %1915 = vperm.xlu1 %2847, %v4122_v17  }
 0x4a0   : > { %v1725_v6 = vmul.f32 %v1722_v59, %v5058_v49 }
 0x4a2   : > { %v1727_v60 = vadd.f32 %v1725_v6, %v1715_v48  ;;  %v5097_v48 = vld [vmem:[#allocation18_spill] sm:$0xff]  ;;  %v5098_v6 = vmov 13  }
 0x4a3   : > { %2870 = vset.pattern.permute.xlu2 %v5090_v43 }
 0x4a4   : > { %2053 = vperm.xlu2 %2870, %v4587_v44   ;;  %v4590_v8 = vpop.permute.xlu2 %1905 }
 0x4a7   : > { %2849 = vset.pattern.permute.xlu1 %v3025_v7  ;;  %v1913_v7 = vmul.f32 %v1910_v10, %v4598_v55  ;;  %v5100_v10 = vmov 14  }
 0x4a8   : > { %v1734_v29 = vpop.permute.xlu1 %1733  ;;  %1927 = vperm.xlu1 %2849, %v4122_v17  }
 0x4a9   : > { %v1737_v39 = vmul.f32 %v1734_v29, %v4361_v47 }
 0x4ab   : > { %v1739_v20 = vadd.f32 %v1737_v39, %v1727_v60 }
 0x4ac   : > { %2873 = vset.pattern.permute.xlu2 %v5091_v52 }
 0x4ad   : > { %v4602_v37 = vadd.f32 %v1739_v20, %v5092_v32  ;;  %2071 = vperm.xlu2 %2873, %v4170_v5   ;;  %v1920_v46 = vpop.permute.xlu2 %1919 }
 0x4ae   : > { %v1923_v19 = vmul.f32 %v1920_v46, %v4437_v51 }
 0x4b0   : > { %2852 = vset.pattern.permute.xlu1 %v5093_v0  ;;  %v4608_v18 = vadd.f32 %v1923_v19, %v1913_v7  ;;  %v5101_v0 = vld [vmem:[#allocation17_spill] sm:$0xff] }
 0x4b1   : > { %v1754_v33 = vpop.permute.xlu1 %1753  ;;  %1945 = vperm.xlu1 %2852, %v4098_v24  }
 0x4b2   : > { %v1760_v4 = vmul.f32 %v1754_v33, %v4013_v41 }
 0x4b4   : > { %v1762_v26 = vadd.f32 %v1760_v4, %v4446_v31 }
 0x4b5   : > { %2875 = vset.pattern.permute.xlu2 %v5094_v2 }
 0x4b6   : > { %v4614_v42 = vpop.permute.xlu2 %1931  ;;  %2085 = vperm.xlu2 %2875, %v4170_v5  }
 0x4b9   : > { %2854 = vset.pattern.permute.xlu1 %v3026_v15 }
 0x4ba   : > { %v1766_v25 = vpop.permute.xlu1 %1765  ;;  %1955 = vperm.xlu1 %2854, %v4098_v24  }
 0x4bb   : > { %v1772_v35 = vmul.f32 %v1766_v25, %v4402_v30 }
 0x4bd   : > { %v1774_v63 = vadd.f32 %v1772_v35, %v1762_v26 }
 0x4be   : > { %2878 = vset.pattern.permute.xlu2 %v5095_v3 }
 0x4bf   : > { %v4622_v54 = vadd.f32 %v1774_v63, %v4448_v38  ;;  %v1952_v31 = vpop.permute.xlu2 %1951  ;;  %2101 = vperm.xlu2 %2878, %v4587_v44  }
 0x4c2   : > { %2857 = vset.pattern.permute.xlu1 %v3027_v27 }
 0x4c3   : > { %v1784_v36 = vpop.permute.xlu1 %1783  ;;  %1977 = vperm.xlu1 %2857, %v4122_v17  }
 0x4c4   : > { %v1787_v15 = vmul.f32 %v1784_v36, %v4546_v11  ;;  %v1958_v36 = vmul.f32 %v1952_v31, %v4176_v34 }
 0x4c7   : > { %2880 = vset.pattern.permute.xlu2 %v5096_v45 }
 0x4c8   : > { %v1964_v9 = vpop.permute.xlu2 %1963  ;;  %2113 = vperm.xlu2 %2880, %v4587_v44  }
 0x4cb   : > { %2859 = vset.pattern.permute.xlu1 %v3028_v57  ;;  %v5099_v57 = vmov 106  }
 0x4cc   : > { %v1794_v21 = vpop.permute.xlu1 %1793  ;;  %1987 = vperm.xlu1 %2859, %v4122_v17  }
 0x4cd   : > { %v1797_v38 = vmul.f32 %v1794_v21, %v5058_v49 }
 0x4cf   : > { %v1799_v59 = vadd.f32 %v1797_v38, %v1787_v15  ;;  %v4689_v15 = vsel %vm249_vm1, %v4592_v14, 0.0 }
 0x4d0   : > { %2883 = vset.pattern.permute.xlu2 %v5098_v6 }
 0x4d1   : > { %v1811_v27 = vadd.f32 %v5097_v48, %v1799_v59  ;;  %v1982_v60 = vpop.permute.xlu2 %1981  ;;  %2133 = vperm.xlu2 %2883, %v4170_v5  }
 0x4d2   : > { %v4637_v29 = vmul.f32 %v1982_v60, %v4598_v55 }
 0x4d3   : > { %v4640_v39 = vadd.f32 %v1811_v27, %v4482_v22 }
 0x4d4   : > { %2862 = vset.pattern.permute.xlu1 %v5099_v57 }
 0x4d5   : > { %v1816_v20 = vpop.permute.xlu1 %1815  ;;  %2003 = vperm.xlu1 %2862, %v4098_v24  }
 0x4d6   : > { %v1822_v32 = vmul.f32 %v1816_v20, %v4343_v53 }
 0x4d9   : > { %2885 = vset.pattern.permute.xlu2 %v5100_v10 }
 0x4da   : > { %v4665_v2 = vpop.permute.xlu2 %1991 }
 0x4dd   : > { %2864 = vset.pattern.permute.xlu1 %v3029_v1 }
 0x4de   : > { %v1826_v46 = vpop.permute.xlu1 %1825  ;;  %2017 = vperm.xlu1 %2864, %v4098_v24   ;;  %v1869_v24 = vmul.f32 %v4575_v28, %v5058_v49  ;;  %v1942_v28 = vpop.permute.xlu0 %1941 }
 0x4df   : > { %v1832_v7 = vmul.f32 %v1826_v46, %v4013_v41  ;;  %v5104_v46 = vmov 12  }
 0x4e1   : > { %v1834_v19 = vadd.f32 %v1832_v7, %v1822_v32 }
 0x4e3   : > { %v1846_v22 = vadd.f32 %v5101_v0, %v1834_v19  ;;  %v4674_v35 = vpop.permute.xlu2 %2013 }
 0x4e5   : > { %v4651_v33 = vadd.f32 %v1846_v22, %v4503_v12 }
 0x4e6   : > { %2867 = vset.pattern.permute.xlu1 %v3030_v13  ;;  %v1968_v48 = vpop.permute.xlu0 %1967 }
 0x4e7   : > { %v1842_v4 = vpop.permute.xlu1 %1841  ;;  %2035 = vperm.xlu1 %2867, %v4122_v17  }
 0x4e8   : > { %v1845_v53 = vmul.f32 %v1842_v4, %v4361_v47  ;;  %v5102_v47 = vld [vmem:[#allocation12_spill] sm:$0xff] }
 0x4ea   : > { %v1847_v1 = vadd.f32 %v1845_v53, %v4558_v16 }
 0x4ec   : > { %v4658_v26 = vadd.f32 %v1847_v1, %v4519_v23  ;;  %v5103_v23 = vmov 7   ;;  %v4692_v21 = vpop.permute.xlu2 %2023 }
 0x4ee   : > { %v2000_v32 = vpop.permute.xlu0 %1999 }
 0x4ef   : > { %2869 = vset.pattern.permute.xlu1 %v5090_v43 }
 0x4f0   : > { %v1856_v41 = vpop.permute.xlu1 %1855  ;;  %2049 = vperm.xlu1 %2869, %v4170_v5  }
 0x4f1   : > { %v1859_v12 = vmul.f32 %v1856_v41, %v4546_v11 }
 0x4f3   : > { %v1871_v13 = vadd.f32 %v1869_v24, %v1859_v12 }
 0x4f5   : > { %v1883_v17 = vadd.f32 %v4563_v58, %v1871_v13 }
 0x4f6   : > { %v2028_v7 = vpop.permute.xlu0 %2027 }
 0x4f7   : > { %v4669_v16 = vadd.f32 %v1883_v17, %v5102_v47 }
 0x4f8   : > { %2872 = vset.pattern.permute.xlu1 %v5103_v23 }
 0x4f9   : > { %v1874_v25 = vpop.permute.xlu1 %1873  ;;  %2063 = vperm.xlu1 %2872, %v4587_v44  }
 0x4fa   : > { %v1880_v43 = vmul.f32 %v1874_v25, %v4402_v30 }
 0x4fc   : > { %v1882_v49 = vadd.f32 %v1880_v43, %v4543_v62 }
 0x4fe   : > { %v4678_v11 = vadd.f32 %v1882_v49, %v4540_v56  ;;  %v1970_v56 = vmul.f32 %v1964_v9, %v4689_v15  ;;  %v2040_v9 = vpop.permute.xlu2 %2039 }
 0x501   : > { %v1889_v63 = vpop.permute.xlu1 %1888  ;;  %2874 = vset.pattern.permute.xlu1 %v5091_v52 }
 0x502   : > { %v4682_v58 = vsel %vm240_vm0, 0.0, %v1889_v63  ;;  %2075 = vperm.xlu1 %2874, %v4587_v44  }
 0x503   : > { %v1948_v30 = vmul.f32 %v1942_v28, %v4682_v58 }
 0x505   : > { %v1960_v62 = vadd.f32 %v1958_v36, %v1948_v30  ;;  %v2006_v36 = vmul.f32 %v2000_v32, %v4689_v15  ;;  %v2031_v32 = vmul.f32 %v2028_v7, %v4437_v51 }
 0x506   : > { %v4711_v10 = vpop.permute.xlu2 %2053 }
 0x507   : > { %v1972_v38 = vadd.f32 %v1970_v56, %v1960_v62  ;;  %v1995_v62 = vmul.f32 %v4665_v2, %v4437_v51 }
 0x509   : > { %v1899_v52 = vpop.permute.xlu1 %1898  ;;  %v4695_v59 = vadd.f32 %v1972_v38, %v4622_v54  ;;  %v1912_v54 = vmul.f32 %v4590_v8, %v4682_v58 }
 0x50a   : > { %v4698_v27 = vsel %vm249_vm1, %v1899_v52, 0.0  ;;  %2877 = vset.pattern.permute.xlu1 %v5095_v3  ;;  %v1997_v52 = vadd.f32 %v1995_v62, %v4637_v29  ;;  %v2020_v29 = vmul.f32 %v4674_v35, %v4682_v58  ;;  %v2417_v62 = vld [vmem:[%s4886_s2 + $0x48] sm:$0xf0] }
 0x50b   : > { %2097 = vperm.xlu1 %2877, %v4170_v5   ;;  %v1935_v14 = vmul.f32 %v4614_v42, %v4698_v27  ;;  %v1971_v41 = vmul.f32 %v1968_v48, %v4698_v27 }
 0x50d   : > { %v1937_v31 = vadd.f32 %v1935_v14, %v4608_v18 }
 0x50e   : > { %v2072_v19 = vpop.permute.xlu2 %2071 }
 0x50f   : > { %v1939_v60 = vadd.f32 %v1937_v31, %v4602_v37 }
 0x511   : > { %v1916_v57 = vpop.permute.xlu1 %1915 }
 0x512   : > { %v1922_v20 = vmul.f32 %v1916_v57, %v4176_v34 }
 0x513   : > { %2879 = vset.pattern.permute.xlu1 %v5096_v45 }
 0x514   : > { %v1924_v3 = vadd.f32 %v1922_v20, %v1912_v54  ;;  %2109 = vperm.xlu1 %2879, %v4170_v5   ;;  %v2060_v5 = vpop.permute.xlu0 %2059 }
 0x515   : > { %v2066_v35 = vmul.f32 %v2060_v5, %v4176_v34  ;;  %v2460_v5 = vld [vmem:[%s4886_s2 + $0x64] sm:$0xf] }
 0x516   : > { %v4722_v22 = vpop.permute.xlu2 %2085 }
 0x51a   : > { %v1928_v42 = vpop.permute.xlu1 %1927 }
 0x51b   : > { %v1934_v18 = vmul.f32 %v1928_v42, %v4689_v15  ;;  %v2043_v42 = vmul.f32 %v2040_v9, %v4698_v27  ;;  %v2439_v9 = vld [vmem:[%s4886_s2 + $0x70] sm:$0xf] }
 0x51c   : > { %2882 = vset.pattern.permute.xlu1 %v5104_v46  ;;  %v2090_v24 = vpop.permute.xlu0 %2089 }
 0x51d   : > { %v1936_v37 = vadd.f32 %v1934_v18, %v1924_v3  ;;  %2125 = vperm.xlu1 %2882, %v4587_v44   ;;  %v2093_v13 = vadd.f32 %v2090_v24, %v1939_v60 }
 0x51e   : > { %v2102_v12 = vpop.permute.xlu2 %2101 }
 0x51f   : > { %v4717_v8 = vadd.f32 %v1936_v37, %v4579_v50  ;;  %v2095_v25 = vmax.f32 %v2093_v13, 0.0 }
 0x523   : > { %v1946_v45 = vpop.permute.xlu1 %1945 }
 0x524   : > { %v1949_v0 = vmul.f32 %v1946_v45, %v4598_v55 }
 0x525   : > { %2884 = vset.pattern.permute.xlu1 %v5098_v6 }
 0x526   : > { %2137 = vperm.xlu1 %2884, %v4587_v44   ;;  %v2114_v31 = vpop.permute.xlu2 %2113 }
 0x52c   : > { %v1956_v4 = vpop.permute.xlu1 %1955 }
 0x52d   : > { %v1959_v53 = vmul.f32 %v1956_v4, %v4437_v51 }
 0x52f   : > { %v1961_v1 = vadd.f32 %v1959_v53, %v1949_v0 }
 0x531   : > { %v1973_v50 = vadd.f32 %v1971_v41, %v1961_v1  ;;  %v2462_v41 = vld [vmem:[%s4886_s2 + $0x74] sm:$0xf] }
 0x533   : > { %v1975_v17 = vadd.f32 %v1973_v50, %v4566_v40  ;;  %v2078_v50 = vmul.f32 %v2072_v19, %v4689_v15 }
 0x535   : > { %v2105_v47 = vadd.f32 %v2102_v12, %v1975_v17  ;;  %v1978_v23 = vpop.permute.xlu1 %1977 }
 0x536   : > { %v1984_v6 = vmul.f32 %v1978_v23, %v4682_v58  ;;  %v2423_v23 = vld [vmem:[%s4886_s2 + $0x50] sm:$0xf] }
 0x537   : > { %v2107_v43 = vmax.f32 %v2105_v47, 0.0 }
 0x539   : > { %v2145_v49 = vadd.f32 %v2107_v43, %v2095_v25  ;;  %v2458_v25 = vld [vmem:[%s4886_s2 + $0x54] sm:$0xf] }
 0x53e   : > { %v1988_v28 = vpop.permute.xlu1 %1987 }
 0x53f   : > { %v1994_v63 = vmul.f32 %v1988_v28, %v4176_v34 }
 0x541   : > { %v1996_v30 = vadd.f32 %v1994_v63, %v1984_v6  ;;  %v2459_v6 = vld [vmem:[%s4886_s2 + $0x54] sm:$0xf0]  ;;  %v2415_v63 = vld [vmem:[%s4886_s2 + $0x40] sm:$0xf] }
 0x543   : > { %v2008_v56 = vadd.f32 %v2006_v36, %v1996_v30  ;;  %v2457_v36 = vld [vmem:[%s4886_s2 + $0x44] sm:$0xf0]  ;;  %v2456_v30 = vld [vmem:[%s4886_s2 + $0x44] sm:$0xf] }
 0x545   : > { %v4733_v38 = vadd.f32 %v2008_v56, %v4508_v61  ;;  %v2416_v56 = vor.u32 %v2457_v36, %v2415_v63 }
 0x547   : > { %v2004_v40 = vpop.permute.xlu1 %2003 }
 0x548   : > { %v2007_v48 = vmul.f32 %v2004_v40, %v4698_v27  ;;  %v2420_v40 = vor.u32 %v2456_v30, %v2417_v62 }
 0x54a   : > { %v2009_v14 = vadd.f32 %v2007_v48, %v1997_v52  ;;  %v2407_v48 = vld [vmem:[%s4886_s2 + $0x30] sm:$0xf] }
 0x54c   : > { %v2011_v60 = vadd.f32 %v2009_v14, %v4640_v39  ;;  %v2030_v39 = vmul.f32 %v4692_v21, %v4176_v34  ;;  %v2431_v34 = vld [vmem:[%s4886_s2 + $0x60] sm:$0xf]  ;;  %v2455_v14 = vld [vmem:[%s4886_s2 + $0x34] sm:$0xf0] }
 0x54e   : > { %v2117_v57 = vadd.f32 %v2114_v31, %v2011_v60  ;;  %v2032_v45 = vadd.f32 %v2030_v39, %v2020_v29  ;;  %v2454_v31 = vld [vmem:[%s4886_s2 + $0x34] sm:$0xf]  ;;  %v2057_v60 = vmul.f32 %v4711_v10, %v4598_v55 }
 0x550   : > { %v2119_v54 = vmax.f32 %v2117_v57, 0.0  ;;  %v2018_v20 = vpop.permute.xlu1 %2017  ;;  %v2408_v57 = vor.u32 %v2455_v14, %v2407_v48  ;;  %v2171_v14 = vld [vmem:[%s4887_s3] sm:$0x3] }
 0x551   : > { %v2021_v3 = vmul.f32 %v2018_v20, %v4598_v55 }
 0x552   : > { %v4740_v2 = vadd.f32 %v2145_v49, %v2119_v54  ;;  %v2424_v49 = vor.u32 %v2459_v6, %v2423_v23 }
 0x553   : > { %v2033_v61 = vadd.f32 %v2031_v32, %v2021_v3  ;;  %v2399_v32 = vld [vmem:[%s4886_s2 + $0x20] sm:$0xf]  ;;  %v2453_v3 = vld [vmem:[%s4886_s2 + $0x24] sm:$0xf0] }
 0x555   : > { %v2045_v18 = vadd.f32 %v2043_v42, %v2033_v61  ;;  %v2452_v61 = vld [vmem:[%s4886_s2 + $0x24] sm:$0xf]  ;;  %v2400_v42 = vor.u32 %v2453_v3, %v2399_v32 }
 0x557   : > { %v4746_v46 = vadd.f32 %v2045_v18, %v4658_v26  ;;  %v2463_v26 = vld [vmem:[%s4886_s2 + $0x74] sm:$0xf0]  ;;  %v2401_v18 = vld [vmem:[%s4886_s2 + $0x28] sm:$0xf0] }
 0x558   : > { %v2440_v1 = vor.u32 %v2463_v26, %v2439_v9  ;;  %v2404_v29 = vor.u32 %v2452_v61, %v2401_v18 }
 0x559   : > { %v2036_v37 = vpop.permute.xlu1 %2035 }
 0x55a   : > { %v2042_v7 = vmul.f32 %v2036_v37, %v4689_v15  ;;  %2257 = vmatpush.bf16.msra.mxu0 %v2440_v1  ;;  %v2433_v15 = vld [vmem:[%s4886_s2 + $0x68] sm:$0xf0]  ;;  %v2448_v1 = vld [vmem:[%s4886_s2 + $0x4] sm:$0xf] }
 0x55b   : > { %v2436_v19 = vor.u32 %v2460_v5, %v2433_v15  ;;  %v5105_v5 = vmov 0  }
 0x55c   : > { %v2044_v0 = vadd.f32 %v2042_v7, %v2032_v45  ;;  %v2391_v45 = vld [vmem:[%s4886_s2 + $0x10] sm:$0xf]  ;;  %v2450_v7 = vld [vmem:[%s4886_s2 + $0x14] sm:$0xf] }
 0x55e   : > { %v4752_v4 = vadd.f32 %v2044_v0, %v4651_v33  ;;  %v2441_v33 = vld [vmem:[%s4886_s2 + $0x78] sm:$0xf0] }
 0x55f   : > { %v2444_v24 = vor.u32 %v2462_v41, %v2441_v33 }
 0x561   : > { %2271 = vmatpush.bf16.msra.mxu1 %v2444_v24 }
 0x562   : > { %v2050_v53 = vpop.permute.xlu1 %2049 }
 0x563   : > { %v2056_v21 = vmul.f32 %v2050_v53, %v4682_v58  ;;  %v2461_v58 = vld [vmem:[%s4886_s2 + $0x64] sm:$0xf0]  ;;  %v2393_v53 = vld [vmem:[%s4886_s2 + $0x18] sm:$0xf0] }
 0x564   : > { %v2432_v17 = vor.u32 %v2461_v58, %v2431_v34  ;;  %v2396_v9 = vor.u32 %v2450_v7, %v2393_v53  ;;  %v2892_v34 = vld [vmem:[%s3074_s22 + $0x8] sm:$0xff]  ;;  %v2122_v58 = vpop.permute.xlu0 %2121 }
 0x565   : > { %v2068_v12 = vadd.f32 %v2066_v35, %v2056_v21  ;;  %2272 = vmatpush.bf16.msra.mxu1 %v2436_v19  ;;  %v2383_v35 = vld [vmem:[%s4886_s2] sm:$0xf]  ;;  %v2449_v21 = vld [vmem:[%s4886_s2 + $0x4] sm:$0xf0]  ;;  %vm2285_vm3 = vcmp.gt.f32.partialorder %v2892_v34, 0.5  ;;  %v2128_v19 = vadd.f32 %v2122_v58, %v4752_v4 }
 0x566   : > { %2258 = vmatpush.bf16.msra.mxu0 %v2432_v17  ;;  %v2134_v17 = vpop.permute.xlu2 %2133 }
 0x567   : > { %v2080_v13 = vadd.f32 %v2078_v50, %v2068_v12 }
 0x569   : > { %v4782_v47 = vadd.f32 %v2080_v13, %v4678_v11  ;;  %v2425_v11 = vld [vmem:[%s4886_s2 + $0x58] sm:$0xf0]  ;;  %v2288_v13 = vsel %vm2286_vm2, 1, %v5105_v5 }
 0x56a   : > { %v2428_v28 = vor.u32 %v2458_v25, %v2425_v11  ;;  %2259 = vmatpush.bf16.msra.mxu0 %v2424_v49  ;;  %2293 = vperm.xlu0 %2886, %v2288_v13  }
 0x56b   : > { %v2064_v43 = vpop.permute.xlu1 %2063  ;;  %v2140_v6 = vadd.f32 %v2134_v17, %v4782_v47 }
 0x56c   : > { %2273 = vmatpush.bf16.msra.mxu1 %v2428_v28  ;;  %v2067_v52 = vmul.f32 %v2064_v43, %v4437_v51  ;;  %v2409_v51 = vld [vmem:[%s4886_s2 + $0x38] sm:$0xf0]  ;;  %v2130_v43 = vmax.f32 %v2128_v19, 0.0 }
 0x56d   : > { %v2412_v20 = vor.u32 %v2454_v31, %v2409_v51  ;;  %v2142_v49 = vmax.f32 %v2140_v6, 0.0  ;;  %v2173_v31 = vperm.slane %v2171_v14, 0 }
 0x56e   : > { %2260 = vmatpush.bf16.msra.mxu0 %v2416_v56  ;;  %v2069_v55 = vadd.f32 %v2067_v52, %v2057_v60  ;;  %v2174_v60 = vperm.slane %v2171_v14, 1 }
 0x570   : > { %2274 = vmatpush.bf16.msra.mxu1 %v2420_v40 }
 0x572   : > { %2261 = vmatpush.bf16.msra.mxu0 %v2408_v57 }
 0x574   : > { %v2076_v54 = vpop.permute.xlu1 %2075  ;;  %2275 = vmatpush.bf16.msra.mxu1 %v2412_v20 }
 0x575   : > { %v2079_v10 = vmul.f32 %v2076_v54, %v4698_v27  ;;  %v2451_v27 = vld [vmem:[%s4886_s2 + $0x14] sm:$0xf0] }
 0x576   : > { %2262 = vmatpush.bf16.msra.mxu0 %v2400_v42  ;;  %v2392_v0 = vor.u32 %v2451_v27, %v2391_v45 }
 0x577   : > { %v2081_v39 = vadd.f32 %v2079_v10, %v2069_v55 }
 0x578   : > { %2276 = vmatpush.bf16.msra.mxu1 %v2404_v29 }
 0x579   : > { %v2083_v37 = vadd.f32 %v2081_v39, %v4669_v16  ;;  %v2092_v16 = vadd.f32 %v4722_v22, %v4717_v8  ;;  %v2384_v8 = vor.u32 %v2449_v21, %v2383_v35  ;;  %v2385_v22 = vld [vmem:[%s4886_s2 + $0x8] sm:$0xf0] }
 0x57a   : > { %2263 = vmatpush.bf16.msra.mxu0 %v2392_v0  ;;  %v2388_v33 = vor.u32 %v2448_v1, %v2385_v22 }
 0x57b   : > { %v2094_v24 = vmax.f32 %v2092_v16, 0.0 }
 0x57c   : > { %2277 = vmatpush.bf16.msra.mxu1 %v2396_v9 }
 0x57d   : > { %v2098_v26 = vpop.permute.xlu1 %2097 }
 0x57e   : > { %v2104_v41 = vadd.f32 %v2098_v26, %v4695_v59  ;;  %2264 = vmatpush.bf16.msra.mxu0 %v2384_v8  ;;  %v2287_v59 = vsel %vm2285_vm3, 1, %v5105_v5 }
 0x57f   : > { %2290 = vperm.xlu2 %2885, %v2287_v59  }
 0x580   : > { %v2106_v50 = vmax.f32 %v2104_v41, 0.0  ;;  %2278 = vmatpush.bf16.msra.mxu1 %v2388_v33 }
 0x582   : > { %v2144_v12 = vadd.f32 %v2106_v50, %v2094_v24 }
 0x586   : > { %v2110_v15 = vpop.permute.xlu1 %2109 }
 0x587   : > { %v2116_v23 = vadd.f32 %v2110_v15, %v4733_v38 }
 0x589   : > { %v2118_v25 = vmax.f32 %v2116_v23, 0.0 }
 0x58b   : > { %v2146_v44 = vadd.f32 %v2144_v12, %v2118_v25 }
 0x58d   : > { %v2148_v11 = vadd.f32 %v2146_v44, %v2130_v43 }
 0x58f   : > { %v2126_v28 = vpop.permute.xlu1 %2125  ;;  %v2150_v63 = vadd.f32 %v2148_v11, %v2142_v49 }
 0x590   : > { %v2129_v36 = vadd.f32 %v2126_v28, %v4746_v46 }
 0x591   : > { %v2152_v38 = vmul.f32 0.2, %v2150_v63 }
 0x592   : > { %v2131_v30 = vmax.f32 %v2129_v36, 0.0 }
 0x594   : > { %v2149_v56 = vadd.f32 %v4740_v2, %v2131_v30 }
 0x598   : > { %v2138_v62 = vpop.permute.xlu1 %2137 }
 0x599   : > { %v2141_v40 = vadd.f32 %v2138_v62, %v2083_v37 }
 0x59b   : > { %v2143_v52 = vmax.f32 %v2141_v40, 0.0 }
 0x59d   : > { %v2151_v4 = vadd.f32 %v2149_v56, %v2143_v52 }
 0x59f   : > { %v2153_v48 = vmul.f32 0.2, %v2151_v4 }
 0x5a1   : > { %v2154_v47 = vpack.c.bf16 %v2153_v48, %v2152_v38 }
 0x5a3   : > { %2265 = vmatmul.bf16.vlgmr.msra.gmra.mxu0 %v2154_v47  ;;  %2279 = vmatmul.bf16.vlgmr.msra.gmra.mxu1 %v2154_v47 }
 0x5d9   : > { %v2291_v46 = vpop.permute.xlu2 %2290 }
 0x5da   : > { %vm2295_vm4 = vcmp.eq.s32.totalorder %v2291_v46, 1 }
 0x5dc   : > { %v2294_v32 = vpop.permute.xlu0 %2293 }
 0x5dd   : > { %vm2296_vm5 = vcmp.eq.s32.totalorder %v2294_v32, 1 }
 0x620   : > { %v2266_v57 = vpop.f32.mrf.mxu0  ;;  %v2280_v51 = vpop.f32.mrf.mxu1 }
 0x621   : > { %v2267_v2 = vadd.f32 %v2266_v57, %v2173_v31  ;;  %v2281_v54 = vadd.f32 %v2280_v51, %v2174_v60 }
 0x623   : > { %v2297_v20 = vsel %vm2295_vm4, %v2267_v2, %v2281_v54 }
 0x624   : > { %2299 = vst [vmem:[%s224_s29] sm:$0xff] %v2297_v20 }
 0x628   : > { %v2268_v3 = vpop.f32.mrf.mxu0  ;;  %v2282_v61 = vpop.f32.mrf.mxu1 }
 0x629   : > { %v2269_v55 = vadd.f32 %v2268_v3, %v2173_v31  ;;  %v2283_v10 = vadd.f32 %v2282_v61, %v2174_v60 }
 0x62b   : > { %v2298_v42 = vsel %vm2296_vm5, %v2269_v55, %v2283_v10 }
 0x62c   : > { %2300 = vst [vmem:[%s224_s29 + $0x8] sm:$0xff] %v2298_v42 }
 0x62d PF: > { %s14_s15 = sadd.s32 1, %s2899_s15  }
 0x62e   : > { %p11_p4 = scmp.ge.s32.totalorder %s14_s15, 4  }
 0x630   :  { %13 = sbr.rel (!%p11_p4) target bundleno = 1 (0x1), region = 69 }

</bundles_post_ra>
